<compile_context>
chip_gen: v5e
topology: v5e:2x2
jax: 0.10.0
libtpu: 0.0.40
codegen_flags: <defaults>
</compile_context>

<pallas_src>
import functools
import math

import jax
import jax.numpy as jnp
from jax.experimental import pallas as pl
from jax.experimental.pallas import tpu as pltpu

_EPS = 1e-6
_NEG_INF = -1e9


def _default_vmem_limit() -> int:
    """Generation-aware VMEM budget: ~3/4 of physical VMEM, clamped to [32, 112] MiB."""
    try:
        cap = int(pltpu.get_tpu_info().vmem_capacity_bytes)
    except Exception:
        cap = 64 * 1024 * 1024          # conservative (v7x-sized) fallback
    return max(32 * 1024 * 1024, min((cap * 3) // 4, 112 * 1024 * 1024))


_VMEM_LIMIT = _default_vmem_limit()


def _fit_tile(dim: int, target: int, align: int) -> int:
    """Largest tile <= target that is a multiple of `align` and divides `dim`; else full dim."""
    if dim <= target:
        return dim
    t = (target // align) * align
    while t >= align:
        if dim % t == 0:
            return t
        t -= align
    return dim


# ----------------------------------------------------------------------------
# Positional-encoding table (matches the PyTorch precompute):
#   pe[p, 2k] = sin(p / 10000^(2k/d)),  pe[p, 2k+1] = cos(p / 10000^(2k/d))
# ----------------------------------------------------------------------------
def make_positional_encoding(position: int, d_model: int) -> jnp.ndarray:
    pos = jnp.arange(position, dtype=jnp.float32)[:, None]
    i = jnp.arange(d_model, dtype=jnp.float32)[None, :]
    angles = 1.0 / jnp.power(
        jnp.float32(10000.0), 2.0 * jnp.floor(i / 2.0) / jnp.float32(d_model))
    angle_rads = pos * angles
    even = (jnp.arange(d_model) % 2) == 0
    pe = jnp.where(even[None, :], jnp.sin(angle_rads), jnp.cos(angle_rads))
    return pe[None].astype(jnp.float32)          # (1, position, d_model)


# ----------------------------------------------------------------------------
# Mask helpers (same semantics as the PyTorch functions)
# ----------------------------------------------------------------------------
def create_padding_mask(x):
    mask = (x == 0).astype(jnp.float32)
    return mask[:, None, None, :]                # (B, 1, 1, S)


def create_look_ahead_mask(x):
    seq_len = x.shape[1]
    look_ahead = jnp.triu(jnp.ones((seq_len, seq_len), jnp.float32), k=1)
    padding = create_padding_mask(x)
    return jnp.maximum(look_ahead[None, None, :, :], padding)   # (B, 1, S, S)


# ----------------------------------------------------------------------------
# Kernel 1: fused  out = x * sqrt(d_model) + PE   (lane-dense, row-tiled, aliased)
# ----------------------------------------------------------------------------
def _scale_posenc_kernel(x_ref, pe_ref, o_ref, *, scale):
    # x_ref: (TB, S*D) rows; pe_ref: (1, S*D) broadcast along sublanes.
    o_ref[...] = x_ref[...] * scale + pe_ref[...]


def embed_scale_posenc(x, pos_encoding):
    """x: (B, S, D); pos_encoding: (1, P, D) with P >= S."""
    B, S, D = x.shape
    row = S * D
    scale = math.sqrt(D)
    x2d = x.reshape(B, row)
    pe2d = pos_encoding[0, :S, :].reshape(1, row)

    itemsize = jnp.dtype(x.dtype).itemsize
    row_bytes = row * itemsize
    budget = max(8 * 1024 * 1024, _VMEM_LIMIT // 2)
    # resident ~= 2 double-buffered copies of (x tile + out tile) + the PE row
    tb = max(1, (budget - row_bytes) // (4 * row_bytes))
    if tb >= B:
        tb = B                        # full batch dim -> "full array dim" tiling exemption
    else:
        tb = max(8, (tb // 8) * 8)    # keep sublane tile a multiple of 8 (may slightly exceed
                                      # the hand budget; vmem_limit_bytes still bounds it)
    grid = (pl.cdiv(B, tb),)

    out2d = pl.pallas_call(
        functools.partial(_scale_posenc_kernel, scale=scale),
        out_shape=jax.ShapeDtypeStruct((B, row), x.dtype),
        grid=grid,
        in_specs=[
            pl.BlockSpec((tb, row), lambda i: (i, 0)),
            pl.BlockSpec((1, row), lambda i: (0, 0)),
        ],
        out_specs=pl.BlockSpec((tb, row), lambda i: (i, 0)),
        input_output_aliases={0: 0},
        compiler_params=pltpu.CompilerParams(
            dimension_semantics=("parallel",),
            vmem_limit_bytes=_VMEM_LIMIT,
        ),
    )(x2d, pe2d)
    return out2d.reshape(B, S, D)


# ----------------------------------------------------------------------------
# Kernel 2: tiled linear  y = x @ w + b      grid = (M//tm, N//tn, K//tk)
# ----------------------------------------------------------------------------
def _matmul_bias_kernel(x_ref, w_ref, b_ref, o_ref, acc_ref):
    @pl.when(pl.program_id(2) == 0)
    def _():
        acc_ref[...] = jnp.zeros_like(acc_ref)

    acc_ref[...] += jnp.dot(x_ref[...], w_ref[...], preferred_element_type=jnp.float32)

    @pl.when(pl.program_id(2) == pl.num_programs(2) - 1)
    def _():
        o_ref[...] = (acc_ref[...] + b_ref[...]).astype(o_ref.dtype)


def linear(x2d, w, b, *, tm_target=256, tn_target=256, tk_target=512):
    M, K = x2d.shape
    N = w.shape[1]
    tm = _fit_tile(M, tm_target, 8)
    tn = _fit_tile(N, tn_target, 128)
    tk = _fit_tile(K, tk_target, 128)
    grid = (M // tm, N // tn, K // tk)
    return pl.pallas_call(
        _matmul_bias_kernel,
        out_shape=jax.ShapeDtypeStruct((M, N), x2d.dtype),
        grid=grid,
        in_specs=[
            pl.BlockSpec((tm, tk), lambda i, j, k: (i, k)),
            pl.BlockSpec((tk, tn), lambda i, j, k: (k, j)),
            pl.BlockSpec((1, tn), lambda i, j, k: (0, j)),
        ],
        out_specs=pl.BlockSpec((tm, tn), lambda i, j, k: (i, j)),
        scratch_shapes=[pltpu.VMEM((tm, tn), jnp.float32)],
        compiler_params=pltpu.CompilerParams(
            dimension_semantics=("parallel", "parallel", "arbitrary"),
            vmem_limit_bytes=_VMEM_LIMIT,
        ),
    )(x2d, w, b.reshape(1, N))


# ----------------------------------------------------------------------------
# Kernel 3: per-batch attention over all heads, lane-dense (Sq, D) output.
# q/k/v refs are D-wide column windows of (possibly packed) projection outputs,
# selected via BlockSpec column-block indices -> no head split/merge transposes.
# ----------------------------------------------------------------------------
def _attention_kernel(q_ref, k_ref, v_ref, m_ref, o_ref, *, num_heads, inv_sqrt_dh):
    q = q_ref[...]                      # (Sq, D)
    k = k_ref[...]                      # (Skv, D)
    v = v_ref[...]                      # (Skv, D)
    neg = m_ref[...] * _NEG_INF         # (1 or Sq, Skv), broadcast over rows
    dh = q.shape[-1] // num_heads

    # TODO(synk): add flash-style Skv tiling with online softmax for long sequences;
    # at these sizes the full (Sq, Skv) logits block fits VMEM comfortably.
    outs = []
    for h in range(num_heads):          # static unroll; batches heads within one grid step
        qh = q[:, h * dh:(h + 1) * dh]
        kh = k[:, h * dh:(h + 1) * dh]
        vh = v[:, h * dh:(h + 1) * dh]
        logits = jax.lax.dot_general(
            qh, kh, (((1,), (1,)), ((), ())), preferred_element_type=jnp.float32
        ) * inv_sqrt_dh
        logits = logits + neg
        logits = logits - jnp.max(logits, axis=-1, keepdims=True)
        p = jnp.exp(logits)
        attn = p * pl.reciprocal(jnp.sum(p, axis=-1, keepdims=True), approx=True)
        outs.append(jnp.dot(attn, vh, preferred_element_type=jnp.float32))
    o_ref[...] = jnp.concatenate(outs, axis=-1).astype(o_ref.dtype)


def attention_context(q_arr, q_blk, k_arr, k_blk, v_arr, v_blk, mask3, num_heads, d_model):
    """q/k/v_arr: (B, S, n*D) packed projections; *_blk selects the D-wide column block.
    mask3: (B, 1 or Sq, Skv) additive-style {0,1} mask. Returns (B, Sq, D)."""
    B, Sq = q_arr.shape[0], q_arr.shape[1]
    Skv = k_arr.shape[1]
    mq = mask3.shape[1]
    dh = d_model // num_heads
    kernel = functools.partial(_attention_kernel, num_heads=num_heads,
                               inv_sqrt_dh=1.0 / math.sqrt(dh))
    return pl.pallas_call(
        kernel,
        out_shape=jax.ShapeDtypeStruct((B, Sq, d_model), q_arr.dtype),
        grid=(B,),
        in_specs=[
            pl.BlockSpec((None, Sq, d_model), lambda b, qb=q_blk: (b, 0, qb)),
            pl.BlockSpec((None, Skv, d_model), lambda b, kb=k_blk: (b, 0, kb)),
            pl.BlockSpec((None, Skv, d_model), lambda b, vb=v_blk: (b, 0, vb)),
            pl.BlockSpec((None, mq, Skv), lambda b: (b, 0, 0)),
        ],
        out_specs=pl.BlockSpec((None, Sq, d_model), lambda b: (b, 0, 0)),
        compiler_params=pltpu.CompilerParams(
            dimension_semantics=("parallel",),
            vmem_limit_bytes=_VMEM_LIMIT,
        ),
    )(q_arr, k_arr, v_arr, mask3)


def _maybe_slice(arr, blk, d_model):
    """If D is not lane-aligned, materialize the column slice so the attention
    BlockSpec's last dim equals the full array dim (keeps the (8,128) rule happy)."""
    if arr.shape[-1] == d_model:
        return arr, 0
    if d_model % 128 == 0:
        return arr, blk
    return arr[..., blk * d_model:(blk + 1) * d_model], 0


# ----------------------------------------------------------------------------
# Kernel 4: fused  LayerNorm( x @ Wo + bo + residual )   — row-tiled, weights resident
# ----------------------------------------------------------------------------
def _proj_res_ln_kernel(x_ref, w_ref, b_ref, r_ref, g_ref, beta_ref, o_ref, *, eps):
    y = (jnp.dot(x_ref[...], w_ref[...], preferred_element_type=jnp.float32)
         + b_ref[...] + r_ref[...])
    mu = jnp.mean(y, axis=-1, keepdims=True)
    var = jnp.mean(jnp.square(y - mu), axis=-1, keepdims=True)
    y = (y - mu) * jax.lax.rsqrt(var + eps)
    o_ref[...] = (y * g_ref[...] + beta_ref[...]).astype(o_ref.dtype)


def proj_residual_layernorm(x2d, w, b, resid2d, gamma, beta, *, tm_target=256):
    M, K = x2d.shape
    N = w.shape[1]
    tm = _fit_tile(M, tm_target, 8)
    grid = (M // tm,)
    return pl.pallas_call(
        functools.partial(_proj_res_ln_kernel, eps=_EPS),
        out_shape=jax.ShapeDtypeStruct((M, N), x2d.dtype),
        grid=grid,
        in_specs=[
            pl.BlockSpec((tm, K), lambda i: (i, 0)),
            pl.BlockSpec((K, N), lambda i: (0, 0)),      # weight stays VMEM-resident
            pl.BlockSpec((1, N), lambda i: (0, 0)),
            pl.BlockSpec((tm, N), lambda i: (i, 0)),
            pl.BlockSpec((1, N), lambda i: (0, 0)),
            pl.BlockSpec((1, N), lambda i: (0, 0)),
        ],
        out_specs=pl.BlockSpec((tm, N), lambda i: (i, 0)),
        compiler_params=pltpu.CompilerParams(
            dimension_semantics=("parallel",),
            vmem_limit_bytes=_VMEM_LIMIT,
        ),
    )(x2d, w, b.reshape(1, N), resid2d, gamma.reshape(1, N), beta.reshape(1, N))


# ----------------------------------------------------------------------------
# Kernel 5: fused  LayerNorm( relu(x@W1+b1)@W2 + b2 + x )   — row-tiled, weights resident
# ----------------------------------------------------------------------------
def _ffn_res_ln_kernel(x_ref, w1_ref, b1_ref, w2_ref, b2_ref, g_ref, beta_ref, o_ref, *, eps):
    x = x_ref[...]
    h = jnp.maximum(
        jnp.dot(x, w1_ref[...], preferred_element_type=jnp.float32) + b1_ref[...], 0.0)
    y = (jnp.dot(h, w2_ref[...], preferred_element_type=jnp.float32)
         + b2_ref[...] + x)
    mu = jnp.mean(y, axis=-1, keepdims=True)
    var = jnp.mean(jnp.square(y - mu), axis=-1, keepdims=True)
    y = (y - mu) * jax.lax.rsqrt(var + eps)
    o_ref[...] = (y * g_ref[...] + beta_ref[...]).astype(o_ref.dtype)


def ffn_residual_layernorm(x2d, w1, b1, w2, b2, gamma, beta, *, tm_target=256):
    # TODO(synk): for very large dff, tile dff as an "arbitrary" reduction axis of the
    # second matmul instead of holding W1/W2 fully resident.
    M, D = x2d.shape
    dff = w1.shape[1]
    tm = _fit_tile(M, tm_target, 8)
    grid = (M // tm,)
    return pl.pallas_call(
        functools.partial(_ffn_res_ln_kernel, eps=_EPS),
        out_shape=jax.ShapeDtypeStruct((M, D), x2d.dtype),
        grid=grid,
        in_specs=[
            pl.BlockSpec((tm, D), lambda i: (i, 0)),
            pl.BlockSpec((D, dff), lambda i: (0, 0)),    # weights stay VMEM-resident
            pl.BlockSpec((1, dff), lambda i: (0, 0)),
            pl.BlockSpec((dff, D), lambda i: (0, 0)),
            pl.BlockSpec((1, D), lambda i: (0, 0)),
            pl.BlockSpec((1, D), lambda i: (0, 0)),
            pl.BlockSpec((1, D), lambda i: (0, 0)),
        ],
        out_specs=pl.BlockSpec((tm, D), lambda i: (i, 0)),
        compiler_params=pltpu.CompilerParams(
            dimension_semantics=("parallel",),
            vmem_limit_bytes=_VMEM_LIMIT,
        ),
    )(x2d, w1, b1.reshape(1, dff), w2, b2.reshape(1, D),
      gamma.reshape(1, D), beta.reshape(1, D))


# ----------------------------------------------------------------------------
# Module-level wrappers
# ----------------------------------------------------------------------------
def multi_head_attention(query, key, value, mask, p, residual, ln, num_heads):
    B, Sq, D = query.shape
    Skv = key.shape[1]
    Sv = value.shape[1]
    assert D % num_heads == 0

    if (query is key) and (key is value):
        # Self-attention: fused QKV projection (x read once).
        w = jnp.concatenate([p["q"]["w"], p["k"]["w"], p["v"]["w"]], axis=1)
        b = jnp.concatenate([p["q"]["b"], p["k"]["b"], p["v"]["b"]], axis=0)
        qkv = linear(query.reshape(B * Sq, D), w, b).reshape(B, Sq, 3 * D)
        q_arr, q_blk = qkv, 0
        k_arr, k_blk = qkv, 1
        v_arr, v_blk = qkv, 2
    elif query is key:
        # Cross-attention as in the reference module: q and k share the same source.
        w = jnp.concatenate([p["q"]["w"], p["k"]["w"]], axis=1)
        b = jnp.concatenate([p["q"]["b"], p["k"]["b"]], axis=0)
        qk = linear(query.reshape(B * Sq, D), w, b).reshape(B, Sq, 2 * D)
        v_arr = linear(value.reshape(B * Sv, D), p["v"]["w"], p["v"]["b"]).reshape(B, Sv, D)
        q_arr, q_blk = qk, 0
        k_arr, k_blk = qk, 1
        v_blk = 0
    else:
        q_arr = linear(query.reshape(B * Sq, D), p["q"]["w"], p["q"]["b"]).reshape(B, Sq, D)
        k_arr = linear(key.reshape(B * Skv, D), p["k"]["w"], p["k"]["b"]).reshape(B, Skv, D)
        v_arr = linear(value.reshape(B * Sv, D), p["v"]["w"], p["v"]["b"]).reshape(B, Sv, D)
        q_blk = k_blk = v_blk = 0

    q_arr, q_blk = _maybe_slice(q_arr, q_blk, D)
    k_arr, k_blk = _maybe_slice(k_arr, k_blk, D)
    v_arr, v_blk = _maybe_slice(v_arr, v_blk, D)

    # (B,1,Sq,Skv) or (B,1,1,Skv)  ->  (B, Sq or 1, Skv); broadcast happens in-kernel.
    mask3 = mask.astype(query.dtype).reshape(B, -1, Skv)

    ctx2d = attention_context(q_arr, q_blk, k_arr, k_blk, v_arr, v_blk,
                              mask3, num_heads, D).reshape(B * Sq, D)

    # output dense + dropout(identity, eval) + residual + layernorm, fused
    out = proj_residual_layernorm(
        ctx2d, p["o"]["w"], p["o"]["b"],
        residual.reshape(B * Sq, D), ln["gamma"], ln["beta"])
    return out.reshape(B, Sq, D)


def decoder_layer(x, enc_output, look_ahead_mask, padding_mask, p, num_heads):
    out1 = multi_head_attention(x, x, x, look_ahead_mask,
                                p["mha1"], residual=x, ln=p["ln1"], num_heads=num_heads)
    # Cross-attention uses (query=enc, key=enc, value=out1), exactly as the reference module.
    out2 = multi_head_attention(enc_output, enc_output, out1, padding_mask,
                                p["mha2"], residual=out1, ln=p["ln2"], num_heads=num_heads)
    B, S, D = out2.shape
    out3 = ffn_residual_layernorm(out2.reshape(B * S, D),
                                  p["ffn1"]["w"], p["ffn1"]["b"],
                                  p["ffn2"]["w"], p["ffn2"]["b"],
                                  p["ln3"]["gamma"], p["ln3"]["beta"])
    return out3.reshape(B, S, D)


def decoder_forward(tokens, enc_output, look_ahead_mask, padding_mask, params, num_heads):
    # TODO(synk): embedding row gather stays in the JAX wrapper (tiny table); dropout is
    # identity (eval mode).
    x = jnp.take(params["embedding"], tokens, axis=0)             # (B, S, D)
    x = embed_scale_posenc(x, params["pos_encoding"])             # fused x*sqrt(D) + PE
    for layer_p in params["layers"]:
        x = decoder_layer(x, enc_output, look_ahead_mask, padding_mask, layer_p, num_heads)
    return x


# ----------------------------------------------------------------------------
# Parameter construction (deterministic)
# ----------------------------------------------------------------------------
def _dense_params(key, fan_in, fan_out):
    wk, bk = jax.random.split(key)
    return {"w": jax.random.normal(wk, (fan_in, fan_out), jnp.float32) * 0.05,
            "b": jax.random.normal(bk, (fan_out,), jnp.float32) * 0.05}


def _mha_params(key, d_model):
    kq, kk, kv, ko = jax.random.split(key, 4)
    return {"q": _dense_params(kq, d_model, d_model),
            "k": _dense_params(kk, d_model, d_model),
            "v": _dense_params(kv, d_model, d_model),
            "o": _dense_params(ko, d_model, d_model)}


def _ln_params(d_model):
    return {"gamma": jnp.ones((d_model,), jnp.float32),
            "beta": jnp.zeros((d_model,), jnp.float32)}


def _layer_params(key, d_model, dff):
    k1, k2, k3, k4 = jax.random.split(key, 4)
    return {"mha1": _mha_params(k1, d_model),
            "mha2": _mha_params(k2, d_model),
            "ffn1": _dense_params(k3, d_model, dff),
            "ffn2": _dense_params(k4, dff, d_model),
            "ln1": _ln_params(d_model),
            "ln2": _ln_params(d_model),
            "ln3": _ln_params(d_model)}


def init_params(key, vocab_size, num_layers, dff, d_model):
    k_emb, k_layers = jax.random.split(key)
    layer_keys = jax.random.split(k_layers, num_layers)
    return {"embedding": jax.random.normal(k_emb, (vocab_size, d_model), jnp.float32),
            "pos_encoding": make_positional_encoding(vocab_size, d_model),
            "layers": [_layer_params(k, d_model, dff) for k in layer_keys]}


# ----------------------------------------------------------------------------
# Pure-JAX reference (same math, no Pallas) for correctness check
# ----------------------------------------------------------------------------
def _ref_linear(x, w, b):
    return jnp.dot(x, w, precision=jax.lax.Precision.HIGHEST) + b


def _ref_mha(query, key, value, mask, p, num_heads):
    B, Sq, D = query.shape
    Skv = key.shape[1]
    dh = D // num_heads
    q = _ref_linear(query, p["q"]["w"], p["q"]["b"]).reshape(B, Sq, num_heads, dh).transpose(0, 2, 1, 3)
    k = _ref_linear(key, p["k"]["w"], p["k"]["b"]).reshape(B, Skv, num_heads, dh).transpose(0, 2, 1, 3)
    v = _ref_linear(value, p["v"]["w"], p["v"]["b"]).reshape(B, Skv, num_heads, dh).transpose(0, 2, 1, 3)
    logits = jnp.einsum("bhqd,bhkd->bhqk", q, k,
                        precision=jax.lax.Precision.HIGHEST) / jnp.sqrt(jnp.float32(dh))
    logits = logits + mask * _NEG_INF
    attn = jax.nn.softmax(logits, axis=-1)
    ctx = jnp.einsum("bhqk,bhkd->bhqd", attn, v, precision=jax.lax.Precision.HIGHEST)
    ctx = ctx.transpose(0, 2, 1, 3).reshape(B, Sq, D)
    return _ref_linear(ctx, p["o"]["w"], p["o"]["b"])


def _ref_layernorm(x, gamma, beta):
    mu = jnp.mean(x, axis=-1, keepdims=True)
    var = jnp.mean(jnp.square(x - mu), axis=-1, keepdims=True)
    return (x - mu) / jnp.sqrt(var + _EPS) * gamma + beta


def decoder_reference(tokens, enc_output, look_ahead_mask, padding_mask, params, num_heads):
    d_model = params["embedding"].shape[1]
    x = jnp.take(params["embedding"], tokens, axis=0) * jnp.sqrt(jnp.float32(d_model))
    x = x + params["pos_encoding"][:, : tokens.shape[1], :]
    for p in params["layers"]:
        attn1 = _ref_mha(x, x, x, look_ahead_mask, p["mha1"], num_heads)
        out1 = _ref_layernorm(attn1 + x, p["ln1"]["gamma"], p["ln1"]["beta"])
        attn2 = _ref_mha(enc_output, enc_output, out1, padding_mask, p["mha2"], num_heads)
        out2 = _ref_layernorm(attn2 + out1, p["ln2"]["gamma"], p["ln2"]["beta"])
        h = jnp.maximum(_ref_linear(out2, p["ffn1"]["w"], p["ffn1"]["b"]), 0.0)
        ffn = _ref_linear(h, p["ffn2"]["w"], p["ffn2"]["b"])
        x = _ref_layernorm(ffn + out2, p["ln3"]["gamma"], p["ln3"]["beta"])
    return x


if __name__ == "__main__":
    # Small, but lane-aligned (d_model multiple of 128) so the packed-QKV column-window
    # BlockSpecs are exercised. dh = 32.
    batch, seq, d_model, num_heads, dff, num_layers, vocab_size = 2, 8, 128, 4, 256, 2, 16

    root = jax.random.PRNGKey(0)
    k_tok, k_enc, k_par = jax.random.split(root, 3)

    tokens = jax.random.randint(k_tok, (batch, seq), 1, vocab_size)
    tokens = tokens.at[:, -2:].set(0)            # trailing padding exercises both masks
    enc_output = jax.random.normal(k_enc, (batch, seq, d_model), dtype=jnp.float32)

    params = init_params(k_par, vocab_size, num_layers, dff, d_model)

    look_ahead_mask = create_look_ahead_mask(tokens)
    padding_mask = create_padding_mask(tokens)

    fwd = jax.jit(decoder_forward, static_argnames=("num_heads",))
    out = fwd(tokens, enc_output, look_ahead_mask, padding_mask, params, num_heads=num_heads)
    out = jax.block_until_ready(out)

    ref = decoder_reference(tokens, enc_output, look_ahead_mask, padding_mask, params,
                            num_heads=num_heads)

    assert out.shape == (batch, seq, d_model)
    assert bool(jnp.all(jnp.isfinite(out)))
    # tolerance covers the EUP approx-reciprocal softmax normalization
    assert bool(jnp.allclose(out, ref, atol=3e-3, rtol=3e-3)), (
        f"mismatch vs reference, max abs err = {float(jnp.max(jnp.abs(out - ref)))}")

    print("KERNEL_OK")
</pallas_src>

<mosaic_0001>
module attributes {stable_mosaic.version = 11 : i64} {
  func.func @_attention_kernel(%arg0: i32, %arg1: memref<1x8x128xf32, #tpu.memory_space<vmem>>, %arg2: memref<1x8x128xf32, #tpu.memory_space<vmem>>, %arg3: memref<1x8x128xf32, #tpu.memory_space<vmem>>, %arg4: memref<1x8x8xf32, #tpu.memory_space<vmem>>, %arg5: memref<1x8x128xf32, #tpu.memory_space<vmem>>) attributes {dimension_semantics = [#tpu.dimension_semantics<parallel>], iteration_bounds = array<i64: 2>, scalar_prefetch = 0 : i64, scratch_operands = 0 : i64, tpu.core_type = #tpu.core_type<tc>, window_params = [{transform_indices = @transform_0, window_bounds = array<i64: 1, 8, 128>}, {transform_indices = @transform_1, window_bounds = array<i64: 1, 8, 128>}, {transform_indices = @transform_2, window_bounds = array<i64: 1, 8, 128>}, {transform_indices = @transform_3, window_bounds = array<i64: 1, 8, 8>}, {transform_indices = @transform_4, window_bounds = array<i64: 1, 8, 128>}]} {
    %c0 = arith.constant 0 : index
    %c0_0 = arith.constant 0 : index
    %c0_1 = arith.constant 0 : index
    %0 = vector.load %arg1[%c0, %c0_0, %c0_1] : memref<1x8x128xf32, #tpu.memory_space<vmem>>, vector<1x8x128xf32>
    %1 = vector.shape_cast %0 : vector<1x8x128xf32> to vector<8x128xf32>
    %c0_2 = arith.constant 0 : index
    %c0_3 = arith.constant 0 : index
    %c0_4 = arith.constant 0 : index
    %2 = vector.load %arg2[%c0_2, %c0_3, %c0_4] : memref<1x8x128xf32, #tpu.memory_space<vmem>>, vector<1x8x128xf32>
    %3 = vector.shape_cast %2 : vector<1x8x128xf32> to vector<8x128xf32>
    %c0_5 = arith.constant 0 : index
    %c0_6 = arith.constant 0 : index
    %c0_7 = arith.constant 0 : index
    %4 = vector.load %arg3[%c0_5, %c0_6, %c0_7] : memref<1x8x128xf32, #tpu.memory_space<vmem>>, vector<1x8x128xf32>
    %5 = vector.shape_cast %4 : vector<1x8x128xf32> to vector<8x128xf32>
    %c0_8 = arith.constant 0 : index
    %c0_9 = arith.constant 0 : index
    %c0_10 = arith.constant 0 : index
    %6 = vector.load %arg4[%c0_8, %c0_9, %c0_10] : memref<1x8x8xf32, #tpu.memory_space<vmem>>, vector<1x8x8xf32>
    %7 = vector.shape_cast %6 : vector<1x8x8xf32> to vector<8x8xf32>
    %cst = arith.constant -1.000000e+09 : f32
    %8 = vector.broadcast %cst : f32 to vector<8x8xf32>
    %9 = arith.mulf %7, %8 : vector<8x8xf32>
    %10 = vector.extract_strided_slice %1 {offsets = [0, 0], sizes = [8, 32], strides = [1, 1]} : vector<8x128xf32> to vector<8x32xf32>
    %11 = vector.extract_strided_slice %3 {offsets = [0, 0], sizes = [8, 32], strides = [1, 1]} : vector<8x128xf32> to vector<8x32xf32>
    %12 = vector.extract_strided_slice %5 {offsets = [0, 0], sizes = [8, 32], strides = [1, 1]} : vector<8x128xf32> to vector<8x32xf32>
    %cst_11 = arith.constant dense<0.000000e+00> : vector<8x8xf32>
    %13 = tpu.matmul %10, %11, %cst_11 {dimension_numbers = #tpu.dot_dimension_numbers<[1], [1], [0], [0], [0, 0, 1, 0], [], []>} : vector<8x32xf32>, vector<8x32xf32>, vector<8x8xf32> -> vector<8x8xf32>
    %cst_12 = arith.constant 0.176776692 : f32
    %14 = vector.broadcast %cst_12 : f32 to vector<8x8xf32>
    %15 = arith.mulf %13, %14 : vector<8x8xf32>
    %16 = arith.addf %15, %9 : vector<8x8xf32>
    %cst_13 = arith.constant dense<0xFF800000> : vector<8xf32>
    %17 = vector.multi_reduction <maximumf>, %16, %cst_13 [1] : vector<8x8xf32> to vector<8xf32>
    %18 = vector.shape_cast %17 : vector<8xf32> to vector<8x1xf32>
    %19 = vector.broadcast %18 : vector<8x1xf32> to vector<8x8xf32>
    %20 = arith.subf %16, %19 : vector<8x8xf32>
    %21 = math.exp %20 : vector<8x8xf32>
    %cst_14 = arith.constant dense<0.000000e+00> : vector<8xf32>
    %22 = vector.multi_reduction <add>, %21, %cst_14 [1] : vector<8x8xf32> to vector<8xf32>
    %23 = vector.shape_cast %22 : vector<8xf32> to vector<8x1xf32>
    %24 = tpu.reciprocal %23 {approx = true} : vector<8x1xf32> -> vector<8x1xf32>
    %25 = vector.broadcast %24 : vector<8x1xf32> to vector<8x8xf32>
    %26 = arith.mulf %21, %25 : vector<8x8xf32>
    %cst_15 = arith.constant dense<0.000000e+00> : vector<8x32xf32>
    %27 = tpu.matmul %26, %12, %cst_15 {dimension_numbers = #tpu.dot_dimension_numbers<[1], [0], [0], [1], [0, 0, 1, 1], [], []>} : vector<8x8xf32>, vector<8x32xf32>, vector<8x32xf32> -> vector<8x32xf32>
    %28 = vector.extract_strided_slice %1 {offsets = [0, 32], sizes = [8, 32], strides = [1, 1]} : vector<8x128xf32> to vector<8x32xf32>
    %29 = vector.extract_strided_slice %3 {offsets = [0, 32], sizes = [8, 32], strides = [1, 1]} : vector<8x128xf32> to vector<8x32xf32>
    %30 = vector.extract_strided_slice %5 {offsets = [0, 32], sizes = [8, 32], strides = [1, 1]} : vector<8x128xf32> to vector<8x32xf32>
    %cst_16 = arith.constant dense<0.000000e+00> : vector<8x8xf32>
    %31 = tpu.matmul %28, %29, %cst_16 {dimension_numbers = #tpu.dot_dimension_numbers<[1], [1], [0], [0], [0, 0, 1, 0], [], []>} : vector<8x32xf32>, vector<8x32xf32>, vector<8x8xf32> -> vector<8x8xf32>
    %cst_17 = arith.constant 0.176776692 : f32
    %32 = vector.broadcast %cst_17 : f32 to vector<8x8xf32>
    %33 = arith.mulf %31, %32 : vector<8x8xf32>
    %34 = arith.addf %33, %9 : vector<8x8xf32>
    %cst_18 = arith.constant dense<0xFF800000> : vector<8xf32>
    %35 = vector.multi_reduction <maximumf>, %34, %cst_18 [1] : vector<8x8xf32> to vector<8xf32>
    %36 = vector.shape_cast %35 : vector<8xf32> to vector<8x1xf32>
    %37 = vector.broadcast %36 : vector<8x1xf32> to vector<8x8xf32>
    %38 = arith.subf %34, %37 : vector<8x8xf32>
    %39 = math.exp %38 : vector<8x8xf32>
    %cst_19 = arith.constant dense<0.000000e+00> : vector<8xf32>
    %40 = vector.multi_reduction <add>, %39, %cst_19 [1] : vector<8x8xf32> to vector<8xf32>
    %41 = vector.shape_cast %40 : vector<8xf32> to vector<8x1xf32>
    %42 = tpu.reciprocal %41 {approx = true} : vector<8x1xf32> -> vector<8x1xf32>
    %43 = vector.broadcast %42 : vector<8x1xf32> to vector<8x8xf32>
    %44 = arith.mulf %39, %43 : vector<8x8xf32>
    %cst_20 = arith.constant dense<0.000000e+00> : vector<8x32xf32>
    %45 = tpu.matmul %44, %30, %cst_20 {dimension_numbers = #tpu.dot_dimension_numbers<[1], [0], [0], [1], [0, 0, 1, 1], [], []>} : vector<8x8xf32>, vector<8x32xf32>, vector<8x32xf32> -> vector<8x32xf32>
    %46 = vector.extract_strided_slice %1 {offsets = [0, 64], sizes = [8, 32], strides = [1, 1]} : vector<8x128xf32> to vector<8x32xf32>
    %47 = vector.extract_strided_slice %3 {offsets = [0, 64], sizes = [8, 32], strides = [1, 1]} : vector<8x128xf32> to vector<8x32xf32>
    %48 = vector.extract_strided_slice %5 {offsets = [0, 64], sizes = [8, 32], strides = [1, 1]} : vector<8x128xf32> to vector<8x32xf32>
    %cst_21 = arith.constant dense<0.000000e+00> : vector<8x8xf32>
    %49 = tpu.matmul %46, %47, %cst_21 {dimension_numbers = #tpu.dot_dimension_numbers<[1], [1], [0], [0], [0, 0, 1, 0], [], []>} : vector<8x32xf32>, vector<8x32xf32>, vector<8x8xf32> -> vector<8x8xf32>
    %cst_22 = arith.constant 0.176776692 : f32
    %50 = vector.broadcast %cst_22 : f32 to vector<8x8xf32>
    %51 = arith.mulf %49, %50 : vector<8x8xf32>
    %52 = arith.addf %51, %9 : vector<8x8xf32>
    %cst_23 = arith.constant dense<0xFF800000> : vector<8xf32>
    %53 = vector.multi_reduction <maximumf>, %52, %cst_23 [1] : vector<8x8xf32> to vector<8xf32>
    %54 = vector.shape_cast %53 : vector<8xf32> to vector<8x1xf32>
    %55 = vector.broadcast %54 : vector<8x1xf32> to vector<8x8xf32>
    %56 = arith.subf %52, %55 : vector<8x8xf32>
    %57 = math.exp %56 : vector<8x8xf32>
    %cst_24 = arith.constant dense<0.000000e+00> : vector<8xf32>
    %58 = vector.multi_reduction <add>, %57, %cst_24 [1] : vector<8x8xf32> to vector<8xf32>
    %59 = vector.shape_cast %58 : vector<8xf32> to vector<8x1xf32>
    %60 = tpu.reciprocal %59 {approx = true} : vector<8x1xf32> -> vector<8x1xf32>
    %61 = vector.broadcast %60 : vector<8x1xf32> to vector<8x8xf32>
    %62 = arith.mulf %57, %61 : vector<8x8xf32>
    %cst_25 = arith.constant dense<0.000000e+00> : vector<8x32xf32>
    %63 = tpu.matmul %62, %48, %cst_25 {dimension_numbers = #tpu.dot_dimension_numbers<[1], [0], [0], [1], [0, 0, 1, 1], [], []>} : vector<8x8xf32>, vector<8x32xf32>, vector<8x32xf32> -> vector<8x32xf32>
    %64 = vector.extract_strided_slice %1 {offsets = [0, 96], sizes = [8, 32], strides = [1, 1]} : vector<8x128xf32> to vector<8x32xf32>
    %65 = vector.extract_strided_slice %3 {offsets = [0, 96], sizes = [8, 32], strides = [1, 1]} : vector<8x128xf32> to vector<8x32xf32>
    %66 = vector.extract_strided_slice %5 {offsets = [0, 96], sizes = [8, 32], strides = [1, 1]} : vector<8x128xf32> to vector<8x32xf32>
    %cst_26 = arith.constant dense<0.000000e+00> : vector<8x8xf32>
    %67 = tpu.matmul %64, %65, %cst_26 {dimension_numbers = #tpu.dot_dimension_numbers<[1], [1], [0], [0], [0, 0, 1, 0], [], []>} : vector<8x32xf32>, vector<8x32xf32>, vector<8x8xf32> -> vector<8x8xf32>
    %cst_27 = arith.constant 0.176776692 : f32
    %68 = vector.broadcast %cst_27 : f32 to vector<8x8xf32>
    %69 = arith.mulf %67, %68 : vector<8x8xf32>
    %70 = arith.addf %69, %9 : vector<8x8xf32>
    %cst_28 = arith.constant dense<0xFF800000> : vector<8xf32>
    %71 = vector.multi_reduction <maximumf>, %70, %cst_28 [1] : vector<8x8xf32> to vector<8xf32>
    %72 = vector.shape_cast %71 : vector<8xf32> to vector<8x1xf32>
    %73 = vector.broadcast %72 : vector<8x1xf32> to vector<8x8xf32>
    %74 = arith.subf %70, %73 : vector<8x8xf32>
    %75 = math.exp %74 : vector<8x8xf32>
    %cst_29 = arith.constant dense<0.000000e+00> : vector<8xf32>
    %76 = vector.multi_reduction <add>, %75, %cst_29 [1] : vector<8x8xf32> to vector<8xf32>
    %77 = vector.shape_cast %76 : vector<8xf32> to vector<8x1xf32>
    %78 = tpu.reciprocal %77 {approx = true} : vector<8x1xf32> -> vector<8x1xf32>
    %79 = vector.broadcast %78 : vector<8x1xf32> to vector<8x8xf32>
    %80 = arith.mulf %75, %79 : vector<8x8xf32>
    %cst_30 = arith.constant dense<0.000000e+00> : vector<8x32xf32>
    %81 = tpu.matmul %80, %66, %cst_30 {dimension_numbers = #tpu.dot_dimension_numbers<[1], [0], [0], [1], [0, 0, 1, 1], [], []>} : vector<8x8xf32>, vector<8x32xf32>, vector<8x32xf32> -> vector<8x32xf32>
    %82 = tpu.concatenate %27, %45, %63, %81 in 1 : vector<8x32xf32>, vector<8x32xf32>, vector<8x32xf32>, vector<8x32xf32> -> vector<8x128xf32>
    %c0_31 = arith.constant 0 : index
    %c0_32 = arith.constant 0 : index
    %c0_33 = arith.constant 0 : index
    %83 = vector.load %arg5[%c0_31, %c0_32, %c0_33] : memref<1x8x128xf32, #tpu.memory_space<vmem>>, vector<1x8x128xf32>
    %84 = vector.shape_cast %83 : vector<1x8x128xf32> to vector<8x128xf32>
    %85 = vector.shape_cast %82 : vector<8x128xf32> to vector<1x8x128xf32>
    tpu.vector_store %arg5[%c0_31, %c0_32, %c0_33], %85 {strides = array<i32>} : memref<1x8x128xf32, #tpu.memory_space<vmem>>, vector<1x8x128xf32>,
    return
  }
  func.func @transform_0(%arg0: i32) -> (i32, i32, i32) {
    %c0_i32 = arith.constant 0 : i32
    %c0_i32_0 = arith.constant 0 : i32
    %c0_i32_1 = arith.constant 0 : i32
    return %arg0, %c0_i32, %c0_i32_0 : i32, i32, i32
  }
  func.func @transform_1(%arg0: i32) -> (i32, i32, i32) {
    %c0_i32 = arith.constant 0 : i32
    %c1_i32 = arith.constant 1 : i32
    %c0_i32_0 = arith.constant 0 : i32
    return %arg0, %c0_i32, %c1_i32 : i32, i32, i32
  }
  func.func @transform_2(%arg0: i32) -> (i32, i32, i32) {
    %c0_i32 = arith.constant 0 : i32
    %c2_i32 = arith.constant 2 : i32
    %c0_i32_0 = arith.constant 0 : i32
    return %arg0, %c0_i32, %c2_i32 : i32, i32, i32
  }
  func.func @transform_3(%arg0: i32) -> (i32, i32, i32) {
    %c0_i32 = arith.constant 0 : i32
    %c0_i32_0 = arith.constant 0 : i32
    %c0_i32_1 = arith.constant 0 : i32
    return %arg0, %c0_i32, %c0_i32_0 : i32, i32, i32
  }
  func.func @transform_4(%arg0: i32) -> (i32, i32, i32) {
    %c0_i32 = arith.constant 0 : i32
    %c0_i32_0 = arith.constant 0 : i32
    %c0_i32_1 = arith.constant 0 : i32
    return %arg0, %c0_i32, %c0_i32_0 : i32, i32, i32
  }
}

module attributes {stable_mosaic.version = 11 : i64} {
  func.func @_scale_posenc_kernel(%arg0: i32, %arg1: memref<2x1024xf32, #tpu.memory_space<vmem>>, %arg2: memref<1x1024xf32, #tpu.memory_space<vmem>>, %arg3: memref<2x1024xf32, #tpu.memory_space<vmem>>) attributes {dimension_semantics = [#tpu.dimension_semantics<parallel>], iteration_bounds = array<i64: 1>, scalar_prefetch = 0 : i64, scratch_operands = 0 : i64, tpu.core_type = #tpu.core_type<tc>, window_params = [{transform_indices = @transform_0, window_bounds = array<i64: 2, 1024>}, {pipeline_mode = #tpu.pipeline_mode<synchronous>, transform_indices = @transform_1, window_bounds = array<i64: 1, 1024>}, {transform_indices = @transform_2, window_bounds = array<i64: 2, 1024>}]} {
    %c0 = arith.constant 0 : index
    %c0_0 = arith.constant 0 : index
    %0 = vector.load %arg1[%c0, %c0_0] : memref<2x1024xf32, #tpu.memory_space<vmem>>, vector<2x1024xf32>
    %cst = arith.constant 11.3137083 : f32
    %1 = vector.broadcast %cst : f32 to vector<2x1024xf32>
    %2 = arith.mulf %0, %1 : vector<2x1024xf32>
    %c0_1 = arith.constant 0 : index
    %c0_2 = arith.constant 0 : index
    %3 = vector.load %arg2[%c0_1, %c0_2] : memref<1x1024xf32, #tpu.memory_space<vmem>>, vector<1x1024xf32>
    %4 = vector.broadcast %3 : vector<1x1024xf32> to vector<2x1024xf32>
    %5 = arith.addf %2, %4 : vector<2x1024xf32>
    %c0_3 = arith.constant 0 : index
    %c0_4 = arith.constant 0 : index
    %6 = vector.load %arg3[%c0_3, %c0_4] : memref<2x1024xf32, #tpu.memory_space<vmem>>, vector<2x1024xf32>
    tpu.vector_store %arg3[%c0_3, %c0_4], %5 {strides = array<i32>} : memref<2x1024xf32, #tpu.memory_space<vmem>>, vector<2x1024xf32>,
    return
  }
  func.func @transform_0(%arg0: i32) -> (i32, i32) {
    %c0_i32 = arith.constant 0 : i32
    %c0_i32_0 = arith.constant 0 : i32
    return %arg0, %c0_i32 : i32, i32
  }
  func.func @transform_1(%arg0: i32) -> (i32, i32) {
    %c0_i32 = arith.constant 0 : i32
    %c0_i32_0 = arith.constant 0 : i32
    %c0_i32_1 = arith.constant 0 : i32
    return %c0_i32, %c0_i32_0 : i32, i32
  }
  func.func @transform_2(%arg0: i32) -> (i32, i32) {
    %c0_i32 = arith.constant 0 : i32
    %c0_i32_0 = arith.constant 0 : i32
    return %arg0, %c0_i32 : i32, i32
  }
}

module attributes {stable_mosaic.version = 11 : i64} {
  func.func @_matmul_bias_kernel(%arg0: i32, %arg1: i32, %arg2: i32, %arg3: memref<16x128xf32, #tpu.memory_space<vmem>>, %arg4: memref<128x128xf32, #tpu.memory_space<vmem>>, %arg5: memref<1x128xf32, #tpu.memory_space<vmem>>, %arg6: memref<16x128xf32, #tpu.memory_space<vmem>>, %arg7: memref<16x128xf32, #tpu.memory_space<vmem>>) attributes {dimension_semantics = [#tpu.dimension_semantics<parallel>, #tpu.dimension_semantics<parallel>, #tpu.dimension_semantics<arbitrary>], iteration_bounds = array<i64: 1, 3, 1>, scalar_prefetch = 0 : i64, scratch_operands = 1 : i64, tpu.core_type = #tpu.core_type<tc>, window_params = [{transform_indices = @transform_0, window_bounds = array<i64: 16, 128>}, {transform_indices = @transform_1, window_bounds = array<i64: 128, 128>}, {transform_indices = @transform_2, window_bounds = array<i64: 1, 128>}, {transform_indices = @transform_3, window_bounds = array<i64: 16, 128>}]} {
    %c0_i32 = arith.constant 0 : i32
    %0 = arith.cmpi eq, %arg2, %c0_i32 : i32
    %1 = arith.extui %0 : i1 to i32
    %c0_i32_0 = arith.constant 0 : i32
    %2 = arith.cmpi ne, %1, %c0_i32_0 : i32
    scf.if %2 {
      %cst_10 = arith.constant 0.000000e+00 : f32
      %12 = vector.broadcast %cst_10 : f32 to vector<16x128xf32>
      %c0_11 = arith.constant 0 : index
      %c0_12 = arith.constant 0 : index
      %13 = vector.load %arg7[%c0_11, %c0_12] : memref<16x128xf32, #tpu.memory_space<vmem>>, vector<16x128xf32>
      tpu.vector_store %arg7[%c0_11, %c0_12], %12 {strides = array<i32>} : memref<16x128xf32, #tpu.memory_space<vmem>>, vector<16x128xf32>,
    } else {
    }
    %c0 = arith.constant 0 : index
    %c0_1 = arith.constant 0 : index
    %3 = vector.load %arg7[%c0, %c0_1] : memref<16x128xf32, #tpu.memory_space<vmem>>, vector<16x128xf32>
    %c0_2 = arith.constant 0 : index
    %c0_3 = arith.constant 0 : index
    %4 = vector.load %arg3[%c0_2, %c0_3] : memref<16x128xf32, #tpu.memory_space<vmem>>, vector<16x128xf32>
    %c0_4 = arith.constant 0 : index
    %c0_5 = arith.constant 0 : index
    %5 = vector.load %arg4[%c0_4, %c0_5] : memref<128x128xf32, #tpu.memory_space<vmem>>, vector<128x128xf32>
    %cst = arith.constant dense<0.000000e+00> : vector<16x128xf32>
    %6 = tpu.matmul %4, %5, %cst {dimension_numbers = #tpu.dot_dimension_numbers<[1], [0], [0], [1], [0, 0, 1, 1], [], []>} : vector<16x128xf32>, vector<128x128xf32>, vector<16x128xf32> -> vector<16x128xf32>
    %7 = arith.addf %3, %6 : vector<16x128xf32>
    %c0_6 = arith.constant 0 : index
    %c0_7 = arith.constant 0 : index
    %8 = vector.load %arg7[%c0_6, %c0_7] : memref<16x128xf32, #tpu.memory_space<vmem>>, vector<16x128xf32>
    tpu.vector_store %arg7[%c0_6, %c0_7], %7 {strides = array<i32>} : memref<16x128xf32, #tpu.memory_space<vmem>>, vector<16x128xf32>,
    %c0_i32_8 = arith.constant 0 : i32
    %9 = arith.cmpi eq, %arg2, %c0_i32_8 : i32
    %10 = arith.extui %9 : i1 to i32
    %c0_i32_9 = arith.constant 0 : i32
    %11 = arith.cmpi ne, %10, %c0_i32_9 : i32
    scf.if %11 {
      %c0_10 = arith.constant 0 : index
      %c0_11 = arith.constant 0 : index
      %12 = vector.load %arg7[%c0_10, %c0_11] : memref<16x128xf32, #tpu.memory_space<vmem>>, vector<16x128xf32>
      %c0_12 = arith.constant 0 : index
      %c0_13 = arith.constant 0 : index
      %13 = vector.load %arg5[%c0_12, %c0_13] : memref<1x128xf32, #tpu.memory_space<vmem>>, vector<1x128xf32>
      %14 = vector.broadcast %13 : vector<1x128xf32> to vector<16x128xf32>
      %15 = arith.addf %12, %14 : vector<16x128xf32>
      %c0_14 = arith.constant 0 : index
      %c0_15 = arith.constant 0 : index
      %16 = vector.load %arg6[%c0_14, %c0_15] : memref<16x128xf32, #tpu.memory_space<vmem>>, vector<16x128xf32>
      tpu.vector_store %arg6[%c0_14, %c0_15], %15 {strides = array<i32>} : memref<16x128xf32, #tpu.memory_space<vmem>>, vector<16x128xf32>,
    } else {
    }
    return
  }
  func.func @transform_0(%arg0: i32, %arg1: i32, %arg2: i32) -> (i32, i32) {
    %c0_i32 = arith.constant 0 : i32
    return %arg0, %arg2 : i32, i32
  }
  func.func @transform_1(%arg0: i32, %arg1: i32, %arg2: i32) -> (i32, i32) {
    %c0_i32 = arith.constant 0 : i32
    return %arg2, %arg1 : i32, i32
  }
  func.func @transform_2(%arg0: i32, %arg1: i32, %arg2: i32) -> (i32, i32) {
    %c0_i32 = arith.constant 0 : i32
    %c0_i32_0 = arith.constant 0 : i32
    return %c0_i32, %arg1 : i32, i32
  }
  func.func @transform_3(%arg0: i32, %arg1: i32, %arg2: i32) -> (i32, i32) {
    %c0_i32 = arith.constant 0 : i32
    return %arg0, %arg1 : i32, i32
  }
}

module attributes {stable_mosaic.version = 11 : i64} {
  func.func @_proj_res_ln_kernel(%arg0: i32, %arg1: memref<16x128xf32, #tpu.memory_space<vmem>>, %arg2: memref<128x128xf32, #tpu.memory_space<vmem>>, %arg3: memref<1x128xf32, #tpu.memory_space<vmem>>, %arg4: memref<16x128xf32, #tpu.memory_space<vmem>>, %arg5: memref<1x128xf32, #tpu.memory_space<vmem>>, %arg6: memref<1x128xf32, #tpu.memory_space<vmem>>, %arg7: memref<16x128xf32, #tpu.memory_space<vmem>>) attributes {dimension_semantics = [#tpu.dimension_semantics<parallel>], iteration_bounds = array<i64: 1>, scalar_prefetch = 0 : i64, scratch_operands = 0 : i64, tpu.core_type = #tpu.core_type<tc>, window_params = [{transform_indices = @transform_0, window_bounds = array<i64: 16, 128>}, {pipeline_mode = #tpu.pipeline_mode<synchronous>, transform_indices = @transform_1, window_bounds = array<i64: 128, 128>}, {pipeline_mode = #tpu.pipeline_mode<synchronous>, transform_indices = @transform_2, window_bounds = array<i64: 1, 128>}, {transform_indices = @transform_3, window_bounds = array<i64: 16, 128>}, {pipeline_mode = #tpu.pipeline_mode<synchronous>, transform_indices = @transform_4, window_bounds = array<i64: 1, 128>}, {pipeline_mode = #tpu.pipeline_mode<synchronous>, transform_indices = @transform_5, window_bounds = array<i64: 1, 128>}, {transform_indices = @transform_6, window_bounds = array<i64: 16, 128>}]} {
    %c0 = arith.constant 0 : index
    %c0_0 = arith.constant 0 : index
    %0 = vector.load %arg1[%c0, %c0_0] : memref<16x128xf32, #tpu.memory_space<vmem>>, vector<16x128xf32>
    %c0_1 = arith.constant 0 : index
    %c0_2 = arith.constant 0 : index
    %1 = vector.load %arg2[%c0_1, %c0_2] : memref<128x128xf32, #tpu.memory_space<vmem>>, vector<128x128xf32>
    %cst = arith.constant dense<0.000000e+00> : vector<16x128xf32>
    %2 = tpu.matmul %0, %1, %cst {dimension_numbers = #tpu.dot_dimension_numbers<[1], [0], [0], [1], [0, 0, 1, 1], [], []>} : vector<16x128xf32>, vector<128x128xf32>, vector<16x128xf32> -> vector<16x128xf32>
    %c0_3 = arith.constant 0 : index
    %c0_4 = arith.constant 0 : index
    %3 = vector.load %arg3[%c0_3, %c0_4] : memref<1x128xf32, #tpu.memory_space<vmem>>, vector<1x128xf32>
    %4 = vector.broadcast %3 : vector<1x128xf32> to vector<16x128xf32>
    %5 = arith.addf %2, %4 : vector<16x128xf32>
    %c0_5 = arith.constant 0 : index
    %c0_6 = arith.constant 0 : index
    %6 = vector.load %arg4[%c0_5, %c0_6] : memref<16x128xf32, #tpu.memory_space<vmem>>, vector<16x128xf32>
    %7 = arith.addf %5, %6 : vector<16x128xf32>
    %cst_7 = arith.constant dense<0.000000e+00> : vector<16xf32>
    %8 = vector.multi_reduction <add>, %7, %cst_7 [1] : vector<16x128xf32> to vector<16xf32>
    %9 = vector.shape_cast %8 : vector<16xf32> to vector<16x1xf32>
    %cst_8 = arith.constant 1.280000e+02 : f32
    %10 = vector.broadcast %cst_8 : f32 to vector<16x1xf32>
    %11 = arith.divf %9, %10 : vector<16x1xf32>
    %12 = vector.broadcast %11 : vector<16x1xf32> to vector<16x128xf32>
    %13 = arith.subf %7, %12 : vector<16x128xf32>
    %14 = arith.mulf %13, %13 : vector<16x128xf32>
    %cst_9 = arith.constant dense<0.000000e+00> : vector<16xf32>
    %15 = vector.multi_reduction <add>, %14, %cst_9 [1] : vector<16x128xf32> to vector<16xf32>
    %16 = vector.shape_cast %15 : vector<16xf32> to vector<16x1xf32>
    %cst_10 = arith.constant 1.280000e+02 : f32
    %17 = vector.broadcast %cst_10 : f32 to vector<16x1xf32>
    %18 = arith.divf %16, %17 : vector<16x1xf32>
    %19 = vector.broadcast %11 : vector<16x1xf32> to vector<16x128xf32>
    %20 = arith.subf %7, %19 : vector<16x128xf32>
    %cst_11 = arith.constant 9.99999997E-7 : f32
    %21 = vector.broadcast %cst_11 : f32 to vector<16x1xf32>
    %22 = arith.addf %18, %21 : vector<16x1xf32>
    %23 = math.rsqrt %22 : vector<16x1xf32>
    %24 = vector.broadcast %23 : vector<16x1xf32> to vector<16x128xf32>
    %25 = arith.mulf %20, %24 : vector<16x128xf32>
    %c0_12 = arith.constant 0 : index
    %c0_13 = arith.constant 0 : index
    %26 = vector.load %arg5[%c0_12, %c0_13] : memref<1x128xf32, #tpu.memory_space<vmem>>, vector<1x128xf32>
    %27 = vector.broadcast %26 : vector<1x128xf32> to vector<16x128xf32>
    %28 = arith.mulf %25, %27 : vector<16x128xf32>
    %c0_14 = arith.constant 0 : index
    %c0_15 = arith.constant 0 : index
    %29 = vector.load %arg6[%c0_14, %c0_15] : memref<1x128xf32, #tpu.memory_space<vmem>>, vector<1x128xf32>
    %30 = vector.broadcast %29 : vector<1x128xf32> to vector<16x128xf32>
    %31 = arith.addf %28, %30 : vector<16x128xf32>
    %c0_16 = arith.constant 0 : index
    %c0_17 = arith.constant 0 : index
    %32 = vector.load %arg7[%c0_16, %c0_17] : memref<16x128xf32, #tpu.memory_space<vmem>>, vector<16x128xf32>
    tpu.vector_store %arg7[%c0_16, %c0_17], %31 {strides = array<i32>} : memref<16x128xf32, #tpu.memory_space<vmem>>, vector<16x128xf32>,
    return
  }
  func.func @transform_0(%arg0: i32) -> (i32, i32) {
    %c0_i32 = arith.constant 0 : i32
    %c0_i32_0 = arith.constant 0 : i32
    return %arg0, %c0_i32 : i32, i32
  }
  func.func @transform_1(%arg0: i32) -> (i32, i32) {
    %c0_i32 = arith.constant 0 : i32
    %c0_i32_0 = arith.constant 0 : i32
    %c0_i32_1 = arith.constant 0 : i32
    return %c0_i32, %c0_i32_0 : i32, i32
  }
  func.func @transform_2(%arg0: i32) -> (i32, i32) {
    %c0_i32 = arith.constant 0 : i32
    %c0_i32_0 = arith.constant 0 : i32
    %c0_i32_1 = arith.constant 0 : i32
    return %c0_i32, %c0_i32_0 : i32, i32
  }
  func.func @transform_3(%arg0: i32) -> (i32, i32) {
    %c0_i32 = arith.constant 0 : i32
    %c0_i32_0 = arith.constant 0 : i32
    return %arg0, %c0_i32 : i32, i32
  }
  func.func @transform_4(%arg0: i32) -> (i32, i32) {
    %c0_i32 = arith.constant 0 : i32
    %c0_i32_0 = arith.constant 0 : i32
    %c0_i32_1 = arith.constant 0 : i32
    return %c0_i32, %c0_i32_0 : i32, i32
  }
  func.func @transform_5(%arg0: i32) -> (i32, i32) {
    %c0_i32 = arith.constant 0 : i32
    %c0_i32_0 = arith.constant 0 : i32
    %c0_i32_1 = arith.constant 0 : i32
    return %c0_i32, %c0_i32_0 : i32, i32
  }
  func.func @transform_6(%arg0: i32) -> (i32, i32) {
    %c0_i32 = arith.constant 0 : i32
    %c0_i32_0 = arith.constant 0 : i32
    return %arg0, %c0_i32 : i32, i32
  }
}

module attributes {stable_mosaic.version = 11 : i64} {
  func.func @_matmul_bias_kernel(%arg0: i32, %arg1: i32, %arg2: i32, %arg3: memref<16x128xf32, #tpu.memory_space<vmem>>, %arg4: memref<128x128xf32, #tpu.memory_space<vmem>>, %arg5: memref<1x128xf32, #tpu.memory_space<vmem>>, %arg6: memref<16x128xf32, #tpu.memory_space<vmem>>, %arg7: memref<16x128xf32, #tpu.memory_space<vmem>>) attributes {dimension_semantics = [#tpu.dimension_semantics<parallel>, #tpu.dimension_semantics<parallel>, #tpu.dimension_semantics<arbitrary>], iteration_bounds = array<i64: 1, 1, 1>, scalar_prefetch = 0 : i64, scratch_operands = 1 : i64, tpu.core_type = #tpu.core_type<tc>, window_params = [{transform_indices = @transform_0, window_bounds = array<i64: 16, 128>}, {transform_indices = @transform_1, window_bounds = array<i64: 128, 128>}, {transform_indices = @transform_2, window_bounds = array<i64: 1, 128>}, {transform_indices = @transform_3, window_bounds = array<i64: 16, 128>}]} {
    %c0_i32 = arith.constant 0 : i32
    %0 = arith.cmpi eq, %arg2, %c0_i32 : i32
    %1 = arith.extui %0 : i1 to i32
    %c0_i32_0 = arith.constant 0 : i32
    %2 = arith.cmpi ne, %1, %c0_i32_0 : i32
    scf.if %2 {
      %cst_10 = arith.constant 0.000000e+00 : f32
      %12 = vector.broadcast %cst_10 : f32 to vector<16x128xf32>
      %c0_11 = arith.constant 0 : index
      %c0_12 = arith.constant 0 : index
      %13 = vector.load %arg7[%c0_11, %c0_12] : memref<16x128xf32, #tpu.memory_space<vmem>>, vector<16x128xf32>
      tpu.vector_store %arg7[%c0_11, %c0_12], %12 {strides = array<i32>} : memref<16x128xf32, #tpu.memory_space<vmem>>, vector<16x128xf32>,
    } else {
    }
    %c0 = arith.constant 0 : index
    %c0_1 = arith.constant 0 : index
    %3 = vector.load %arg7[%c0, %c0_1] : memref<16x128xf32, #tpu.memory_space<vmem>>, vector<16x128xf32>
    %c0_2 = arith.constant 0 : index
    %c0_3 = arith.constant 0 : index
    %4 = vector.load %arg3[%c0_2, %c0_3] : memref<16x128xf32, #tpu.memory_space<vmem>>, vector<16x128xf32>
    %c0_4 = arith.constant 0 : index
    %c0_5 = arith.constant 0 : index
    %5 = vector.load %arg4[%c0_4, %c0_5] : memref<128x128xf32, #tpu.memory_space<vmem>>, vector<128x128xf32>
    %cst = arith.constant dense<0.000000e+00> : vector<16x128xf32>
    %6 = tpu.matmul %4, %5, %cst {dimension_numbers = #tpu.dot_dimension_numbers<[1], [0], [0], [1], [0, 0, 1, 1], [], []>} : vector<16x128xf32>, vector<128x128xf32>, vector<16x128xf32> -> vector<16x128xf32>
    %7 = arith.addf %3, %6 : vector<16x128xf32>
    %c0_6 = arith.constant 0 : index
    %c0_7 = arith.constant 0 : index
    %8 = vector.load %arg7[%c0_6, %c0_7] : memref<16x128xf32, #tpu.memory_space<vmem>>, vector<16x128xf32>
    tpu.vector_store %arg7[%c0_6, %c0_7], %7 {strides = array<i32>} : memref<16x128xf32, #tpu.memory_space<vmem>>, vector<16x128xf32>,
    %c0_i32_8 = arith.constant 0 : i32
    %9 = arith.cmpi eq, %arg2, %c0_i32_8 : i32
    %10 = arith.extui %9 : i1 to i32
    %c0_i32_9 = arith.constant 0 : i32
    %11 = arith.cmpi ne, %10, %c0_i32_9 : i32
    scf.if %11 {
      %c0_10 = arith.constant 0 : index
      %c0_11 = arith.constant 0 : index
      %12 = vector.load %arg7[%c0_10, %c0_11] : memref<16x128xf32, #tpu.memory_space<vmem>>, vector<16x128xf32>
      %c0_12 = arith.constant 0 : index
      %c0_13 = arith.constant 0 : index
      %13 = vector.load %arg5[%c0_12, %c0_13] : memref<1x128xf32, #tpu.memory_space<vmem>>, vector<1x128xf32>
      %14 = vector.broadcast %13 : vector<1x128xf32> to vector<16x128xf32>
      %15 = arith.addf %12, %14 : vector<16x128xf32>
      %c0_14 = arith.constant 0 : index
      %c0_15 = arith.constant 0 : index
      %16 = vector.load %arg6[%c0_14, %c0_15] : memref<16x128xf32, #tpu.memory_space<vmem>>, vector<16x128xf32>
      tpu.vector_store %arg6[%c0_14, %c0_15], %15 {strides = array<i32>} : memref<16x128xf32, #tpu.memory_space<vmem>>, vector<16x128xf32>,
    } else {
    }
    return
  }
  func.func @transform_0(%arg0: i32, %arg1: i32, %arg2: i32) -> (i32, i32) {
    %c0_i32 = arith.constant 0 : i32
    return %arg0, %arg2 : i32, i32
  }
  func.func @transform_1(%arg0: i32, %arg1: i32, %arg2: i32) -> (i32, i32) {
    %c0_i32 = arith.constant 0 : i32
    return %arg2, %arg1 : i32, i32
  }
  func.func @transform_2(%arg0: i32, %arg1: i32, %arg2: i32) -> (i32, i32) {
    %c0_i32 = arith.constant 0 : i32
    %c0_i32_0 = arith.constant 0 : i32
    return %c0_i32, %arg1 : i32, i32
  }
  func.func @transform_3(%arg0: i32, %arg1: i32, %arg2: i32) -> (i32, i32) {
    %c0_i32 = arith.constant 0 : i32
    return %arg0, %arg1 : i32, i32
  }
}

module attributes {stable_mosaic.version = 11 : i64} {
  func.func @_attention_kernel(%arg0: i32, %arg1: memref<1x8x128xf32, #tpu.memory_space<vmem>>, %arg2: memref<1x8x128xf32, #tpu.memory_space<vmem>>, %arg3: memref<1x8x128xf32, #tpu.memory_space<vmem>>, %arg4: memref<1x1x8xf32, #tpu.memory_space<vmem>>, %arg5: memref<1x8x128xf32, #tpu.memory_space<vmem>>) attributes {dimension_semantics = [#tpu.dimension_semantics<parallel>], iteration_bounds = array<i64: 2>, scalar_prefetch = 0 : i64, scratch_operands = 0 : i64, tpu.core_type = #tpu.core_type<tc>, window_params = [{transform_indices = @transform_0, window_bounds = array<i64: 1, 8, 128>}, {transform_indices = @transform_1, window_bounds = array<i64: 1, 8, 128>}, {transform_indices = @transform_2, window_bounds = array<i64: 1, 8, 128>}, {transform_indices = @transform_3, window_bounds = array<i64: 1, 1, 8>}, {transform_indices = @transform_4, window_bounds = array<i64: 1, 8, 128>}]} {
    %c0 = arith.constant 0 : index
    %c0_0 = arith.constant 0 : index
    %c0_1 = arith.constant 0 : index
    %0 = vector.load %arg1[%c0, %c0_0, %c0_1] : memref<1x8x128xf32, #tpu.memory_space<vmem>>, vector<1x8x128xf32>
    %1 = vector.shape_cast %0 : vector<1x8x128xf32> to vector<8x128xf32>
    %c0_2 = arith.constant 0 : index
    %c0_3 = arith.constant 0 : index
    %c0_4 = arith.constant 0 : index
    %2 = vector.load %arg2[%c0_2, %c0_3, %c0_4] : memref<1x8x128xf32, #tpu.memory_space<vmem>>, vector<1x8x128xf32>
    %3 = vector.shape_cast %2 : vector<1x8x128xf32> to vector<8x128xf32>
    %c0_5 = arith.constant 0 : index
    %c0_6 = arith.constant 0 : index
    %c0_7 = arith.constant 0 : index
    %4 = vector.load %arg3[%c0_5, %c0_6, %c0_7] : memref<1x8x128xf32, #tpu.memory_space<vmem>>, vector<1x8x128xf32>
    %5 = vector.shape_cast %4 : vector<1x8x128xf32> to vector<8x128xf32>
    %c0_8 = arith.constant 0 : index
    %c0_9 = arith.constant 0 : index
    %c0_10 = arith.constant 0 : index
    %6 = vector.load %arg4[%c0_8, %c0_9, %c0_10] : memref<1x1x8xf32, #tpu.memory_space<vmem>>, vector<1x1x8xf32>
    %7 = vector.shape_cast %6 : vector<1x1x8xf32> to vector<1x8xf32>
    %cst = arith.constant -1.000000e+09 : f32
    %8 = vector.broadcast %cst : f32 to vector<1x8xf32>
    %9 = arith.mulf %7, %8 : vector<1x8xf32>
    %10 = vector.extract_strided_slice %1 {offsets = [0, 0], sizes = [8, 32], strides = [1, 1]} : vector<8x128xf32> to vector<8x32xf32>
    %11 = vector.extract_strided_slice %3 {offsets = [0, 0], sizes = [8, 32], strides = [1, 1]} : vector<8x128xf32> to vector<8x32xf32>
    %12 = vector.extract_strided_slice %5 {offsets = [0, 0], sizes = [8, 32], strides = [1, 1]} : vector<8x128xf32> to vector<8x32xf32>
    %cst_11 = arith.constant dense<0.000000e+00> : vector<8x8xf32>
    %13 = tpu.matmul %10, %11, %cst_11 {dimension_numbers = #tpu.dot_dimension_numbers<[1], [1], [0], [0], [0, 0, 1, 0], [], []>} : vector<8x32xf32>, vector<8x32xf32>, vector<8x8xf32> -> vector<8x8xf32>
    %cst_12 = arith.constant 0.176776692 : f32
    %14 = vector.broadcast %cst_12 : f32 to vector<8x8xf32>
    %15 = arith.mulf %13, %14 : vector<8x8xf32>
    %16 = vector.broadcast %9 : vector<1x8xf32> to vector<8x8xf32>
    %17 = arith.addf %15, %16 : vector<8x8xf32>
    %cst_13 = arith.constant dense<0xFF800000> : vector<8xf32>
    %18 = vector.multi_reduction <maximumf>, %17, %cst_13 [1] : vector<8x8xf32> to vector<8xf32>
    %19 = vector.shape_cast %18 : vector<8xf32> to vector<8x1xf32>
    %20 = vector.broadcast %19 : vector<8x1xf32> to vector<8x8xf32>
    %21 = arith.subf %17, %20 : vector<8x8xf32>
    %22 = math.exp %21 : vector<8x8xf32>
    %cst_14 = arith.constant dense<0.000000e+00> : vector<8xf32>
    %23 = vector.multi_reduction <add>, %22, %cst_14 [1] : vector<8x8xf32> to vector<8xf32>
    %24 = vector.shape_cast %23 : vector<8xf32> to vector<8x1xf32>
    %25 = tpu.reciprocal %24 {approx = true} : vector<8x1xf32> -> vector<8x1xf32>
    %26 = vector.broadcast %25 : vector<8x1xf32> to vector<8x8xf32>
    %27 = arith.mulf %22, %26 : vector<8x8xf32>
    %cst_15 = arith.constant dense<0.000000e+00> : vector<8x32xf32>
    %28 = tpu.matmul %27, %12, %cst_15 {dimension_numbers = #tpu.dot_dimension_numbers<[1], [0], [0], [1], [0, 0, 1, 1], [], []>} : vector<8x8xf32>, vector<8x32xf32>, vector<8x32xf32> -> vector<8x32xf32>
    %29 = vector.extract_strided_slice %1 {offsets = [0, 32], sizes = [8, 32], strides = [1, 1]} : vector<8x128xf32> to vector<8x32xf32>
    %30 = vector.extract_strided_slice %3 {offsets = [0, 32], sizes = [8, 32], strides = [1, 1]} : vector<8x128xf32> to vector<8x32xf32>
    %31 = vector.extract_strided_slice %5 {offsets = [0, 32], sizes = [8, 32], strides = [1, 1]} : vector<8x128xf32> to vector<8x32xf32>
    %cst_16 = arith.constant dense<0.000000e+00> : vector<8x8xf32>
    %32 = tpu.matmul %29, %30, %cst_16 {dimension_numbers = #tpu.dot_dimension_numbers<[1], [1], [0], [0], [0, 0, 1, 0], [], []>} : vector<8x32xf32>, vector<8x32xf32>, vector<8x8xf32> -> vector<8x8xf32>
    %cst_17 = arith.constant 0.176776692 : f32
    %33 = vector.broadcast %cst_17 : f32 to vector<8x8xf32>
    %34 = arith.mulf %32, %33 : vector<8x8xf32>
    %35 = vector.broadcast %9 : vector<1x8xf32> to vector<8x8xf32>
    %36 = arith.addf %34, %35 : vector<8x8xf32>
    %cst_18 = arith.constant dense<0xFF800000> : vector<8xf32>
    %37 = vector.multi_reduction <maximumf>, %36, %cst_18 [1] : vector<8x8xf32> to vector<8xf32>
    %38 = vector.shape_cast %37 : vector<8xf32> to vector<8x1xf32>
    %39 = vector.broadcast %38 : vector<8x1xf32> to vector<8x8xf32>
    %40 = arith.subf %36, %39 : vector<8x8xf32>
    %41 = math.exp %40 : vector<8x8xf32>
    %cst_19 = arith.constant dense<0.000000e+00> : vector<8xf32>
    %42 = vector.multi_reduction <add>, %41, %cst_19 [1] : vector<8x8xf32> to vector<8xf32>
    %43 = vector.shape_cast %42 : vector<8xf32> to vector<8x1xf32>
    %44 = tpu.reciprocal %43 {approx = true} : vector<8x1xf32> -> vector<8x1xf32>
    %45 = vector.broadcast %44 : vector<8x1xf32> to vector<8x8xf32>
    %46 = arith.mulf %41, %45 : vector<8x8xf32>
    %cst_20 = arith.constant dense<0.000000e+00> : vector<8x32xf32>
    %47 = tpu.matmul %46, %31, %cst_20 {dimension_numbers = #tpu.dot_dimension_numbers<[1], [0], [0], [1], [0, 0, 1, 1], [], []>} : vector<8x8xf32>, vector<8x32xf32>, vector<8x32xf32> -> vector<8x32xf32>
    %48 = vector.extract_strided_slice %1 {offsets = [0, 64], sizes = [8, 32], strides = [1, 1]} : vector<8x128xf32> to vector<8x32xf32>
    %49 = vector.extract_strided_slice %3 {offsets = [0, 64], sizes = [8, 32], strides = [1, 1]} : vector<8x128xf32> to vector<8x32xf32>
    %50 = vector.extract_strided_slice %5 {offsets = [0, 64], sizes = [8, 32], strides = [1, 1]} : vector<8x128xf32> to vector<8x32xf32>
    %cst_21 = arith.constant dense<0.000000e+00> : vector<8x8xf32>
    %51 = tpu.matmul %48, %49, %cst_21 {dimension_numbers = #tpu.dot_dimension_numbers<[1], [1], [0], [0], [0, 0, 1, 0], [], []>} : vector<8x32xf32>, vector<8x32xf32>, vector<8x8xf32> -> vector<8x8xf32>
    %cst_22 = arith.constant 0.176776692 : f32
    %52 = vector.broadcast %cst_22 : f32 to vector<8x8xf32>
    %53 = arith.mulf %51, %52 : vector<8x8xf32>
    %54 = vector.broadcast %9 : vector<1x8xf32> to vector<8x8xf32>
    %55 = arith.addf %53, %54 : vector<8x8xf32>
    %cst_23 = arith.constant dense<0xFF800000> : vector<8xf32>
    %56 = vector.multi_reduction <maximumf>, %55, %cst_23 [1] : vector<8x8xf32> to vector<8xf32>
    %57 = vector.shape_cast %56 : vector<8xf32> to vector<8x1xf32>
    %58 = vector.broadcast %57 : vector<8x1xf32> to vector<8x8xf32>
    %59 = arith.subf %55, %58 : vector<8x8xf32>
    %60 = math.exp %59 : vector<8x8xf32>
    %cst_24 = arith.constant dense<0.000000e+00> : vector<8xf32>
    %61 = vector.multi_reduction <add>, %60, %cst_24 [1] : vector<8x8xf32> to vector<8xf32>
    %62 = vector.shape_cast %61 : vector<8xf32> to vector<8x1xf32>
    %63 = tpu.reciprocal %62 {approx = true} : vector<8x1xf32> -> vector<8x1xf32>
    %64 = vector.broadcast %63 : vector<8x1xf32> to vector<8x8xf32>
    %65 = arith.mulf %60, %64 : vector<8x8xf32>
    %cst_25 = arith.constant dense<0.000000e+00> : vector<8x32xf32>
    %66 = tpu.matmul %65, %50, %cst_25 {dimension_numbers = #tpu.dot_dimension_numbers<[1], [0], [0], [1], [0, 0, 1, 1], [], []>} : vector<8x8xf32>, vector<8x32xf32>, vector<8x32xf32> -> vector<8x32xf32>
    %67 = vector.extract_strided_slice %1 {offsets = [0, 96], sizes = [8, 32], strides = [1, 1]} : vector<8x128xf32> to vector<8x32xf32>
    %68 = vector.extract_strided_slice %3 {offsets = [0, 96], sizes = [8, 32], strides = [1, 1]} : vector<8x128xf32> to vector<8x32xf32>
    %69 = vector.extract_strided_slice %5 {offsets = [0, 96], sizes = [8, 32], strides = [1, 1]} : vector<8x128xf32> to vector<8x32xf32>
    %cst_26 = arith.constant dense<0.000000e+00> : vector<8x8xf32>
    %70 = tpu.matmul %67, %68, %cst_26 {dimension_numbers = #tpu.dot_dimension_numbers<[1], [1], [0], [0], [0, 0, 1, 0], [], []>} : vector<8x32xf32>, vector<8x32xf32>, vector<8x8xf32> -> vector<8x8xf32>
    %cst_27 = arith.constant 0.176776692 : f32
    %71 = vector.broadcast %cst_27 : f32 to vector<8x8xf32>
    %72 = arith.mulf %70, %71 : vector<8x8xf32>
    %73 = vector.broadcast %9 : vector<1x8xf32> to vector<8x8xf32>
    %74 = arith.addf %72, %73 : vector<8x8xf32>
    %cst_28 = arith.constant dense<0xFF800000> : vector<8xf32>
    %75 = vector.multi_reduction <maximumf>, %74, %cst_28 [1] : vector<8x8xf32> to vector<8xf32>
    %76 = vector.shape_cast %75 : vector<8xf32> to vector<8x1xf32>
    %77 = vector.broadcast %76 : vector<8x1xf32> to vector<8x8xf32>
    %78 = arith.subf %74, %77 : vector<8x8xf32>
    %79 = math.exp %78 : vector<8x8xf32>
    %cst_29 = arith.constant dense<0.000000e+00> : vector<8xf32>
    %80 = vector.multi_reduction <add>, %79, %cst_29 [1] : vector<8x8xf32> to vector<8xf32>
    %81 = vector.shape_cast %80 : vector<8xf32> to vector<8x1xf32>
    %82 = tpu.reciprocal %81 {approx = true} : vector<8x1xf32> -> vector<8x1xf32>
    %83 = vector.broadcast %82 : vector<8x1xf32> to vector<8x8xf32>
    %84 = arith.mulf %79, %83 : vector<8x8xf32>
    %cst_30 = arith.constant dense<0.000000e+00> : vector<8x32xf32>
    %85 = tpu.matmul %84, %69, %cst_30 {dimension_numbers = #tpu.dot_dimension_numbers<[1], [0], [0], [1], [0, 0, 1, 1], [], []>} : vector<8x8xf32>, vector<8x32xf32>, vector<8x32xf32> -> vector<8x32xf32>
    %86 = tpu.concatenate %28, %47, %66, %85 in 1 : vector<8x32xf32>, vector<8x32xf32>, vector<8x32xf32>, vector<8x32xf32> -> vector<8x128xf32>
    %c0_31 = arith.constant 0 : index
    %c0_32 = arith.constant 0 : index
    %c0_33 = arith.constant 0 : index
    %87 = vector.load %arg5[%c0_31, %c0_32, %c0_33] : memref<1x8x128xf32, #tpu.memory_space<vmem>>, vector<1x8x128xf32>
    %88 = vector.shape_cast %87 : vector<1x8x128xf32> to vector<8x128xf32>
    %89 = vector.shape_cast %86 : vector<8x128xf32> to vector<1x8x128xf32>
    tpu.vector_store %arg5[%c0_31, %c0_32, %c0_33], %89 {strides = array<i32>} : memref<1x8x128xf32, #tpu.memory_space<vmem>>, vector<1x8x128xf32>,
    return
  }
  func.func @transform_0(%arg0: i32) -> (i32, i32, i32) {
    %c0_i32 = arith.constant 0 : i32
    %c0_i32_0 = arith.constant 0 : i32
    %c0_i32_1 = arith.constant 0 : i32
    return %arg0, %c0_i32, %c0_i32_0 : i32, i32, i32
  }
  func.func @transform_1(%arg0: i32) -> (i32, i32, i32) {
    %c0_i32 = arith.constant 0 : i32
    %c1_i32 = arith.constant 1 : i32
    %c0_i32_0 = arith.constant 0 : i32
    return %arg0, %c0_i32, %c1_i32 : i32, i32, i32
  }
  func.func @transform_2(%arg0: i32) -> (i32, i32, i32) {
    %c0_i32 = arith.constant 0 : i32
    %c0_i32_0 = arith.constant 0 : i32
    %c0_i32_1 = arith.constant 0 : i32
    return %arg0, %c0_i32, %c0_i32_0 : i32, i32, i32
  }
  func.func @transform_3(%arg0: i32) -> (i32, i32, i32) {
    %c0_i32 = arith.constant 0 : i32
    %c0_i32_0 = arith.constant 0 : i32
    %c0_i32_1 = arith.constant 0 : i32
    return %arg0, %c0_i32, %c0_i32_0 : i32, i32, i32
  }
  func.func @transform_4(%arg0: i32) -> (i32, i32, i32) {
    %c0_i32 = arith.constant 0 : i32
    %c0_i32_0 = arith.constant 0 : i32
    %c0_i32_1 = arith.constant 0 : i32
    return %arg0, %c0_i32, %c0_i32_0 : i32, i32, i32
  }
}

module attributes {stable_mosaic.version = 11 : i64} {
  func.func @_matmul_bias_kernel(%arg0: i32, %arg1: i32, %arg2: i32, %arg3: memref<16x128xf32, #tpu.memory_space<vmem>>, %arg4: memref<128x256xf32, #tpu.memory_space<vmem>>, %arg5: memref<1x256xf32, #tpu.memory_space<vmem>>, %arg6: memref<16x256xf32, #tpu.memory_space<vmem>>, %arg7: memref<16x256xf32, #tpu.memory_space<vmem>>) attributes {dimension_semantics = [#tpu.dimension_semantics<parallel>, #tpu.dimension_semantics<parallel>, #tpu.dimension_semantics<arbitrary>], iteration_bounds = array<i64: 1, 1, 1>, scalar_prefetch = 0 : i64, scratch_operands = 1 : i64, tpu.core_type = #tpu.core_type<tc>, window_params = [{transform_indices = @transform_0, window_bounds = array<i64: 16, 128>}, {transform_indices = @transform_1, window_bounds = array<i64: 128, 256>}, {transform_indices = @transform_2, window_bounds = array<i64: 1, 256>}, {transform_indices = @transform_3, window_bounds = array<i64: 16, 256>}]} {
    %c0_i32 = arith.constant 0 : i32
    %0 = arith.cmpi eq, %arg2, %c0_i32 : i32
    %1 = arith.extui %0 : i1 to i32
    %c0_i32_0 = arith.constant 0 : i32
    %2 = arith.cmpi ne, %1, %c0_i32_0 : i32
    scf.if %2 {
      %cst_10 = arith.constant 0.000000e+00 : f32
      %12 = vector.broadcast %cst_10 : f32 to vector<16x256xf32>
      %c0_11 = arith.constant 0 : index
      %c0_12 = arith.constant 0 : index
      %13 = vector.load %arg7[%c0_11, %c0_12] : memref<16x256xf32, #tpu.memory_space<vmem>>, vector<16x256xf32>
      tpu.vector_store %arg7[%c0_11, %c0_12], %12 {strides = array<i32>} : memref<16x256xf32, #tpu.memory_space<vmem>>, vector<16x256xf32>,
    } else {
    }
    %c0 = arith.constant 0 : index
    %c0_1 = arith.constant 0 : index
    %3 = vector.load %arg7[%c0, %c0_1] : memref<16x256xf32, #tpu.memory_space<vmem>>, vector<16x256xf32>
    %c0_2 = arith.constant 0 : index
    %c0_3 = arith.constant 0 : index
    %4 = vector.load %arg3[%c0_2, %c0_3] : memref<16x128xf32, #tpu.memory_space<vmem>>, vector<16x128xf32>
    %c0_4 = arith.constant 0 : index
    %c0_5 = arith.constant 0 : index
    %5 = vector.load %arg4[%c0_4, %c0_5] : memref<128x256xf32, #tpu.memory_space<vmem>>, vector<128x256xf32>
    %cst = arith.constant dense<0.000000e+00> : vector<16x256xf32>
    %6 = tpu.matmul %4, %5, %cst {dimension_numbers = #tpu.dot_dimension_numbers<[1], [0], [0], [1], [0, 0, 1, 1], [], []>} : vector<16x128xf32>, vector<128x256xf32>, vector<16x256xf32> -> vector<16x256xf32>
    %7 = arith.addf %3, %6 : vector<16x256xf32>
    %c0_6 = arith.constant 0 : index
    %c0_7 = arith.constant 0 : index
    %8 = vector.load %arg7[%c0_6, %c0_7] : memref<16x256xf32, #tpu.memory_space<vmem>>, vector<16x256xf32>
    tpu.vector_store %arg7[%c0_6, %c0_7], %7 {strides = array<i32>} : memref<16x256xf32, #tpu.memory_space<vmem>>, vector<16x256xf32>,
    %c0_i32_8 = arith.constant 0 : i32
    %9 = arith.cmpi eq, %arg2, %c0_i32_8 : i32
    %10 = arith.extui %9 : i1 to i32
    %c0_i32_9 = arith.constant 0 : i32
    %11 = arith.cmpi ne, %10, %c0_i32_9 : i32
    scf.if %11 {
      %c0_10 = arith.constant 0 : index
      %c0_11 = arith.constant 0 : index
      %12 = vector.load %arg7[%c0_10, %c0_11] : memref<16x256xf32, #tpu.memory_space<vmem>>, vector<16x256xf32>
      %c0_12 = arith.constant 0 : index
      %c0_13 = arith.constant 0 : index
      %13 = vector.load %arg5[%c0_12, %c0_13] : memref<1x256xf32, #tpu.memory_space<vmem>>, vector<1x256xf32>
      %14 = vector.broadcast %13 : vector<1x256xf32> to vector<16x256xf32>
      %15 = arith.addf %12, %14 : vector<16x256xf32>
      %c0_14 = arith.constant 0 : index
      %c0_15 = arith.constant 0 : index
      %16 = vector.load %arg6[%c0_14, %c0_15] : memref<16x256xf32, #tpu.memory_space<vmem>>, vector<16x256xf32>
      tpu.vector_store %arg6[%c0_14, %c0_15], %15 {strides = array<i32>} : memref<16x256xf32, #tpu.memory_space<vmem>>, vector<16x256xf32>,
    } else {
    }
    return
  }
  func.func @transform_0(%arg0: i32, %arg1: i32, %arg2: i32) -> (i32, i32) {
    %c0_i32 = arith.constant 0 : i32
    return %arg0, %arg2 : i32, i32
  }
  func.func @transform_1(%arg0: i32, %arg1: i32, %arg2: i32) -> (i32, i32) {
    %c0_i32 = arith.constant 0 : i32
    return %arg2, %arg1 : i32, i32
  }
  func.func @transform_2(%arg0: i32, %arg1: i32, %arg2: i32) -> (i32, i32) {
    %c0_i32 = arith.constant 0 : i32
    %c0_i32_0 = arith.constant 0 : i32
    return %c0_i32, %arg1 : i32, i32
  }
  func.func @transform_3(%arg0: i32, %arg1: i32, %arg2: i32) -> (i32, i32) {
    %c0_i32 = arith.constant 0 : i32
    return %arg0, %arg1 : i32, i32
  }
}

module attributes {stable_mosaic.version = 11 : i64} {
  func.func @_proj_res_ln_kernel(%arg0: i32, %arg1: memref<16x128xf32, #tpu.memory_space<vmem>>, %arg2: memref<128x128xf32, #tpu.memory_space<vmem>>, %arg3: memref<1x128xf32, #tpu.memory_space<vmem>>, %arg4: memref<16x128xf32, #tpu.memory_space<vmem>>, %arg5: memref<1x128xf32, #tpu.memory_space<vmem>>, %arg6: memref<1x128xf32, #tpu.memory_space<vmem>>, %arg7: memref<16x128xf32, #tpu.memory_space<vmem>>) attributes {dimension_semantics = [#tpu.dimension_semantics<parallel>], iteration_bounds = array<i64: 1>, scalar_prefetch = 0 : i64, scratch_operands = 0 : i64, tpu.core_type = #tpu.core_type<tc>, window_params = [{transform_indices = @transform_0, window_bounds = array<i64: 16, 128>}, {pipeline_mode = #tpu.pipeline_mode<synchronous>, transform_indices = @transform_1, window_bounds = array<i64: 128, 128>}, {pipeline_mode = #tpu.pipeline_mode<synchronous>, transform_indices = @transform_2, window_bounds = array<i64: 1, 128>}, {transform_indices = @transform_3, window_bounds = array<i64: 16, 128>}, {pipeline_mode = #tpu.pipeline_mode<synchronous>, transform_indices = @transform_4, window_bounds = array<i64: 1, 128>}, {pipeline_mode = #tpu.pipeline_mode<synchronous>, transform_indices = @transform_5, window_bounds = array<i64: 1, 128>}, {transform_indices = @transform_6, window_bounds = array<i64: 16, 128>}]} {
    %c0 = arith.constant 0 : index
    %c0_0 = arith.constant 0 : index
    %0 = vector.load %arg1[%c0, %c0_0] : memref<16x128xf32, #tpu.memory_space<vmem>>, vector<16x128xf32>
    %c0_1 = arith.constant 0 : index
    %c0_2 = arith.constant 0 : index
    %1 = vector.load %arg2[%c0_1, %c0_2] : memref<128x128xf32, #tpu.memory_space<vmem>>, vector<128x128xf32>
    %cst = arith.constant dense<0.000000e+00> : vector<16x128xf32>
    %2 = tpu.matmul %0, %1, %cst {dimension_numbers = #tpu.dot_dimension_numbers<[1], [0], [0], [1], [0, 0, 1, 1], [], []>} : vector<16x128xf32>, vector<128x128xf32>, vector<16x128xf32> -> vector<16x128xf32>
    %c0_3 = arith.constant 0 : index
    %c0_4 = arith.constant 0 : index
    %3 = vector.load %arg3[%c0_3, %c0_4] : memref<1x128xf32, #tpu.memory_space<vmem>>, vector<1x128xf32>
    %4 = vector.broadcast %3 : vector<1x128xf32> to vector<16x128xf32>
    %5 = arith.addf %2, %4 : vector<16x128xf32>
    %c0_5 = arith.constant 0 : index
    %c0_6 = arith.constant 0 : index
    %6 = vector.load %arg4[%c0_5, %c0_6] : memref<16x128xf32, #tpu.memory_space<vmem>>, vector<16x128xf32>
    %7 = arith.addf %5, %6 : vector<16x128xf32>
    %cst_7 = arith.constant dense<0.000000e+00> : vector<16xf32>
    %8 = vector.multi_reduction <add>, %7, %cst_7 [1] : vector<16x128xf32> to vector<16xf32>
    %9 = vector.shape_cast %8 : vector<16xf32> to vector<16x1xf32>
    %cst_8 = arith.constant 1.280000e+02 : f32
    %10 = vector.broadcast %cst_8 : f32 to vector<16x1xf32>
    %11 = arith.divf %9, %10 : vector<16x1xf32>
    %12 = vector.broadcast %11 : vector<16x1xf32> to vector<16x128xf32>
    %13 = arith.subf %7, %12 : vector<16x128xf32>
    %14 = arith.mulf %13, %13 : vector<16x128xf32>
    %cst_9 = arith.constant dense<0.000000e+00> : vector<16xf32>
    %15 = vector.multi_reduction <add>, %14, %cst_9 [1] : vector<16x128xf32> to vector<16xf32>
    %16 = vector.shape_cast %15 : vector<16xf32> to vector<16x1xf32>
    %cst_10 = arith.constant 1.280000e+02 : f32
    %17 = vector.broadcast %cst_10 : f32 to vector<16x1xf32>
    %18 = arith.divf %16, %17 : vector<16x1xf32>
    %19 = vector.broadcast %11 : vector<16x1xf32> to vector<16x128xf32>
    %20 = arith.subf %7, %19 : vector<16x128xf32>
    %cst_11 = arith.constant 9.99999997E-7 : f32
    %21 = vector.broadcast %cst_11 : f32 to vector<16x1xf32>
    %22 = arith.addf %18, %21 : vector<16x1xf32>
    %23 = math.rsqrt %22 : vector<16x1xf32>
    %24 = vector.broadcast %23 : vector<16x1xf32> to vector<16x128xf32>
    %25 = arith.mulf %20, %24 : vector<16x128xf32>
    %c0_12 = arith.constant 0 : index
    %c0_13 = arith.constant 0 : index
    %26 = vector.load %arg5[%c0_12, %c0_13] : memref<1x128xf32, #tpu.memory_space<vmem>>, vector<1x128xf32>
    %27 = vector.broadcast %26 : vector<1x128xf32> to vector<16x128xf32>
    %28 = arith.mulf %25, %27 : vector<16x128xf32>
    %c0_14 = arith.constant 0 : index
    %c0_15 = arith.constant 0 : index
    %29 = vector.load %arg6[%c0_14, %c0_15] : memref<1x128xf32, #tpu.memory_space<vmem>>, vector<1x128xf32>
    %30 = vector.broadcast %29 : vector<1x128xf32> to vector<16x128xf32>
    %31 = arith.addf %28, %30 : vector<16x128xf32>
    %c0_16 = arith.constant 0 : index
    %c0_17 = arith.constant 0 : index
    %32 = vector.load %arg7[%c0_16, %c0_17] : memref<16x128xf32, #tpu.memory_space<vmem>>, vector<16x128xf32>
    tpu.vector_store %arg7[%c0_16, %c0_17], %31 {strides = array<i32>} : memref<16x128xf32, #tpu.memory_space<vmem>>, vector<16x128xf32>,
    return
  }
  func.func @transform_0(%arg0: i32) -> (i32, i32) {
    %c0_i32 = arith.constant 0 : i32
    %c0_i32_0 = arith.constant 0 : i32
    return %arg0, %c0_i32 : i32, i32
  }
  func.func @transform_1(%arg0: i32) -> (i32, i32) {
    %c0_i32 = arith.constant 0 : i32
    %c0_i32_0 = arith.constant 0 : i32
    %c0_i32_1 = arith.constant 0 : i32
    return %c0_i32, %c0_i32_0 : i32, i32
  }
  func.func @transform_2(%arg0: i32) -> (i32, i32) {
    %c0_i32 = arith.constant 0 : i32
    %c0_i32_0 = arith.constant 0 : i32
    %c0_i32_1 = arith.constant 0 : i32
    return %c0_i32, %c0_i32_0 : i32, i32
  }
  func.func @transform_3(%arg0: i32) -> (i32, i32) {
    %c0_i32 = arith.constant 0 : i32
    %c0_i32_0 = arith.constant 0 : i32
    return %arg0, %c0_i32 : i32, i32
  }
  func.func @transform_4(%arg0: i32) -> (i32, i32) {
    %c0_i32 = arith.constant 0 : i32
    %c0_i32_0 = arith.constant 0 : i32
    %c0_i32_1 = arith.constant 0 : i32
    return %c0_i32, %c0_i32_0 : i32, i32
  }
  func.func @transform_5(%arg0: i32) -> (i32, i32) {
    %c0_i32 = arith.constant 0 : i32
    %c0_i32_0 = arith.constant 0 : i32
    %c0_i32_1 = arith.constant 0 : i32
    return %c0_i32, %c0_i32_0 : i32, i32
  }
  func.func @transform_6(%arg0: i32) -> (i32, i32) {
    %c0_i32 = arith.constant 0 : i32
    %c0_i32_0 = arith.constant 0 : i32
    return %arg0, %c0_i32 : i32, i32
  }
}

module attributes {stable_mosaic.version = 11 : i64} {
  func.func @_ffn_res_ln_kernel(%arg0: i32, %arg1: memref<16x128xf32, #tpu.memory_space<vmem>>, %arg2: memref<128x256xf32, #tpu.memory_space<vmem>>, %arg3: memref<1x256xf32, #tpu.memory_space<vmem>>, %arg4: memref<256x128xf32, #tpu.memory_space<vmem>>, %arg5: memref<1x128xf32, #tpu.memory_space<vmem>>, %arg6: memref<1x128xf32, #tpu.memory_space<vmem>>, %arg7: memref<1x128xf32, #tpu.memory_space<vmem>>, %arg8: memref<16x128xf32, #tpu.memory_space<vmem>>) attributes {dimension_semantics = [#tpu.dimension_semantics<parallel>], iteration_bounds = array<i64: 1>, scalar_prefetch = 0 : i64, scratch_operands = 0 : i64, tpu.core_type = #tpu.core_type<tc>, window_params = [{transform_indices = @transform_0, window_bounds = array<i64: 16, 128>}, {pipeline_mode = #tpu.pipeline_mode<synchronous>, transform_indices = @transform_1, window_bounds = array<i64: 128, 256>}, {pipeline_mode = #tpu.pipeline_mode<synchronous>, transform_indices = @transform_2, window_bounds = array<i64: 1, 256>}, {pipeline_mode = #tpu.pipeline_mode<synchronous>, transform_indices = @transform_3, window_bounds = array<i64: 256, 128>}, {pipeline_mode = #tpu.pipeline_mode<synchronous>, transform_indices = @transform_4, window_bounds = array<i64: 1, 128>}, {pipeline_mode = #tpu.pipeline_mode<synchronous>, transform_indices = @transform_5, window_bounds = array<i64: 1, 128>}, {pipeline_mode = #tpu.pipeline_mode<synchronous>, transform_indices = @transform_6, window_bounds = array<i64: 1, 128>}, {transform_indices = @transform_7, window_bounds = array<i64: 16, 128>}]} {
    %c0 = arith.constant 0 : index
    %c0_0 = arith.constant 0 : index
    %0 = vector.load %arg1[%c0, %c0_0] : memref<16x128xf32, #tpu.memory_space<vmem>>, vector<16x128xf32>
    %c0_1 = arith.constant 0 : index
    %c0_2 = arith.constant 0 : index
    %1 = vector.load %arg2[%c0_1, %c0_2] : memref<128x256xf32, #tpu.memory_space<vmem>>, vector<128x256xf32>
    %cst = arith.constant dense<0.000000e+00> : vector<16x256xf32>
    %2 = tpu.matmul %0, %1, %cst {dimension_numbers = #tpu.dot_dimension_numbers<[1], [0], [0], [1], [0, 0, 1, 1], [], []>} : vector<16x128xf32>, vector<128x256xf32>, vector<16x256xf32> -> vector<16x256xf32>
    %c0_3 = arith.constant 0 : index
    %c0_4 = arith.constant 0 : index
    %3 = vector.load %arg3[%c0_3, %c0_4] : memref<1x256xf32, #tpu.memory_space<vmem>>, vector<1x256xf32>
    %4 = vector.broadcast %3 : vector<1x256xf32> to vector<16x256xf32>
    %5 = arith.addf %2, %4 : vector<16x256xf32>
    %cst_5 = arith.constant 0.000000e+00 : f32
    %6 = vector.broadcast %cst_5 : f32 to vector<16x256xf32>
    %7 = arith.maximumf %5, %6 : vector<16x256xf32>
    %c0_6 = arith.constant 0 : index
    %c0_7 = arith.constant 0 : index
    %8 = vector.load %arg4[%c0_6, %c0_7] : memref<256x128xf32, #tpu.memory_space<vmem>>, vector<256x128xf32>
    %cst_8 = arith.constant dense<0.000000e+00> : vector<16x128xf32>
    %9 = tpu.matmul %7, %8, %cst_8 {dimension_numbers = #tpu.dot_dimension_numbers<[1], [0], [0], [1], [0, 0, 1, 1], [], []>} : vector<16x256xf32>, vector<256x128xf32>, vector<16x128xf32> -> vector<16x128xf32>
    %c0_9 = arith.constant 0 : index
    %c0_10 = arith.constant 0 : index
    %10 = vector.load %arg5[%c0_9, %c0_10] : memref<1x128xf32, #tpu.memory_space<vmem>>, vector<1x128xf32>
    %11 = vector.broadcast %10 : vector<1x128xf32> to vector<16x128xf32>
    %12 = arith.addf %9, %11 : vector<16x128xf32>
    %13 = arith.addf %12, %0 : vector<16x128xf32>
    %cst_11 = arith.constant dense<0.000000e+00> : vector<16xf32>
    %14 = vector.multi_reduction <add>, %13, %cst_11 [1] : vector<16x128xf32> to vector<16xf32>
    %15 = vector.shape_cast %14 : vector<16xf32> to vector<16x1xf32>
    %cst_12 = arith.constant 1.280000e+02 : f32
    %16 = vector.broadcast %cst_12 : f32 to vector<16x1xf32>
    %17 = arith.divf %15, %16 : vector<16x1xf32>
    %18 = vector.broadcast %17 : vector<16x1xf32> to vector<16x128xf32>
    %19 = arith.subf %13, %18 : vector<16x128xf32>
    %20 = arith.mulf %19, %19 : vector<16x128xf32>
    %cst_13 = arith.constant dense<0.000000e+00> : vector<16xf32>
    %21 = vector.multi_reduction <add>, %20, %cst_13 [1] : vector<16x128xf32> to vector<16xf32>
    %22 = vector.shape_cast %21 : vector<16xf32> to vector<16x1xf32>
    %cst_14 = arith.constant 1.280000e+02 : f32
    %23 = vector.broadcast %cst_14 : f32 to vector<16x1xf32>
    %24 = arith.divf %22, %23 : vector<16x1xf32>
    %25 = vector.broadcast %17 : vector<16x1xf32> to vector<16x128xf32>
    %26 = arith.subf %13, %25 : vector<16x128xf32>
    %cst_15 = arith.constant 9.99999997E-7 : f32
    %27 = vector.broadcast %cst_15 : f32 to vector<16x1xf32>
    %28 = arith.addf %24, %27 : vector<16x1xf32>
    %29 = math.rsqrt %28 : vector<16x1xf32>
    %30 = vector.broadcast %29 : vector<16x1xf32> to vector<16x128xf32>
    %31 = arith.mulf %26, %30 : vector<16x128xf32>
    %c0_16 = arith.constant 0 : index
    %c0_17 = arith.constant 0 : index
    %32 = vector.load %arg6[%c0_16, %c0_17] : memref<1x128xf32, #tpu.memory_space<vmem>>, vector<1x128xf32>
    %33 = vector.broadcast %32 : vector<1x128xf32> to vector<16x128xf32>
    %34 = arith.mulf %31, %33 : vector<16x128xf32>
    %c0_18 = arith.constant 0 : index
    %c0_19 = arith.constant 0 : index
    %35 = vector.load %arg7[%c0_18, %c0_19] : memref<1x128xf32, #tpu.memory_space<vmem>>, vector<1x128xf32>
    %36 = vector.broadcast %35 : vector<1x128xf32> to vector<16x128xf32>
    %37 = arith.addf %34, %36 : vector<16x128xf32>
    %c0_20 = arith.constant 0 : index
    %c0_21 = arith.constant 0 : index
    %38 = vector.load %arg8[%c0_20, %c0_21] : memref<16x128xf32, #tpu.memory_space<vmem>>, vector<16x128xf32>
    tpu.vector_store %arg8[%c0_20, %c0_21], %37 {strides = array<i32>} : memref<16x128xf32, #tpu.memory_space<vmem>>, vector<16x128xf32>,
    return
  }
  func.func @transform_0(%arg0: i32) -> (i32, i32) {
    %c0_i32 = arith.constant 0 : i32
    %c0_i32_0 = arith.constant 0 : i32
    return %arg0, %c0_i32 : i32, i32
  }
  func.func @transform_1(%arg0: i32) -> (i32, i32) {
    %c0_i32 = arith.constant 0 : i32
    %c0_i32_0 = arith.constant 0 : i32
    %c0_i32_1 = arith.constant 0 : i32
    return %c0_i32, %c0_i32_0 : i32, i32
  }
  func.func @transform_2(%arg0: i32) -> (i32, i32) {
    %c0_i32 = arith.constant 0 : i32
    %c0_i32_0 = arith.constant 0 : i32
    %c0_i32_1 = arith.constant 0 : i32
    return %c0_i32, %c0_i32_0 : i32, i32
  }
  func.func @transform_3(%arg0: i32) -> (i32, i32) {
    %c0_i32 = arith.constant 0 : i32
    %c0_i32_0 = arith.constant 0 : i32
    %c0_i32_1 = arith.constant 0 : i32
    return %c0_i32, %c0_i32_0 : i32, i32
  }
  func.func @transform_4(%arg0: i32) -> (i32, i32) {
    %c0_i32 = arith.constant 0 : i32
    %c0_i32_0 = arith.constant 0 : i32
    %c0_i32_1 = arith.constant 0 : i32
    return %c0_i32, %c0_i32_0 : i32, i32
  }
  func.func @transform_5(%arg0: i32) -> (i32, i32) {
    %c0_i32 = arith.constant 0 : i32
    %c0_i32_0 = arith.constant 0 : i32
    %c0_i32_1 = arith.constant 0 : i32
    return %c0_i32, %c0_i32_0 : i32, i32
  }
  func.func @transform_6(%arg0: i32) -> (i32, i32) {
    %c0_i32 = arith.constant 0 : i32
    %c0_i32_0 = arith.constant 0 : i32
    %c0_i32_1 = arith.constant 0 : i32
    return %c0_i32, %c0_i32_0 : i32, i32
  }
  func.func @transform_7(%arg0: i32) -> (i32, i32) {
    %c0_i32 = arith.constant 0 : i32
    %c0_i32_0 = arith.constant 0 : i32
    return %arg0, %c0_i32 : i32, i32
  }
}

module attributes {stable_mosaic.version = 11 : i64} {
  func.func @_matmul_bias_kernel(%arg0: i32, %arg1: i32, %arg2: i32, %arg3: memref<16x128xf32, #tpu.memory_space<vmem>>, %arg4: memref<128x128xf32, #tpu.memory_space<vmem>>, %arg5: memref<1x128xf32, #tpu.memory_space<vmem>>, %arg6: memref<16x128xf32, #tpu.memory_space<vmem>>, %arg7: memref<16x128xf32, #tpu.memory_space<vmem>>) attributes {dimension_semantics = [#tpu.dimension_semantics<parallel>, #tpu.dimension_semantics<parallel>, #tpu.dimension_semantics<arbitrary>], iteration_bounds = array<i64: 1, 1, 1>, scalar_prefetch = 0 : i64, scratch_operands = 1 : i64, tpu.core_type = #tpu.core_type<tc>, window_params = [{transform_indices = @transform_0, window_bounds = array<i64: 16, 128>}, {transform_indices = @transform_1, window_bounds = array<i64: 128, 128>}, {transform_indices = @transform_2, window_bounds = array<i64: 1, 128>}, {transform_indices = @transform_3, window_bounds = array<i64: 16, 128>}]} {
    %c0_i32 = arith.constant 0 : i32
    %0 = arith.cmpi eq, %arg2, %c0_i32 : i32
    %1 = arith.extui %0 : i1 to i32
    %c0_i32_0 = arith.constant 0 : i32
    %2 = arith.cmpi ne, %1, %c0_i32_0 : i32
    scf.if %2 {
      %cst_10 = arith.constant 0.000000e+00 : f32
      %12 = vector.broadcast %cst_10 : f32 to vector<16x128xf32>
      %c0_11 = arith.constant 0 : index
      %c0_12 = arith.constant 0 : index
      %13 = vector.load %arg7[%c0_11, %c0_12] : memref<16x128xf32, #tpu.memory_space<vmem>>, vector<16x128xf32>
      tpu.vector_store %arg7[%c0_11, %c0_12], %12 {strides = array<i32>} : memref<16x128xf32, #tpu.memory_space<vmem>>, vector<16x128xf32>,
    } else {
    }
    %c0 = arith.constant 0 : index
    %c0_1 = arith.constant 0 : index
    %3 = vector.load %arg7[%c0, %c0_1] : memref<16x128xf32, #tpu.memory_space<vmem>>, vector<16x128xf32>
    %c0_2 = arith.constant 0 : index
    %c0_3 = arith.constant 0 : index
    %4 = vector.load %arg3[%c0_2, %c0_3] : memref<16x128xf32, #tpu.memory_space<vmem>>, vector<16x128xf32>
    %c0_4 = arith.constant 0 : index
    %c0_5 = arith.constant 0 : index
    %5 = vector.load %arg4[%c0_4, %c0_5] : memref<128x128xf32, #tpu.memory_space<vmem>>, vector<128x128xf32>
    %cst = arith.constant dense<0.000000e+00> : vector<16x128xf32>
    %6 = tpu.matmul %4, %5, %cst {dimension_numbers = #tpu.dot_dimension_numbers<[1], [0], [0], [1], [0, 0, 1, 1], [], []>} : vector<16x128xf32>, vector<128x128xf32>, vector<16x128xf32> -> vector<16x128xf32>
    %7 = arith.addf %3, %6 : vector<16x128xf32>
    %c0_6 = arith.constant 0 : index
    %c0_7 = arith.constant 0 : index
    %8 = vector.load %arg7[%c0_6, %c0_7] : memref<16x128xf32, #tpu.memory_space<vmem>>, vector<16x128xf32>
    tpu.vector_store %arg7[%c0_6, %c0_7], %7 {strides = array<i32>} : memref<16x128xf32, #tpu.memory_space<vmem>>, vector<16x128xf32>,
    %c0_i32_8 = arith.constant 0 : i32
    %9 = arith.cmpi eq, %arg2, %c0_i32_8 : i32
    %10 = arith.extui %9 : i1 to i32
    %c0_i32_9 = arith.constant 0 : i32
    %11 = arith.cmpi ne, %10, %c0_i32_9 : i32
    scf.if %11 {
      %c0_10 = arith.constant 0 : index
      %c0_11 = arith.constant 0 : index
      %12 = vector.load %arg7[%c0_10, %c0_11] : memref<16x128xf32, #tpu.memory_space<vmem>>, vector<16x128xf32>
      %c0_12 = arith.constant 0 : index
      %c0_13 = arith.constant 0 : index
      %13 = vector.load %arg5[%c0_12, %c0_13] : memref<1x128xf32, #tpu.memory_space<vmem>>, vector<1x128xf32>
      %14 = vector.broadcast %13 : vector<1x128xf32> to vector<16x128xf32>
      %15 = arith.addf %12, %14 : vector<16x128xf32>
      %c0_14 = arith.constant 0 : index
      %c0_15 = arith.constant 0 : index
      %16 = vector.load %arg6[%c0_14, %c0_15] : memref<16x128xf32, #tpu.memory_space<vmem>>, vector<16x128xf32>
      tpu.vector_store %arg6[%c0_14, %c0_15], %15 {strides = array<i32>} : memref<16x128xf32, #tpu.memory_space<vmem>>, vector<16x128xf32>,
    } else {
    }
    return
  }
  func.func @transform_0(%arg0: i32, %arg1: i32, %arg2: i32) -> (i32, i32) {
    %c0_i32 = arith.constant 0 : i32
    return %arg0, %arg2 : i32, i32
  }
  func.func @transform_1(%arg0: i32, %arg1: i32, %arg2: i32) -> (i32, i32) {
    %c0_i32 = arith.constant 0 : i32
    return %arg2, %arg1 : i32, i32
  }
  func.func @transform_2(%arg0: i32, %arg1: i32, %arg2: i32) -> (i32, i32) {
    %c0_i32 = arith.constant 0 : i32
    %c0_i32_0 = arith.constant 0 : i32
    return %c0_i32, %arg1 : i32, i32
  }
  func.func @transform_3(%arg0: i32, %arg1: i32, %arg2: i32) -> (i32, i32) {
    %c0_i32 = arith.constant 0 : i32
    return %arg0, %arg1 : i32, i32
  }
}

module attributes {stable_mosaic.version = 11 : i64} {
  func.func @_ffn_res_ln_kernel(%arg0: i32, %arg1: memref<16x128xf32, #tpu.memory_space<vmem>>, %arg2: memref<128x256xf32, #tpu.memory_space<vmem>>, %arg3: memref<1x256xf32, #tpu.memory_space<vmem>>, %arg4: memref<256x128xf32, #tpu.memory_space<vmem>>, %arg5: memref<1x128xf32, #tpu.memory_space<vmem>>, %arg6: memref<1x128xf32, #tpu.memory_space<vmem>>, %arg7: memref<1x128xf32, #tpu.memory_space<vmem>>, %arg8: memref<16x128xf32, #tpu.memory_space<vmem>>) attributes {dimension_semantics = [#tpu.dimension_semantics<parallel>], iteration_bounds = array<i64: 1>, scalar_prefetch = 0 : i64, scratch_operands = 0 : i64, tpu.core_type = #tpu.core_type<tc>, window_params = [{transform_indices = @transform_0, window_bounds = array<i64: 16, 128>}, {pipeline_mode = #tpu.pipeline_mode<synchronous>, transform_indices = @transform_1, window_bounds = array<i64: 128, 256>}, {pipeline_mode = #tpu.pipeline_mode<synchronous>, transform_indices = @transform_2, window_bounds = array<i64: 1, 256>}, {pipeline_mode = #tpu.pipeline_mode<synchronous>, transform_indices = @transform_3, window_bounds = array<i64: 256, 128>}, {pipeline_mode = #tpu.pipeline_mode<synchronous>, transform_indices = @transform_4, window_bounds = array<i64: 1, 128>}, {pipeline_mode = #tpu.pipeline_mode<synchronous>, transform_indices = @transform_5, window_bounds = array<i64: 1, 128>}, {pipeline_mode = #tpu.pipeline_mode<synchronous>, transform_indices = @transform_6, window_bounds = array<i64: 1, 128>}, {transform_indices = @transform_7, window_bounds = array<i64: 16, 128>}]} {
    %c0 = arith.constant 0 : index
    %c0_0 = arith.constant 0 : index
    %0 = vector.load %arg1[%c0, %c0_0] : memref<16x128xf32, #tpu.memory_space<vmem>>, vector<16x128xf32>
    %c0_1 = arith.constant 0 : index
    %c0_2 = arith.constant 0 : index
    %1 = vector.load %arg2[%c0_1, %c0_2] : memref<128x256xf32, #tpu.memory_space<vmem>>, vector<128x256xf32>
    %cst = arith.constant dense<0.000000e+00> : vector<16x256xf32>
    %2 = tpu.matmul %0, %1, %cst {dimension_numbers = #tpu.dot_dimension_numbers<[1], [0], [0], [1], [0, 0, 1, 1], [], []>} : vector<16x128xf32>, vector<128x256xf32>, vector<16x256xf32> -> vector<16x256xf32>
    %c0_3 = arith.constant 0 : index
    %c0_4 = arith.constant 0 : index
    %3 = vector.load %arg3[%c0_3, %c0_4] : memref<1x256xf32, #tpu.memory_space<vmem>>, vector<1x256xf32>
    %4 = vector.broadcast %3 : vector<1x256xf32> to vector<16x256xf32>
    %5 = arith.addf %2, %4 : vector<16x256xf32>
    %cst_5 = arith.constant 0.000000e+00 : f32
    %6 = vector.broadcast %cst_5 : f32 to vector<16x256xf32>
    %7 = arith.maximumf %5, %6 : vector<16x256xf32>
    %c0_6 = arith.constant 0 : index
    %c0_7 = arith.constant 0 : index
    %8 = vector.load %arg4[%c0_6, %c0_7] : memref<256x128xf32, #tpu.memory_space<vmem>>, vector<256x128xf32>
    %cst_8 = arith.constant dense<0.000000e+00> : vector<16x128xf32>
    %9 = tpu.matmul %7, %8, %cst_8 {dimension_numbers = #tpu.dot_dimension_numbers<[1], [0], [0], [1], [0, 0, 1, 1], [], []>} : vector<16x256xf32>, vector<256x128xf32>, vector<16x128xf32> -> vector<16x128xf32>
    %c0_9 = arith.constant 0 : index
    %c0_10 = arith.constant 0 : index
    %10 = vector.load %arg5[%c0_9, %c0_10] : memref<1x128xf32, #tpu.memory_space<vmem>>, vector<1x128xf32>
    %11 = vector.broadcast %10 : vector<1x128xf32> to vector<16x128xf32>
    %12 = arith.addf %9, %11 : vector<16x128xf32>
    %13 = arith.addf %12, %0 : vector<16x128xf32>
    %cst_11 = arith.constant dense<0.000000e+00> : vector<16xf32>
    %14 = vector.multi_reduction <add>, %13, %cst_11 [1] : vector<16x128xf32> to vector<16xf32>
    %15 = vector.shape_cast %14 : vector<16xf32> to vector<16x1xf32>
    %cst_12 = arith.constant 1.280000e+02 : f32
    %16 = vector.broadcast %cst_12 : f32 to vector<16x1xf32>
    %17 = arith.divf %15, %16 : vector<16x1xf32>
    %18 = vector.broadcast %17 : vector<16x1xf32> to vector<16x128xf32>
    %19 = arith.subf %13, %18 : vector<16x128xf32>
    %20 = arith.mulf %19, %19 : vector<16x128xf32>
    %cst_13 = arith.constant dense<0.000000e+00> : vector<16xf32>
    %21 = vector.multi_reduction <add>, %20, %cst_13 [1] : vector<16x128xf32> to vector<16xf32>
    %22 = vector.shape_cast %21 : vector<16xf32> to vector<16x1xf32>
    %cst_14 = arith.constant 1.280000e+02 : f32
    %23 = vector.broadcast %cst_14 : f32 to vector<16x1xf32>
    %24 = arith.divf %22, %23 : vector<16x1xf32>
    %25 = vector.broadcast %17 : vector<16x1xf32> to vector<16x128xf32>
    %26 = arith.subf %13, %25 : vector<16x128xf32>
    %cst_15 = arith.constant 9.99999997E-7 : f32
    %27 = vector.broadcast %cst_15 : f32 to vector<16x1xf32>
    %28 = arith.addf %24, %27 : vector<16x1xf32>
    %29 = math.rsqrt %28 : vector<16x1xf32>
    %30 = vector.broadcast %29 : vector<16x1xf32> to vector<16x128xf32>
    %31 = arith.mulf %26, %30 : vector<16x128xf32>
    %c0_16 = arith.constant 0 : index
    %c0_17 = arith.constant 0 : index
    %32 = vector.load %arg6[%c0_16, %c0_17] : memref<1x128xf32, #tpu.memory_space<vmem>>, vector<1x128xf32>
    %33 = vector.broadcast %32 : vector<1x128xf32> to vector<16x128xf32>
    %34 = arith.mulf %31, %33 : vector<16x128xf32>
    %c0_18 = arith.constant 0 : index
    %c0_19 = arith.constant 0 : index
    %35 = vector.load %arg7[%c0_18, %c0_19] : memref<1x128xf32, #tpu.memory_space<vmem>>, vector<1x128xf32>
    %36 = vector.broadcast %35 : vector<1x128xf32> to vector<16x128xf32>
    %37 = arith.addf %34, %36 : vector<16x128xf32>
    %c0_20 = arith.constant 0 : index
    %c0_21 = arith.constant 0 : index
    %38 = vector.load %arg8[%c0_20, %c0_21] : memref<16x128xf32, #tpu.memory_space<vmem>>, vector<16x128xf32>
    tpu.vector_store %arg8[%c0_20, %c0_21], %37 {strides = array<i32>} : memref<16x128xf32, #tpu.memory_space<vmem>>, vector<16x128xf32>,
    return
  }
  func.func @transform_0(%arg0: i32) -> (i32, i32) {
    %c0_i32 = arith.constant 0 : i32
    %c0_i32_0 = arith.constant 0 : i32
    return %arg0, %c0_i32 : i32, i32
  }
  func.func @transform_1(%arg0: i32) -> (i32, i32) {
    %c0_i32 = arith.constant 0 : i32
    %c0_i32_0 = arith.constant 0 : i32
    %c0_i32_1 = arith.constant 0 : i32
    return %c0_i32, %c0_i32_0 : i32, i32
  }
  func.func @transform_2(%arg0: i32) -> (i32, i32) {
    %c0_i32 = arith.constant 0 : i32
    %c0_i32_0 = arith.constant 0 : i32
    %c0_i32_1 = arith.constant 0 : i32
    return %c0_i32, %c0_i32_0 : i32, i32
  }
  func.func @transform_3(%arg0: i32) -> (i32, i32) {
    %c0_i32 = arith.constant 0 : i32
    %c0_i32_0 = arith.constant 0 : i32
    %c0_i32_1 = arith.constant 0 : i32
    return %c0_i32, %c0_i32_0 : i32, i32
  }
  func.func @transform_4(%arg0: i32) -> (i32, i32) {
    %c0_i32 = arith.constant 0 : i32
    %c0_i32_0 = arith.constant 0 : i32
    %c0_i32_1 = arith.constant 0 : i32
    return %c0_i32, %c0_i32_0 : i32, i32
  }
  func.func @transform_5(%arg0: i32) -> (i32, i32) {
    %c0_i32 = arith.constant 0 : i32
    %c0_i32_0 = arith.constant 0 : i32
    %c0_i32_1 = arith.constant 0 : i32
    return %c0_i32, %c0_i32_0 : i32, i32
  }
  func.func @transform_6(%arg0: i32) -> (i32, i32) {
    %c0_i32 = arith.constant 0 : i32
    %c0_i32_0 = arith.constant 0 : i32
    %c0_i32_1 = arith.constant 0 : i32
    return %c0_i32, %c0_i32_0 : i32, i32
  }
  func.func @transform_7(%arg0: i32) -> (i32, i32) {
    %c0_i32 = arith.constant 0 : i32
    %c0_i32_0 = arith.constant 0 : i32
    return %arg0, %c0_i32 : i32, i32
  }
}

</mosaic_0001>

<bundles_post_ra>
// kernel: decoder_forward.17
= control target key start
LH: loop header
LB: loop body
LE: loop exit
PB: predicated region body
PF: predicated region fallthrough
CT: control target
= control target key end

     0   :  { %vm31_vm0 = vcmask 1041408   ;;  %vm33_vm1 = vcmask 1045508   ;;  %vm35_vm2 = vcmask 1043456   ;;  %s84_s0 = inlined_call_operand.vmem [shape: f32[2,1024], index: 0, kind: input, shape index: {}, may-alias: {0,2}]   ;;  %s85_s1 = inlined_call_operand.vmem [shape: f32[1,1024], index: 1, kind: input, shape index: {}]   ;;  %s86_s2 = inlined_call_operand.vmem [shape: f32[2,1024], index: 2, kind: output, shape index: {}, may-alias: {0,2}]  }
   0x1   :  { %v15_v0 = vld [vmem:[%s85_s1] sm:$0xff]  ;;  %v12_v6 = vld [vmem:[%s84_s0 + $0x8] sm:$0xff] }
   0x2   :  { %v11_v1 = vld [vmem:[%s84_s0] sm:$0xff]  ;;  %v17_v2 = vperm.slane %v15_v0, 0  ;;  %v18_v3 = vperm.slane %v15_v0, 1  ;;  %v19_v4 = vperm.slane %v15_v0, 2  ;;  %v20_v5 = vperm.slane %v15_v0, 3 }
   0x3   :  { %v21_v7 = vperm.slane %v15_v0, 4  ;;  %v22_v8 = vperm.slane %v15_v0, 5  ;;  %v23_v11 = vperm.slane %v15_v0, 6  ;;  %v24_v12 = vperm.slane %v15_v0, 7 }
   0x4   :  { %v25_v9 = vrot.slane %v18_v3, 6  ;;  %v26_v10 = vrot.slane %v19_v4, 4  ;;  %v13_v13 = vmul.f32 11.313708, %v11_v1  ;;  %v27_v14 = vrot.slane %v20_v5, 2 }
   0x5   :  { %v28_v15 = vrot.slane %v22_v8, 6  ;;  %v14_v17 = vmul.f32 11.313708, %v12_v6  ;;  %v29_v18 = vrot.slane %v23_v11, 4  ;;  %v30_v19 = vrot.slane %v24_v12, 2 }
   0x6   :  { %v32_v16 = vsel %vm31_vm0, %v17_v2, %v25_v9  ;;  %v34_v20 = vsel %vm33_vm1, %v26_v10, %v27_v14 }
   0x7   :  { %v37_v21 = vsel %vm31_vm0, %v21_v7, %v28_v15  ;;  %v36_v22 = vsel %vm35_vm2, %v32_v16, %v34_v20  ;;  %v38_v23 = vsel %vm33_vm1, %v29_v18, %v30_v19 }
   0x8   :  { %v42_v24 = vadd.f32 %v36_v22, %v13_v13  ;;  %v39_v25 = vsel %vm35_vm2, %v37_v21, %v38_v23 }
   0x9   :  { %v43_v26 = vadd.f32 %v39_v25, %v14_v17 }
   0xa   :  { %44 = vst [vmem:[%s86_s2] sm:$0xff] %v42_v24 }
   0xb   :  { %45 = vst [vmem:[%s86_s2 + $0x8] sm:$0xff] %v43_v26 }

// kernel: decoder_forward.19
= control target key start
LH: loop header
LB: loop body
LE: loop exit
PB: predicated region body
PF: predicated region fallthrough
CT: control target
= control target key end

     0   :  { %s739_s15 = smov 0   ;;  %s811_s0 = inlined_call_operand.vmem [shape: f32[2,8,384], index: 0, kind: input, shape index: {}, may-alias: {0,1,2}]   ;;  %s812_s1 = inlined_call_operand.vmem [shape: f32[2,8,384], index: 1, kind: input, shape index: {}, may-alias: {0,1,2}]   ;;  %s813_s2 = inlined_call_operand.vmem [shape: f32[2,8,384], index: 2, kind: input, shape index: {}, may-alias: {0,1,2}]   ;;  %s814_s3 = inlined_call_operand.vmem [shape: f32[2,8,8], index: 3, kind: input, shape index: {}]   ;;  %s815_s4 = inlined_call_operand.vmem [shape: f32[2,8,128], index: 4, kind: output, shape index: {}]  }
   0x1 LB: > { %s649_s16 = sadd.s32 4294967295, %s709_s15   ;;  %p653_p0 = scmp.ge.s32.totalorder %s709_s15, 1  ;;  %s709_s15 = sphi %s739_s15, %s14_s15  }
   0x2   : > { %p193_p1 = scmp.lt.s32.totalorder %s709_s15, 3 }
   0x4   : > { %p194_p2 = pnand %p653_p0, %p193_p1 }
   0x5   : > { %p234_p3 = scmp.lt.s32.totalorder (!%p194_p2), %s649_s16, 1  ;;  %s711_s24 = smov (!%p194_p2), 96  }
   0x6   : > { %197 = sbr.rel (%p194_p2) target bundleno = 1047 (0x417), region = 36  ;;  %s712_s25 = smov (!%p194_p2), 64  }
   0x7   : > { %s713_s26 = smov (!%p194_p2), 32  }
   0xb   : > { %s817_s16 = smov (!%p234_p3, %s649_s16), 1  ;;  %vm264_vm0 = vcmask 261120   ;;  %vm293_vm1 = vcmask 64512   ;;  %vm543_vm2 = vcmask 523264   ;;  %vm545_vm3 = vcmask 785408  }
   0xc   : > { %s750_s17 = smul.u32 24, %s817_s16  ;;  %s657_s27 = sshll.u32 %s817_s16, 3 }
   0xd   : > { %s254_s30 = scalar_lea.vmem %s814_s3, %s657_s27  ;;  %s258_s10 = scalar_lea.vmem %s815_s4, %s657_s27 }
   0xe   : > { %s597_s20 = scalar_lea.vmem %s812_s1, %s750_s17  ;;  %s238_s23 = scalar_lea.vmem %s811_s0, %s750_s17  ;;  %v262_v6 = vld [vmem:[%s254_s30] sm:$0xff] }
   0xf   : > { %v659_v0 = vld [vmem:[%s597_s20 + $0x8] sm:$0xff]  ;;  %v259_v1 = vld [vmem:[%s238_s23] sm:$0xff]  ;;  %v263_v7 = vmul.f32 -1e+09, %v262_v6  ;;  %s601_s7 = scalar_lea.vmem %s813_s2, %s750_s17 }
  0x10   : > { %661 = vmatpush.xpose.msk.msra.mxu0 %vm264_vm0, %v659_v0  ;;  %330 = vrot.lane.b32.xlu1 %v659_v0, %s711_s24  ;;  %v660_v22 = vld [vmem:[%s601_s7 + $0x10] sm:$0xff] }
  0x11   : > { %398 = vrot.lane.b32.xlu2 %v659_v0, %s712_s25  ;;  %323 = vmatpush.msra.mxu1 %v660_v22 }
  0x13   : > { %662 = vmatmul.msk.f32.vlgmr.msra.gmra.mxu0 %vm264_vm0, %v259_v1 }
  0x18   : > { %328 = vrot.lane.b32.xlu1 %v259_v1, %s711_s24 }
  0x19   : > { %465 = vrot.lane.b32.xlu2 %v659_v0, %s713_s26 }
  0x20   : > { %463 = vrot.lane.b32.xlu1 %v259_v1, %s713_s26 }
  0x6b   : > { %v399_v2 = vpop.permute.xlu2 %398 }
  0x6c   : > { %667 = vmatpush.xpose.msk.msrb.mxu1 %vm264_vm0, %v399_v2 }
  0x73   : > { %v466_v3 = vpop.permute.xlu2 %465 }
  0x74   : > { %670 = vmatpush.xpose.msk.msrb.mxu0 %vm264_vm0, %v466_v3 }
  0x82   : > { %v331_v4 = vpop.permute.xlu1 %330 }
  0x83   : > { %664 = vmatpush.xpose.msk.msra.mxu2 %vm264_vm0, %v331_v4 }
  0x8a   : > { %v329_v5 = vpop.permute.xlu1 %328 }
  0x8b   : > { %665 = vmatmul.msk.f32.vlgmr.msra.gmra.mxu2 %vm264_vm0, %v329_v5 }
  0x90   : > { %v288_v8 = vpop.f32.mrf.mxu0 }
  0x91   : > { %v291_v9 = vmul.f32 0.17677669, %v288_v8 }
  0x92   : > { %v464_v10 = vpop.permute.xlu1 %463 }
  0x93   : > { %v292_v11 = vadd.f32 %v291_v9, %v263_v7  ;;  %671 = vmatmul.msk.f32.vlgmr.msrb.gmra.mxu0 %vm264_vm0, %v464_v10 }
  0x95   : > { %v294_v12 = vsel %vm293_vm1, %v292_v11, -inf }
  0x96   : > { %295 = vmax.xlane.f32.xlu0 %v294_v12 }
 0x109   : > { %v296_v13 = vpop.xlane.xlu0 %295 }
 0x10a   : > { %v297_v14 = vsub.f32 %v292_v11, %v296_v13 }
 0x10c   : > { %v298_v15 = vmul.f32 1.442695, %v297_v14 }
 0x10e   : > { %687 = vpow2.f32 %v298_v15  ;;  %v353_v16 = vpop.f32.mrf.mxu2 }
 0x10f   : > { %v356_v17 = vmul.f32 0.17677669, %v353_v16 }
 0x110   : > { %v488_v23 = vpop.f32.mrf.mxu0 }
 0x111   : > { %v357_v18 = vadd.f32 %v356_v17, %v263_v7  ;;  %v491_v24 = vmul.f32 0.17677669, %v488_v23 }
 0x113   : > { %v358_v19 = vsel %vm293_vm1, %v357_v18, -inf  ;;  %v492_v25 = vadd.f32 %v491_v24, %v263_v7 }
 0x114   : > { %v688_v20 = vpop.eup %687  ;;  %359 = vmax.xlane.f32.xlu2 %v358_v19 }
 0x115   : > { %v300_v21 = vsel %vm293_vm1, %v688_v20, 0.0  ;;  %v493_v26 = vsel %vm293_vm1, %v492_v25, -inf }
 0x116   : > { %301 = vadd.xlane.f32.xlu0 %v300_v21 }
 0x12a   : > { %396 = vrot.lane.b32.xlu0 %v259_v1, %s712_s25 }
 0x154   : > { %494 = vmax.xlane.f32.xlu0 %v493_v26 }
 0x168   : > { %437 = vrot.lane.b32.xlu0 %v660_v22, %s712_s25 }
 0x187   : > { %v360_v27 = vpop.xlane.xlu2 %359 }
 0x188   : > { %v361_v28 = vsub.f32 %v357_v18, %v360_v27 }
 0x189   : > { %v302_v29 = vpop.xlane.xlu0 %301 }
 0x18a   : > { %689 = vrcp.f32 %v302_v29  ;;  %v362_v30 = vmul.f32 1.442695, %v361_v28 }
 0x18c   : > { %691 = vpow2.f32 %v362_v30 }
 0x190   : > { %v690_v31 = vpop.eup %689 }
 0x191   : > { %v304_v32 = vmul.f32 %v690_v31, %v688_v20 }
 0x192   : > { %v692_v33 = vpop.eup %691 }
 0x193   : > { %663 = vmatmul.msk.f32.vlgmr.msra.gmra.mxu1 %vm293_vm1, %v304_v32  ;;  %v364_v34 = vsel %vm293_vm1, %v692_v33, 0.0 }
 0x194   : > { %365 = vadd.xlane.f32.xlu2 %v364_v34 }
 0x19c   : > { %v397_v35 = vpop.permute.xlu0 %396 }
 0x19d   : > { %668 = vmatmul.msk.f32.vlgmr.msrb.gmra.mxu1 %vm264_vm0, %v397_v35 }
 0x1c7   : > { %v495_v36 = vpop.xlane.xlu0 %494 }
 0x1c8   : > { %v496_v37 = vsub.f32 %v492_v25, %v495_v36 }
 0x1ca   : > { %v497_v38 = vmul.f32 1.442695, %v496_v37 }
 0x1cc   : > { %693 = vpow2.f32 %v497_v38 }
 0x1d2   : > { %v694_v39 = vpop.eup %693 }
 0x1d3   : > { %v499_v40 = vsel %vm293_vm1, %v694_v39, 0.0 }
 0x1d4   : > { %500 = vadd.xlane.f32.xlu2 %v499_v40 }
 0x1da   : > { %v438_v55 = vpop.permute.xlu0 %437 }
 0x207   : > { %v366_v50 = vpop.xlane.xlu2 %365 }
 0x210   : > { %v325_v41 = vpop.f32.mrf.mxu1 }
 0x21a   : > { %v421_v42 = vpop.f32.mrf.mxu1 }
 0x21b   : > { %v424_v43 = vmul.f32 0.17677669, %v421_v42 }
 0x21d   : > { %v425_v44 = vadd.f32 %v424_v43, %v263_v7 }
 0x21f   : > { %v426_v45 = vsel %vm293_vm1, %v425_v44, -inf }
 0x220   : > { %427 = vmax.xlane.f32.xlu1 %v426_v45 }
 0x239   : > { %370 = vrot.lane.b32.xlu1 %v660_v22, %s711_s24 }
 0x247   : > { %v501_v56 = vpop.xlane.xlu2 %500 }
 0x293   : > { %v428_v46 = vpop.xlane.xlu1 %427 }
 0x294   : > { %v429_v47 = vsub.f32 %v425_v44, %v428_v46 }
 0x296   : > { %v430_v48 = vmul.f32 1.442695, %v429_v47 }
 0x298   : > { %695 = vpow2.f32 %v430_v48 }
 0x299   : > { %697 = vrcp.f32 %v366_v50 }
 0x29a   : > { %699 = vrcp.f32 %v501_v56 }
 0x29e   : > { %v696_v49 = vpop.eup %695 }
 0x29f   : > { %v432_v51 = vsel %vm293_vm1, %v696_v49, 0.0  ;;  %v698_v52 = vpop.eup %697 }
 0x2a0   : > { %433 = vadd.xlane.f32.xlu2 %v432_v51  ;;  %v368_v54 = vmul.f32 %v698_v52, %v692_v33  ;;  %v700_v58 = vpop.eup %699 }
 0x2a1   : > { %v503_v62 = vmul.f32 %v700_v58, %v694_v39 }
 0x2ab   : > { %v371_v53 = vpop.permute.xlu1 %370 }
 0x2ac   : > { %391 = vmatpush.msra.mxu3 %v371_v53 }
 0x2ad   : > { %666 = vmatmul.msk.f32.vlgmr.msra.gmra.mxu3 %vm293_vm1, %v368_v54 }
 0x2ae   : > { %458 = vmatpush.msrb.mxu3 %v438_v55 }
 0x2b8   : > { %504 = vrot.lane.b32.xlu2 %v660_v22, %s713_s26 }
 0x313   : > { %v434_v57 = vpop.xlane.xlu2 %433 }
 0x314   : > { %701 = vrcp.f32 %v434_v57 }
 0x31a   : > { %v702_v59 = vpop.eup %701 }
 0x31b   : > { %v505_v60 = vpop.permute.xlu2 %504  ;;  %v436_v61 = vmul.f32 %v702_v59, %v696_v49 }
 0x31c   : > { %525 = vmatpush.msrb.mxu2 %v505_v60 }
 0x31d   : > { %669 = vmatmul.msk.f32.vlgmr.msrb.gmra.mxu3 %vm293_vm1, %v436_v61  ;;  %672 = vmatmul.msk.f32.vlgmr.msrb.gmra.mxu2 %vm293_vm1, %v503_v62 }
 0x330   : > { %v393_v63 = vpop.f32.mrf.mxu3 }
 0x331   : > { %531 = vrot.lane.b32.xlu1 %v393_v63, %s713_s26 }
 0x3a0   : > { %v460_v0 = vpop.f32.mrf.mxu3  ;;  %v527_v1 = vpop.f32.mrf.mxu2 }
 0x3a1   : > { %539 = vrot.lane.b32.xlu1 %v527_v1, %s711_s24  ;;  %535 = vrot.lane.b32.xlu0 %v460_v0, %s712_s25 }
 0x3a3   : > { %v532_v2 = vpop.permute.xlu1 %531 }
 0x3a4   : > { %v542_v3 = vsel %vm264_vm0, %v325_v41, %v532_v2 }
 0x413   : > { %v540_v4 = vpop.permute.xlu1 %539  ;;  %v536_v5 = vpop.permute.xlu0 %535 }
 0x414   : > { %v544_v6 = vsel %vm543_vm2, %v542_v3, %v536_v5 }
 0x415   : > { %v546_v7 = vsel %vm545_vm3, %v544_v6, %v540_v4 }
 0x416   : > { %547 = vst [vmem:[%s258_s10] sm:$0xff] %v546_v7 }
 0x417 PF: > { %s14_s15 = sadd.s32 1, %s709_s15  }
 0x418   : > { %p11_p4 = scmp.ge.s32.totalorder %s14_s15, 4  }
 0x41a   :  { %13 = sbr.rel (!%p11_p4) target bundleno = 1 (0x1), region = 75 }

// kernel: decoder_forward.18
= control target key start
LH: loop header
LB: loop body
LE: loop exit
PB: predicated region body
PF: predicated region fallthrough
CT: control target
= control target key end

     0   :  { %s680_s12 = smov 0   ;;  %s682_s13 = smov 0   ;;  %s811_s0 = inlined_call_operand.vmem [shape: f32[16,128], index: 0, kind: input, shape index: {}]   ;;  %s812_s1 = inlined_call_operand.vmem [shape: f32[128,384], index: 1, kind: input, shape index: {}]   ;;  %s813_s2 = inlined_call_operand.vmem [shape: f32[1,384], index: 2, kind: input, shape index: {}]   ;;  %s814_s3 = inlined_call_operand.vmem [shape: f32[16,384], index: 3, kind: output, shape index: {}]  }
   0x1   :  { %s684_s14 = smov 0   ;;  %s686_s15 = smov 0  }
   0x2   :  { %s688_s16 = smov 0  }
   0x3 LB: > { %s28_s17 = sadd.s32 1, %s654_s15  ;;  %s549_s18 = sadd.s32 4294967295, %s658_s16   ;;  %s658_s16 = sphi %s688_s16, %s13_s16   ;;  %s654_s15 = sphi %s686_s15, %s819_s15   ;;  %s650_s14 = sphi %s684_s14, %s818_s14   ;;  %s646_s13 = sphi %s682_s13, %s817_s13   ;;  %s642_s12 = sphi %s680_s12, %s816_s12  }
   0x4   : > { %p30_p0 = scmp.ge.s32.totalorder %s28_s17, 3  ;;  %p76_p1 = scmp.ne.s32.totalorder %s646_s13, %s642_s12 }
   0x5   : > { %p77_p2 = scmp.eq.s32.totalorder %s658_s16, 0  ;;  %p134_p4 = scmp.eq.s32.totalorder %s549_s18, 2 }
   0x6   : > { %s821_s17 = smov (%p30_p0, %s28_s17), 0  ;;  %s69_s20 = sadd.s32 1, %s646_s13 }
   0x7   : > { %p78_p3 = por %p77_p2, %p76_p1  ;;  %s65_s19 = ssub.s32 %s654_s15, %s821_s17 }
   0x8   : > { %p67_p5 = scmp.eq.s32.totalorder %s65_s19, 0  ;;  %p715_p6 = por %p134_p4, %p76_p1 }
   0x9   : > { %p553_p7 = scmp.ge.s32.totalorder %s658_s16, 3 }
   0xa   : > { %s720_s22 = scalar_select %p67_p5, %s646_s13, %s69_s20  }
   0xb   : > { %168 = sbr.rel (%p553_p7) target bundleno = 36 (0x24), region = 20 }
  0x10   : > { %171 = sbr.rel (!%p78_p3) target bundleno = 36 (0x24), region = 24  ;;  %s173_s23 = sand.u32 (%p78_p3), 1, %s646_s13  }
  0x11   : > { %s555_s24 = sshll.u32 (%p78_p3), %s654_s15, 3  ;;  %s554_s25 = sshll.u32 (%p78_p3), %s173_s23, 7 }
  0x12   : > { %s728_s28 = scalar_lea.vmem (%p78_p3), %s812_s1, %s555_s24  ;;  %s175_s29 = scalar_lea.vmem (%p78_p3), [#allocation3], %s554_s25 }
  0x13   : > { %v239_v0 = vld [vmem:[%s728_s28] sm:$0xff] (%p78_p3)  ;;  %v241_v1 = vld [vmem:[%s728_s28 + $0x18] sm:$0xff] (%p78_p3)  ;;  %v243_v2 = vld [vmem:[%s728_s28 + $0x30] sm:$0xff] (%p78_p3) }
  0x14   : > { %240 = vst [vmem:[%s175_s29] sm:$0xff] (%p78_p3), %v239_v0  ;;  %v245_v3 = vld [vmem:[%s728_s28 + $0x48] sm:$0xff] (%p78_p3)  ;;  %v247_v4 = vld [vmem:[%s728_s28 + $0x60] sm:$0xff] (%p78_p3)  ;;  %v249_v5 = vld [vmem:[%s728_s28 + $0x78] sm:$0xff] (%p78_p3) }
  0x15   : > { %242 = vst [vmem:[%s175_s29 + $0x8] sm:$0xff] %v241_v1  ;;  %v251_v6 = vld [vmem:[%s728_s28 + $0x90] sm:$0xff]  ;;  %v253_v7 = vld [vmem:[%s728_s28 + $0xa8] sm:$0xff]  ;;  %v255_v8 = vld [vmem:[%s728_s28 + $0xc0] sm:$0xff] }
  0x16   : > { %244 = vst [vmem:[%s175_s29 + $0x10] sm:$0xff] %v243_v2  ;;  %v257_v9 = vld [vmem:[%s728_s28 + $0xd8] sm:$0xff]  ;;  %v259_v10 = vld [vmem:[%s728_s28 + $0xf0] sm:$0xff]  ;;  %v261_v11 = vld [vmem:[%s728_s28 + $0x108] sm:$0xff] }
  0x17   : > { %246 = vst [vmem:[%s175_s29 + $0x18] sm:$0xff] %v245_v3  ;;  %v263_v12 = vld [vmem:[%s728_s28 + $0x120] sm:$0xff]  ;;  %v265_v13 = vld [vmem:[%s728_s28 + $0x138] sm:$0xff]  ;;  %v267_v14 = vld [vmem:[%s728_s28 + $0x150] sm:$0xff] }
  0x18   : > { %248 = vst [vmem:[%s175_s29 + $0x20] sm:$0xff] %v247_v4  ;;  %v269_v15 = vld [vmem:[%s728_s28 + $0x168] sm:$0xff] }
  0x19   : > { %250 = vst [vmem:[%s175_s29 + $0x28] sm:$0xff] %v249_v5 }
  0x1a   : > { %252 = vst [vmem:[%s175_s29 + $0x30] sm:$0xff] %v251_v6 }
  0x1b   : > { %254 = vst [vmem:[%s175_s29 + $0x38] sm:$0xff] %v253_v7 }
  0x1c   : > { %256 = vst [vmem:[%s175_s29 + $0x40] sm:$0xff] %v255_v8 }
  0x1d   : > { %258 = vst [vmem:[%s175_s29 + $0x48] sm:$0xff] %v257_v9 }
  0x1e   : > { %260 = vst [vmem:[%s175_s29 + $0x50] sm:$0xff] %v259_v10 }
  0x1f   : > { %262 = vst [vmem:[%s175_s29 + $0x58] sm:$0xff] %v261_v11 }
  0x20   : > { %264 = vst [vmem:[%s175_s29 + $0x60] sm:$0xff] %v263_v12 }
  0x21   : > { %266 = vst [vmem:[%s175_s29 + $0x68] sm:$0xff] %v265_v13 }
  0x22   : > { %268 = vst [vmem:[%s175_s29 + $0x70] sm:$0xff] %v267_v14 }
  0x23   : > { %270 = vst [vmem:[%s175_s29 + $0x78] sm:$0xff] %v269_v15 }
  0x24 PF: > { %p556_p8 = scmp.ge.s32.totalorder %s658_s16, 1  ;;  %p281_p9 = scmp.lt.s32.totalorder %s658_s16, 4 }
  0x26   : > { %p282_p10 = pnand %p556_p8, %p281_p9 }
  0x27   : > { %s288_s30 = sand.u32 (!%p282_p10), 1, %s642_s12   ;;  %p331_p11 = scmp.lt.s32.totalorder (!%p282_p10), %s650_s14, 2 }
  0x28   : > { %285 = sbr.rel (%p282_p10) target bundleno = 215 (0xd7), region = 66  ;;  %s557_s4 = sshll.u32 (!%p282_p10), %s288_s30, 7 }
  0x29   : > { %s752_s5 = scalar_lea.vmem (!%p282_p10), [#allocation3], %s557_s4  ;;  %s558_s20 = sshll.u32 (!%p282_p10), %s288_s30, 4 }
  0x2a   : > { %s320_s25 = scalar_lea.vmem (!%p282_p10), [#allocation4], %s558_s20 }
  0x2d   : > { %v360_v16 = vld [vmem:[%s752_s5 + $0x78] sm:$0xff]  ;;  %v359_v17 = vld [vmem:[%s752_s5 + $0x70] sm:$0xff]  ;;  %s757_s6 = scalar_select %p331_p11, %s650_s14, 2  ;;  %v358_v18 = vld [vmem:[%s752_s5 + $0x68] sm:$0xff] }
  0x2e   : > { %361 = vmatpush.msra.mxu0 %v360_v16  ;;  %563 = vmatpush.msra.mxu1 %v360_v16  ;;  %v357_v19 = vld [vmem:[%s752_s5 + $0x60] sm:$0xff]  ;;  %v356_v20 = vld [vmem:[%s752_s5 + $0x58] sm:$0xff]  ;;  %v355_v21 = vld [vmem:[%s752_s5 + $0x50] sm:$0xff]  ;;  %s560_s26 = sshll.u32 (%p715_p6), %s650_s14, 3 }
  0x2f   : > { %s333_s9 = scalar_lea.vmem %s813_s2, %s757_s6  ;;  %v354_v22 = vld [vmem:[%s752_s5 + $0x48] sm:$0xff]  ;;  %v353_v23 = vld [vmem:[%s752_s5 + $0x40] sm:$0xff]  ;;  %v352_v24 = vld [vmem:[%s752_s5 + $0x38] sm:$0xff]  ;;  %s412_s28 = scalar_lea.vmem (%p715_p6), %s814_s3, %s560_s26 }
  0x30   : > { %362 = vmatpush.msra.mxu0 %v359_v17  ;;  %564 = vmatpush.msra.mxu1 %v359_v17  ;;  %v351_v25 = vld [vmem:[%s752_s5 + $0x30] sm:$0xff]  ;;  %v350_v26 = vld [vmem:[%s752_s5 + $0x28] sm:$0xff]  ;;  %v349_v27 = vld [vmem:[%s752_s5 + $0x20] sm:$0xff] }
  0x31   : > { %v348_v28 = vld [vmem:[%s752_s5 + $0x18] sm:$0xff]  ;;  %v347_v29 = vld [vmem:[%s752_s5 + $0x10] sm:$0xff]  ;;  %v346_v30 = vld [vmem:[%s752_s5 + $0x8] sm:$0xff] }
  0x32   : > { %363 = vmatpush.msra.mxu0 %v358_v18  ;;  %565 = vmatpush.msra.mxu1 %v358_v18  ;;  %v345_v31 = vld [vmem:[%s752_s5] sm:$0xff]  ;;  %v344_v33 = vld [vmem:[%s811_s0 + $0x8] sm:$0xff] }
  0x33   : > { %v343_v32 = vld [vmem:[%s811_s0] sm:$0xff] }
  0x34   : > { %364 = vmatpush.msra.mxu0 %v357_v19  ;;  %566 = vmatpush.msra.mxu1 %v357_v19  ;;  %v619_v34 = vld [vmem:[%s333_s9] ss:$0 sm:$0xff] }
  0x36   : > { %365 = vmatpush.msra.mxu0 %v356_v20  ;;  %567 = vmatpush.msra.mxu1 %v356_v20 }
  0x38   : > { %366 = vmatpush.msra.mxu0 %v355_v21  ;;  %568 = vmatpush.msra.mxu1 %v355_v21 }
  0x3a   : > { %367 = vmatpush.msra.mxu0 %v354_v22  ;;  %569 = vmatpush.msra.mxu1 %v354_v22 }
  0x3c   : > { %368 = vmatpush.msra.mxu0 %v353_v23  ;;  %570 = vmatpush.msra.mxu1 %v353_v23 }
  0x3e   : > { %369 = vmatpush.msra.mxu0 %v352_v24  ;;  %571 = vmatpush.msra.mxu1 %v352_v24 }
  0x40   : > { %370 = vmatpush.msra.mxu0 %v351_v25  ;;  %572 = vmatpush.msra.mxu1 %v351_v25 }
  0x42   : > { %371 = vmatpush.msra.mxu0 %v350_v26  ;;  %573 = vmatpush.msra.mxu1 %v350_v26 }
  0x44   : > { %372 = vmatpush.msra.mxu0 %v349_v27  ;;  %574 = vmatpush.msra.mxu1 %v349_v27 }
  0x46   : > { %373 = vmatpush.msra.mxu0 %v348_v28  ;;  %575 = vmatpush.msra.mxu1 %v348_v28 }
  0x48   : > { %374 = vmatpush.msra.mxu0 %v347_v29  ;;  %576 = vmatpush.msra.mxu1 %v347_v29 }
  0x4a   : > { %375 = vmatpush.msra.mxu0 %v346_v30  ;;  %577 = vmatpush.msra.mxu1 %v346_v30 }
  0x4c   : > { %376 = vmatpush.msra.mxu0 %v345_v31  ;;  %578 = vmatpush.msra.mxu1 %v345_v31 }
  0x4d   : > { %377 = vmatmul.f32.vlgmr.msra.gmra.mxu0 %v343_v32  ;;  %380 = vmatmul.f32.vlgmr.msra.gmra.mxu1 %v344_v33 }
  0xca   : > { %v378_v35 = vpop.f32.mrf.mxu0  ;;  %v381_v36 = vpop.f32.mrf.mxu1  ;;  %407 = sbr.rel (!%p715_p6) target bundleno = 215 (0xd7), region = 82 }
  0xcb   : > { %v397_v37 = vadd.f32 %v619_v34, %v378_v35  ;;  %v398_v38 = vadd.f32 %v619_v34, %v381_v36 }
  0xcd   : > { %399 = vst [vmem:[%s320_s25] sm:$0xff] %v397_v37 }
  0xce   : > { %400 = vst [vmem:[%s320_s25 + $0x8] sm:$0xff] %v398_v38 }
  0xd4   : > { %v443_v39 = vld [vmem:[%s320_s25] sm:$0xff] }
  0xd5   : > { %v445_v40 = vld [vmem:[%s320_s25 + $0x8] sm:$0xff]  ;;  %444 = vst [vmem:[%s412_s28] sm:$0xff] %v443_v39 }
  0xd6   : > { %446 = vst [vmem:[%s412_s28 + $0x18] sm:$0xff] %v445_v40 }
  0xd7 PF: > { %s13_s16 = sadd.s32 1, %s658_s16   ;;  %s816_s12 = smov %s646_s13 }
  0xd8   : > { %p10_p12 = scmp.ge.s32.totalorder %s13_s16, 5   ;;  %s817_s13 = smov %s720_s22 }
  0xd9   : > { %s818_s14 = smov %s654_s15  ;;  %s819_s15 = smov %s821_s17 }
  0xda   :  { %12 = sbr.rel (!%p10_p12) target bundleno = 3 (0x3), region = 157 }

// kernel: decoder_forward.20
= control target key start
LH: loop header
LB: loop body
LE: loop exit
PB: predicated region body
PF: predicated region fallthrough
CT: control target
= control target key end

     0   :  { %v163_v27 = vmov 128.0   ;;  %s274_s1 = inlined_call_operand.vmem [shape: f32[128,128], index: 1, kind: input, shape index: {}]   ;;  %s275_s2 = inlined_call_operand.vmem [shape: f32[1,128], index: 2, kind: input, shape index: {}]   ;;  %s276_s0 = inlined_call_operand.vmem [shape: f32[16,128], index: 0, kind: input, shape index: {}]   ;;  %s277_s3 = inlined_call_operand.vmem [shape: f32[16,128], index: 3, kind: input, shape index: {}]   ;;  %s278_s4 = inlined_call_operand.vmem [shape: f32[1,128], index: 4, kind: input, shape index: {}]   ;;  %s279_s5 = inlined_call_operand.vmem [shape: f32[1,128], index: 5, kind: input, shape index: {}]   ;;  %s280_s6 = inlined_call_operand.vmem [shape: f32[16,128], index: 6, kind: output, shape index: {}]  }
   0x1   :  { %v40_v0 = vld [vmem:[%s274_s1 + $0x78] sm:$0xff]  ;;  %v39_v1 = vld [vmem:[%s274_s1 + $0x70] sm:$0xff]  ;;  %v38_v2 = vld [vmem:[%s274_s1 + $0x68] sm:$0xff]  ;;  %157 = vrcp.f32 %v163_v27 }
   0x2   :  { %45 = vmatpush.msra.mxu0 %v40_v0  ;;  %137 = vmatpush.msra.mxu1 %v40_v0  ;;  %v37_v3 = vld [vmem:[%s274_s1 + $0x60] sm:$0xff]  ;;  %v36_v4 = vld [vmem:[%s274_s1 + $0x58] sm:$0xff]  ;;  %v35_v5 = vld [vmem:[%s274_s1 + $0x50] sm:$0xff] }
   0x3   :  { %v34_v6 = vld [vmem:[%s274_s1 + $0x48] sm:$0xff]  ;;  %v33_v7 = vld [vmem:[%s274_s1 + $0x40] sm:$0xff]  ;;  %v32_v8 = vld [vmem:[%s274_s1 + $0x38] sm:$0xff] }
   0x4   :  { %46 = vmatpush.msra.mxu0 %v39_v1  ;;  %138 = vmatpush.msra.mxu1 %v39_v1  ;;  %v31_v9 = vld [vmem:[%s274_s1 + $0x30] sm:$0xff]  ;;  %v30_v10 = vld [vmem:[%s274_s1 + $0x28] sm:$0xff]  ;;  %v29_v11 = vld [vmem:[%s274_s1 + $0x20] sm:$0xff] }
   0x5   :  { %v28_v12 = vld [vmem:[%s274_s1 + $0x18] sm:$0xff]  ;;  %v27_v13 = vld [vmem:[%s274_s1 + $0x10] sm:$0xff]  ;;  %v26_v14 = vld [vmem:[%s274_s1 + $0x8] sm:$0xff] }
   0x6   :  { %47 = vmatpush.msra.mxu0 %v38_v2  ;;  %139 = vmatpush.msra.mxu1 %v38_v2  ;;  %v25_v15 = vld [vmem:[%s274_s1] sm:$0xff]  ;;  %v24_v17 = vld [vmem:[%s276_s0 + $0x8] sm:$0xff] }
   0x7   :  { %v23_v16 = vld [vmem:[%s276_s0] sm:$0xff]  ;;  %v69_v25 = vld [vmem:[%s277_s3 + $0x8] sm:$0xff]  ;;  %v158_v28 = vpop.eup %157 }
   0x8   :  { %48 = vmatpush.msra.mxu0 %v37_v3  ;;  %140 = vmatpush.msra.mxu1 %v37_v3  ;;  %v154_v18 = vld [vmem:[%s275_s2] ss:$0 sm:$0xff]  ;;  %v77_v29 = vmul.f32 128.0, %v158_v28  ;;  %vm81_vm0 = vweird.f32 %v158_v28 }
   0x9   :  { %v68_v20 = vld [vmem:[%s277_s3] sm:$0xff] }
   0xa   :  { %49 = vmatpush.msra.mxu0 %v36_v4  ;;  %141 = vmatpush.msra.mxu1 %v36_v4  ;;  %v78_v30 = vsub.f32 1.0, %v77_v29  ;;  %v155_v56 = vld [vmem:[%s278_s4] ss:$0 sm:$0xff] }
   0xb   :  { %v156_v59 = vld [vmem:[%s279_s5] ss:$0 sm:$0xff] }
   0xc   :  { %50 = vmatpush.msra.mxu0 %v35_v5  ;;  %142 = vmatpush.msra.mxu1 %v35_v5  ;;  %v79_v31 = vmul.f32 %v158_v28, %v78_v30 }
   0xe   :  { %51 = vmatpush.msra.mxu0 %v34_v6  ;;  %143 = vmatpush.msra.mxu1 %v34_v6  ;;  %v80_v32 = vadd.f32 %v158_v28, %v79_v31 }
  0x10   :  { %52 = vmatpush.msra.mxu0 %v33_v7  ;;  %144 = vmatpush.msra.mxu1 %v33_v7  ;;  %v82_v33 = vsel %vm81_vm0, %v158_v28, %v80_v32 }
  0x12   :  { %53 = vmatpush.msra.mxu0 %v32_v8  ;;  %145 = vmatpush.msra.mxu1 %v32_v8 }
  0x14   :  { %54 = vmatpush.msra.mxu0 %v31_v9  ;;  %146 = vmatpush.msra.mxu1 %v31_v9 }
  0x16   :  { %55 = vmatpush.msra.mxu0 %v30_v10  ;;  %147 = vmatpush.msra.mxu1 %v30_v10 }
  0x18   :  { %56 = vmatpush.msra.mxu0 %v29_v11  ;;  %148 = vmatpush.msra.mxu1 %v29_v11 }
  0x1a   :  { %57 = vmatpush.msra.mxu0 %v28_v12  ;;  %149 = vmatpush.msra.mxu1 %v28_v12 }
  0x1c   :  { %58 = vmatpush.msra.mxu0 %v27_v13  ;;  %150 = vmatpush.msra.mxu1 %v27_v13 }
  0x1e   :  { %59 = vmatpush.msra.mxu0 %v26_v14  ;;  %151 = vmatpush.msra.mxu1 %v26_v14 }
  0x20   :  { %60 = vmatpush.msra.mxu0 %v25_v15  ;;  %152 = vmatpush.msra.mxu1 %v25_v15 }
  0x21   :  { %61 = vmatmul.f32.vlgmr.msra.gmra.mxu0 %v23_v16  ;;  %64 = vmatmul.f32.vlgmr.msra.gmra.mxu1 %v24_v17 }
  0x9e   :  { %v62_v19 = vpop.f32.mrf.mxu0  ;;  %v65_v22 = vpop.f32.mrf.mxu1 }
  0x9f   :  { %v63_v21 = vadd.f32 %v154_v18, %v62_v19  ;;  %v66_v24 = vadd.f32 %v154_v18, %v65_v22 }
  0xa1   :  { %v70_v23 = vadd.f32 %v68_v20, %v63_v21  ;;  %v71_v26 = vadd.f32 %v69_v25, %v66_v24 }
  0xa3   :  { %72 = vadd.xlane.f32.xlu0 %v70_v23 }
  0xab   :  { %74 = vadd.xlane.f32.xlu0 %v71_v26 }
 0x116   :  { %v73_v34 = vpop.xlane.xlu0 %72 }
 0x117   :  { %v83_v35 = vmul.f32 %v82_v33, %v73_v34 }
 0x119   :  { %v85_v36 = vsub.f32 %v70_v23, %v83_v35 }
 0x11b   :  { %v87_v37 = vmul.f32 %v85_v36, %v85_v36 }
 0x11d   :  { %89 = vadd.xlane.f32.xlu1 %v87_v37 }
 0x11e   :  { %v75_v38 = vpop.xlane.xlu0 %74 }
 0x11f   :  { %v84_v39 = vmul.f32 %v82_v33, %v75_v38 }
 0x121   :  { %v86_v40 = vsub.f32 %v71_v26, %v84_v39 }
 0x123   :  { %v88_v41 = vmul.f32 %v86_v40, %v86_v40 }
 0x125   :  { %91 = vadd.xlane.f32.xlu1 %v88_v41 }
 0x190   :  { %v90_v42 = vpop.xlane.xlu1 %89 }
 0x191   :  { %v93_v43 = vmul.f32 %v90_v42, %v82_v33 }
 0x193   :  { %v95_v44 = vadd.f32 1e-06, %v93_v43 }
 0x195   :  { %159 = vrsqrt.f32 %v95_v44  ;;  %vm103_vm2 = vweird.f32 %v95_v44 }
 0x198   :  { %v92_v45 = vpop.xlane.xlu1 %91 }
 0x199   :  { %v94_v46 = vmul.f32 %v92_v45, %v82_v33 }
 0x19b   :  { %v160_v47 = vpop.eup %159  ;;  %v96_v48 = vadd.f32 1e-06, %v94_v46 }
 0x19c   :  { %v98_v49 = vmul.f32 %v160_v47, %v95_v44  ;;  %vm104_vm1 = vweird.f32 %v160_v47 }
 0x19d   :  { %161 = vrsqrt.f32 %v96_v48  ;;  %vm105_vm3 = vmor %vm103_vm2, %vm104_vm1  ;;  %vm113_vm5 = vweird.f32 %v96_v48 }
 0x19e   :  { %v99_v50 = vmul.f32 %v160_v47, %v98_v49 }
 0x1a0   :  { %v100_v51 = vmul.f32 0.5, %v99_v50 }
 0x1a2   :  { %v101_v52 = vsub.f32 1.5, %v100_v51 }
 0x1a3   :  { %v162_v53 = vpop.eup %161 }
 0x1a4   :  { %v102_v54 = vmul.f32 %v160_v47, %v101_v52  ;;  %v108_v55 = vmul.f32 %v162_v53, %v96_v48  ;;  %vm114_vm4 = vweird.f32 %v162_v53 }
 0x1a5   :  { %vm115_vm6 = vmor %vm113_vm5, %vm114_vm4 }
 0x1a6   :  { %v106_v57 = vsel %vm105_vm3, %v160_v47, %v102_v54  ;;  %v109_v58 = vmul.f32 %v162_v53, %v108_v55 }
 0x1a7   :  { %v117_v60 = vmul.f32 %v106_v57, %v85_v36 }
 0x1a8   :  { %v110_v61 = vmul.f32 0.5, %v109_v58 }
 0x1a9   :  { %v123_v62 = vmul.f32 %v155_v56, %v117_v60 }
 0x1aa   :  { %v111_v63 = vsub.f32 1.5, %v110_v61 }
 0x1ab   :  { %v129_v0 = vadd.f32 %v156_v59, %v123_v62 }
 0x1ac   :  { %v112_v1 = vmul.f32 %v162_v53, %v111_v63 }
 0x1ad   :  { %131 = vst [vmem:[%s280_s6] sm:$0xff] %v129_v0 }
 0x1ae   :  { %v116_v2 = vsel %vm115_vm6, %v162_v53, %v112_v1 }
 0x1af   :  { %v118_v3 = vmul.f32 %v116_v2, %v86_v40 }
 0x1b1   :  { %v124_v4 = vmul.f32 %v155_v56, %v118_v3 }
 0x1b3   :  { %v130_v5 = vadd.f32 %v156_v59, %v124_v4 }
 0x1b5   :  { %132 = vst [vmem:[%s280_s6 + $0x8] sm:$0xff] %v130_v5 }

// kernel: decoder_forward.22
= control target key start
LH: loop header
LB: loop body
LE: loop exit
PB: predicated region body
PF: predicated region fallthrough
CT: control target
= control target key end

     0   :  { %8 = vsyncpa [#allocation4], 0  ;;  %s147_s15 = smov [#allocation3]   ;;  %s148_s17 = smov 128   ;;  %s188_s0 = inlined_call_operand.vmem [shape: f32[16,128], index: 0, kind: input, shape index: {}]   ;;  %s189_s1 = inlined_call_operand.hbm [shape: f32[128,128], index: 1, kind: input, shape index: {}]   ;;  %s190_s2 = inlined_call_operand.vmem [shape: f32[1,128], index: 2, kind: input, shape index: {}]   ;;  %s191_s3 = inlined_call_operand.vmem [shape: f32[16,128], index: 3, kind: output, shape index: {}]  }
   0x1   :  { %s15_s14 = sshll.u32 %s189_s1, 4  ;;  %s17_s16 = sshll.u32 %s147_s15, 4  ;;  %s16_s14 = int_to_ptr.hbm [resolvable:$true] %s15_s14  ;;  %s18_s16 = int_to_ptr.vmem [resolvable:$true] %s17_s16 }
   0x2   :  { %s149_s18 = smov 8  }
   0x3   :  { %23 = dma.hbm_to_vmem [thread:$0]  %s16_s14, 2048, %s18_s16, [#allocation4], %s148_s17, %s148_s17, %s149_s18  }
   0x4   :  { %145 = dma.done.wait [#allocation4], 2048  }
   0x5   :  { %146 = vsyncadd [#allocation4], 4294965248  ;;  %v55_v0 = vld [vmem:[#allocation3 + $0x78] sm:$0xff]  ;;  %v54_v1 = vld [vmem:[#allocation3 + $0x70] sm:$0xff] }
   0x6   :  { %56 = vmatpush.msra.mxu0 %v55_v0  ;;  %101 = vmatpush.msra.mxu1 %v55_v0  ;;  %v53_v2 = vld [vmem:[#allocation3 + $0x68] sm:$0xff]  ;;  %v52_v3 = vld [vmem:[#allocation3 + $0x60] sm:$0xff]  ;;  %v51_v4 = vld [vmem:[#allocation3 + $0x58] sm:$0xff] }
   0x7   :  { %v50_v5 = vld [vmem:[#allocation3 + $0x50] sm:$0xff]  ;;  %v49_v6 = vld [vmem:[#allocation3 + $0x48] sm:$0xff]  ;;  %v48_v7 = vld [vmem:[#allocation3 + $0x40] sm:$0xff] }
   0x8   :  { %57 = vmatpush.msra.mxu0 %v54_v1  ;;  %102 = vmatpush.msra.mxu1 %v54_v1  ;;  %v47_v8 = vld [vmem:[#allocation3 + $0x38] sm:$0xff]  ;;  %v46_v9 = vld [vmem:[#allocation3 + $0x30] sm:$0xff]  ;;  %v45_v10 = vld [vmem:[#allocation3 + $0x28] sm:$0xff] }
   0x9   :  { %v44_v11 = vld [vmem:[#allocation3 + $0x20] sm:$0xff]  ;;  %v43_v12 = vld [vmem:[#allocation3 + $0x18] sm:$0xff]  ;;  %v42_v13 = vld [vmem:[#allocation3 + $0x10] sm:$0xff] }
   0xa   :  { %58 = vmatpush.msra.mxu0 %v53_v2  ;;  %103 = vmatpush.msra.mxu1 %v53_v2  ;;  %v41_v14 = vld [vmem:[#allocation3 + $0x8] sm:$0xff]  ;;  %v40_v15 = vld [vmem:[#allocation3] sm:$0xff] }
   0xb   :  { %v38_v16 = vld [vmem:[%s188_s0] sm:$0xff]  ;;  %v39_v17 = vld [vmem:[%s188_s0 + $0x8] sm:$0xff] }
   0xc   :  { %59 = vmatpush.msra.mxu0 %v52_v3  ;;  %104 = vmatpush.msra.mxu1 %v52_v3  ;;  %v120_v18 = vld [vmem:[%s190_s2] ss:$0 sm:$0xff] }
   0xe   :  { %60 = vmatpush.msra.mxu0 %v51_v4  ;;  %105 = vmatpush.msra.mxu1 %v51_v4 }
  0x10   :  { %61 = vmatpush.msra.mxu0 %v50_v5  ;;  %106 = vmatpush.msra.mxu1 %v50_v5 }
  0x12   :  { %62 = vmatpush.msra.mxu0 %v49_v6  ;;  %107 = vmatpush.msra.mxu1 %v49_v6 }
  0x14   :  { %63 = vmatpush.msra.mxu0 %v48_v7  ;;  %108 = vmatpush.msra.mxu1 %v48_v7 }
  0x16   :  { %64 = vmatpush.msra.mxu0 %v47_v8  ;;  %109 = vmatpush.msra.mxu1 %v47_v8 }
  0x18   :  { %65 = vmatpush.msra.mxu0 %v46_v9  ;;  %110 = vmatpush.msra.mxu1 %v46_v9 }
  0x1a   :  { %66 = vmatpush.msra.mxu0 %v45_v10  ;;  %111 = vmatpush.msra.mxu1 %v45_v10 }
  0x1c   :  { %67 = vmatpush.msra.mxu0 %v44_v11  ;;  %112 = vmatpush.msra.mxu1 %v44_v11 }
  0x1e   :  { %68 = vmatpush.msra.mxu0 %v43_v12  ;;  %113 = vmatpush.msra.mxu1 %v43_v12 }
  0x20   :  { %69 = vmatpush.msra.mxu0 %v42_v13  ;;  %114 = vmatpush.msra.mxu1 %v42_v13 }
  0x22   :  { %70 = vmatpush.msra.mxu0 %v41_v14  ;;  %115 = vmatpush.msra.mxu1 %v41_v14 }
  0x24   :  { %71 = vmatpush.msra.mxu0 %v40_v15  ;;  %116 = vmatpush.msra.mxu1 %v40_v15 }
  0x25   :  { %72 = vmatmul.f32.vlgmr.msra.gmra.mxu0 %v38_v16  ;;  %75 = vmatmul.f32.vlgmr.msra.gmra.mxu1 %v39_v17 }
  0xa2   :  { %v73_v19 = vpop.f32.mrf.mxu0  ;;  %v76_v20 = vpop.f32.mrf.mxu1 }
  0xa3   :  { %v92_v21 = vadd.f32 %v120_v18, %v73_v19  ;;  %v93_v22 = vadd.f32 %v120_v18, %v76_v20 }
  0xa5   :  { %94 = vst [vmem:[%s191_s3] sm:$0xff] %v92_v21 }
  0xa6   :  { %95 = vst [vmem:[%s191_s3 + $0x8] sm:$0xff] %v93_v22 }
  0xa7   :  { %100 = vsyncpa [#allocation4], 1 }

// kernel: decoder_forward.23
= control target key start
LH: loop header
LB: loop body
LE: loop exit
PB: predicated region body
PF: predicated region fallthrough
CT: control target
= control target key end

     0   :  { %s725_s15 = smov 0   ;;  %s793_s0 = inlined_call_operand.vmem [shape: f32[2,8,256], index: 0, kind: input, shape index: {}, may-alias: {0,1}]   ;;  %s794_s1 = inlined_call_operand.vmem [shape: f32[2,8,256], index: 1, kind: input, shape index: {}, may-alias: {0,1}]   ;;  %s795_s2 = inlined_call_operand.vmem [shape: f32[2,8,128], index: 2, kind: input, shape index: {}]   ;;  %s796_s3 = inlined_call_operand.vmem [shape: f32[2,1,8], index: 3, kind: input, shape index: {}]   ;;  %s797_s4 = inlined_call_operand.vmem [shape: f32[2,8,128], index: 4, kind: output, shape index: {}]  }
   0x1 LB: > { %s634_s16 = sadd.s32 4294967295, %s695_s15   ;;  %p638_p0 = scmp.ge.s32.totalorder %s695_s15, 1  ;;  %s695_s15 = sphi %s725_s15, %s14_s15  }
   0x2   : > { %p190_p1 = scmp.lt.s32.totalorder %s695_s15, 3 }
   0x4   : > { %p191_p2 = pnand %p638_p0, %p190_p1 }
   0x5   : > { %p228_p3 = scmp.lt.s32.totalorder (!%p191_p2), %s634_s16, 1  ;;  %s697_s24 = smov (!%p191_p2), 96  }
   0x6   : > { %194 = sbr.rel (%p191_p2) target bundleno = 1046 (0x416), region = 36  ;;  %s698_s25 = smov (!%p191_p2), 64  }
   0x7   : > { %s699_s26 = smov (!%p191_p2), 32  }
   0xb   : > { %s799_s16 = smov (!%p228_p3, %s634_s16), 1  ;;  %vm255_vm0 = vcmask 261120   ;;  %vm287_vm1 = vcmask 64512   ;;  %vm537_vm2 = vcmask 523264   ;;  %vm539_vm3 = vcmask 785408  }
   0xc   : > { %s660_s17 = sshll.u32 %s799_s16, 4  ;;  %s245_s29 = scalar_lea.vmem %s796_s3, %s799_s16 }
   0xd   : > { %s585_s20 = scalar_lea.vmem %s794_s1, %s660_s17  ;;  %s232_s23 = scalar_lea.vmem %s793_s0, %s660_s17  ;;  %v253_v5 = vld [vmem:[%s245_s29] sm:$0x1] }
   0xe   : > { %v645_v0 = vld [vmem:[%s585_s20 + $0x8] sm:$0xff]  ;;  %v250_v1 = vld [vmem:[%s232_s23] sm:$0xff]  ;;  %v254_v7 = vmul.f32 -1e+09, %v253_v5  ;;  %s643_s30 = sshll.u32 %s799_s16, 3 }
   0xf   : > { %646 = vmatpush.xpose.msk.msra.mxu0 %vm255_vm0, %v645_v0  ;;  %324 = vrot.lane.b32.xlu1 %v645_v0, %s697_s24  ;;  %s242_s7 = scalar_lea.vmem %s795_s2, %s643_s30  ;;  %s249_s10 = scalar_lea.vmem %s797_s4, %s643_s30 }
  0x10   : > { %392 = vrot.lane.b32.xlu2 %v645_v0, %s698_s25  ;;  %v284_v8 = vperm.slane %v254_v7, 0  ;;  %v252_v23 = vld [vmem:[%s242_s7] sm:$0xff] }
  0x11   : > { %317 = vmatpush.msra.mxu1 %v252_v23 }
  0x12   : > { %647 = vmatmul.msk.f32.vlgmr.msra.gmra.mxu0 %vm255_vm0, %v250_v1 }
  0x17   : > { %322 = vrot.lane.b32.xlu1 %v250_v1, %s697_s24 }
  0x18   : > { %459 = vrot.lane.b32.xlu2 %v645_v0, %s699_s26 }
  0x1f   : > { %457 = vrot.lane.b32.xlu1 %v250_v1, %s699_s26 }
  0x6a   : > { %v393_v2 = vpop.permute.xlu2 %392 }
  0x6b   : > { %652 = vmatpush.xpose.msk.msrb.mxu1 %vm255_vm0, %v393_v2 }
  0x72   : > { %v460_v3 = vpop.permute.xlu2 %459 }
  0x73   : > { %655 = vmatpush.xpose.msk.msrb.mxu0 %vm255_vm0, %v460_v3 }
  0x81   : > { %v325_v4 = vpop.permute.xlu1 %324 }
  0x82   : > { %649 = vmatpush.xpose.msk.msra.mxu2 %vm255_vm0, %v325_v4 }
  0x89   : > { %v323_v6 = vpop.permute.xlu1 %322 }
  0x8a   : > { %650 = vmatmul.msk.f32.vlgmr.msra.gmra.mxu2 %vm255_vm0, %v323_v6 }
  0x8f   : > { %v279_v9 = vpop.f32.mrf.mxu0 }
  0x90   : > { %v282_v10 = vmul.f32 0.17677669, %v279_v9 }
  0x91   : > { %v458_v11 = vpop.permute.xlu1 %457 }
  0x92   : > { %v286_v12 = vadd.f32 %v284_v8, %v282_v10  ;;  %656 = vmatmul.msk.f32.vlgmr.msrb.gmra.mxu0 %vm255_vm0, %v458_v11 }
  0x94   : > { %v288_v13 = vsel %vm287_vm1, %v286_v12, -inf }
  0x95   : > { %289 = vmax.xlane.f32.xlu0 %v288_v13 }
 0x108   : > { %v290_v14 = vpop.xlane.xlu0 %289 }
 0x109   : > { %v291_v15 = vsub.f32 %v286_v12, %v290_v14 }
 0x10b   : > { %v292_v16 = vmul.f32 1.442695, %v291_v15 }
 0x10d   : > { %673 = vpow2.f32 %v292_v16  ;;  %v347_v17 = vpop.f32.mrf.mxu2 }
 0x10e   : > { %v350_v18 = vmul.f32 0.17677669, %v347_v17 }
 0x10f   : > { %v482_v24 = vpop.f32.mrf.mxu0 }
 0x110   : > { %v351_v19 = vadd.f32 %v350_v18, %v284_v8  ;;  %v485_v25 = vmul.f32 0.17677669, %v482_v24 }
 0x112   : > { %v352_v20 = vsel %vm287_vm1, %v351_v19, -inf  ;;  %v486_v26 = vadd.f32 %v485_v25, %v284_v8 }
 0x113   : > { %v674_v21 = vpop.eup %673  ;;  %353 = vmax.xlane.f32.xlu2 %v352_v20 }
 0x114   : > { %v294_v22 = vsel %vm287_vm1, %v674_v21, 0.0  ;;  %v487_v27 = vsel %vm287_vm1, %v486_v26, -inf }
 0x115   : > { %295 = vadd.xlane.f32.xlu0 %v294_v22 }
 0x129   : > { %390 = vrot.lane.b32.xlu0 %v250_v1, %s698_s25 }
 0x153   : > { %488 = vmax.xlane.f32.xlu0 %v487_v27 }
 0x167   : > { %431 = vrot.lane.b32.xlu0 %v252_v23, %s698_s25 }
 0x186   : > { %v354_v28 = vpop.xlane.xlu2 %353 }
 0x187   : > { %v355_v29 = vsub.f32 %v351_v19, %v354_v28 }
 0x188   : > { %v296_v30 = vpop.xlane.xlu0 %295 }
 0x189   : > { %675 = vrcp.f32 %v296_v30  ;;  %v356_v31 = vmul.f32 1.442695, %v355_v29 }
 0x18b   : > { %677 = vpow2.f32 %v356_v31 }
 0x18f   : > { %v676_v32 = vpop.eup %675 }
 0x190   : > { %v298_v33 = vmul.f32 %v676_v32, %v674_v21 }
 0x191   : > { %v678_v34 = vpop.eup %677 }
 0x192   : > { %648 = vmatmul.msk.f32.vlgmr.msra.gmra.mxu1 %vm287_vm1, %v298_v33  ;;  %v358_v35 = vsel %vm287_vm1, %v678_v34, 0.0 }
 0x193   : > { %359 = vadd.xlane.f32.xlu2 %v358_v35 }
 0x19b   : > { %v391_v36 = vpop.permute.xlu0 %390 }
 0x19c   : > { %653 = vmatmul.msk.f32.vlgmr.msrb.gmra.mxu1 %vm255_vm0, %v391_v36 }
 0x1c6   : > { %v489_v37 = vpop.xlane.xlu0 %488 }
 0x1c7   : > { %v490_v38 = vsub.f32 %v486_v26, %v489_v37 }
 0x1c9   : > { %v491_v39 = vmul.f32 1.442695, %v490_v38 }
 0x1cb   : > { %679 = vpow2.f32 %v491_v39 }
 0x1d1   : > { %v680_v40 = vpop.eup %679 }
 0x1d2   : > { %v493_v41 = vsel %vm287_vm1, %v680_v40, 0.0 }
 0x1d3   : > { %494 = vadd.xlane.f32.xlu2 %v493_v41 }
 0x1d9   : > { %v432_v56 = vpop.permute.xlu0 %431 }
 0x206   : > { %v360_v51 = vpop.xlane.xlu2 %359 }
 0x20f   : > { %v319_v42 = vpop.f32.mrf.mxu1 }
 0x219   : > { %v415_v43 = vpop.f32.mrf.mxu1 }
 0x21a   : > { %v418_v44 = vmul.f32 0.17677669, %v415_v43 }
 0x21c   : > { %v419_v45 = vadd.f32 %v418_v44, %v284_v8 }
 0x21e   : > { %v420_v46 = vsel %vm287_vm1, %v419_v45, -inf }
 0x21f   : > { %421 = vmax.xlane.f32.xlu1 %v420_v46 }
 0x238   : > { %364 = vrot.lane.b32.xlu1 %v252_v23, %s697_s24 }
 0x246   : > { %v495_v57 = vpop.xlane.xlu2 %494 }
 0x292   : > { %v422_v47 = vpop.xlane.xlu1 %421 }
 0x293   : > { %v423_v48 = vsub.f32 %v419_v45, %v422_v47 }
 0x295   : > { %v424_v49 = vmul.f32 1.442695, %v423_v48 }
 0x297   : > { %681 = vpow2.f32 %v424_v49 }
 0x298   : > { %683 = vrcp.f32 %v360_v51 }
 0x299   : > { %685 = vrcp.f32 %v495_v57 }
 0x29d   : > { %v682_v50 = vpop.eup %681 }
 0x29e   : > { %v426_v52 = vsel %vm287_vm1, %v682_v50, 0.0  ;;  %v684_v53 = vpop.eup %683 }
 0x29f   : > { %427 = vadd.xlane.f32.xlu2 %v426_v52  ;;  %v362_v55 = vmul.f32 %v684_v53, %v678_v34  ;;  %v686_v59 = vpop.eup %685 }
 0x2a0   : > { %v497_v63 = vmul.f32 %v686_v59, %v680_v40 }
 0x2aa   : > { %v365_v54 = vpop.permute.xlu1 %364 }
 0x2ab   : > { %385 = vmatpush.msra.mxu3 %v365_v54 }
 0x2ac   : > { %651 = vmatmul.msk.f32.vlgmr.msra.gmra.mxu3 %vm287_vm1, %v362_v55 }
 0x2ad   : > { %452 = vmatpush.msrb.mxu3 %v432_v56 }
 0x2b7   : > { %498 = vrot.lane.b32.xlu2 %v252_v23, %s699_s26 }
 0x312   : > { %v428_v58 = vpop.xlane.xlu2 %427 }
 0x313   : > { %687 = vrcp.f32 %v428_v58 }
 0x319   : > { %v688_v60 = vpop.eup %687 }
 0x31a   : > { %v499_v61 = vpop.permute.xlu2 %498  ;;  %v430_v62 = vmul.f32 %v688_v60, %v682_v50 }
 0x31b   : > { %519 = vmatpush.msrb.mxu2 %v499_v61 }
 0x31c   : > { %654 = vmatmul.msk.f32.vlgmr.msrb.gmra.mxu3 %vm287_vm1, %v430_v62  ;;  %657 = vmatmul.msk.f32.vlgmr.msrb.gmra.mxu2 %vm287_vm1, %v497_v63 }
 0x32f   : > { %v387_v0 = vpop.f32.mrf.mxu3 }
 0x330   : > { %525 = vrot.lane.b32.xlu1 %v387_v0, %s699_s26 }
 0x39f   : > { %v454_v1 = vpop.f32.mrf.mxu3  ;;  %v521_v2 = vpop.f32.mrf.mxu2 }
 0x3a0   : > { %533 = vrot.lane.b32.xlu1 %v521_v2, %s697_s24  ;;  %529 = vrot.lane.b32.xlu0 %v454_v1, %s698_s25 }
 0x3a2   : > { %v526_v3 = vpop.permute.xlu1 %525 }
 0x3a3   : > { %v536_v4 = vsel %vm255_vm0, %v319_v42, %v526_v3 }
 0x412   : > { %v534_v5 = vpop.permute.xlu1 %533  ;;  %v530_v6 = vpop.permute.xlu0 %529 }
 0x413   : > { %v538_v7 = vsel %vm537_vm2, %v536_v4, %v530_v6 }
 0x414   : > { %v540_v8 = vsel %vm539_vm3, %v538_v7, %v534_v5 }
 0x415   : > { %541 = vst [vmem:[%s249_s10] sm:$0xff] %v540_v8 }
 0x416 PF: > { %s14_s15 = sadd.s32 1, %s695_s15  }
 0x417   : > { %p11_p4 = scmp.ge.s32.totalorder %s14_s15, 4  }
 0x419   :  { %13 = sbr.rel (!%p11_p4) target bundleno = 1 (0x1), region = 75 }

// kernel: decoder_forward.24
= control target key start
LH: loop header
LB: loop body
LE: loop exit
PB: predicated region body
PF: predicated region fallthrough
CT: control target
= control target key end

     0   :  { %11 = vsyncpa [#allocation3], 0  ;;  %s209_s24 = smov [#allocation2]   ;;  %s210_s26 = smov 128   ;;  %s278_s0 = inlined_call_operand.vmem [shape: f32[16,128], index: 0, kind: input, shape index: {}]   ;;  %s279_s1 = inlined_call_operand.hbm [shape: f32[128,128], index: 1, kind: input, shape index: {}]   ;;  %s280_s2 = inlined_call_operand.vmem [shape: f32[1,128], index: 2, kind: input, shape index: {}]   ;;  %s281_s3 = inlined_call_operand.vmem [shape: f32[16,128], index: 3, kind: input, shape index: {}]   ;;  %s282_s4 = inlined_call_operand.vmem [shape: f32[1,128], index: 4, kind: input, shape index: {}]   ;;  %s283_s5 = inlined_call_operand.vmem [shape: f32[1,128], index: 5, kind: input, shape index: {}]   ;;  %s284_s6 = inlined_call_operand.vmem [shape: f32[16,128], index: 6, kind: output, shape index: {}]  }
   0x1   :  { %s18_s23 = sshll.u32 %s279_s1, 4  ;;  %s20_s25 = sshll.u32 %s209_s24, 4  ;;  %s19_s23 = int_to_ptr.hbm [resolvable:$true] %s18_s23  ;;  %s21_s25 = int_to_ptr.vmem [resolvable:$true] %s20_s25 }
   0x2   :  { %s211_s27 = smov 8  }
   0x3   :  { %26 = dma.hbm_to_vmem [thread:$0]  %s19_s23, 2048, %s21_s25, [#allocation3], %s210_s26, %s210_s26, %s211_s27  }
   0x4   :  { %207 = dma.done.wait [#allocation3], 2048  }
   0x5   :  { %208 = vsyncadd [#allocation3], 4294965248  ;;  %v56_v0 = vld [vmem:[#allocation2 + $0x78] sm:$0xff]  ;;  %v55_v1 = vld [vmem:[#allocation2 + $0x70] sm:$0xff]  ;;  %v212_v27 = vmov 128.0  }
   0x6   :  { %61 = vmatpush.msra.mxu0 %v56_v0  ;;  %154 = vmatpush.msra.mxu1 %v56_v0  ;;  %v54_v2 = vld [vmem:[#allocation2 + $0x68] sm:$0xff]  ;;  %v53_v3 = vld [vmem:[#allocation2 + $0x60] sm:$0xff]  ;;  %v52_v4 = vld [vmem:[#allocation2 + $0x58] sm:$0xff]  ;;  %177 = vrcp.f32 %v212_v27 }
   0x7   :  { %v51_v5 = vld [vmem:[#allocation2 + $0x50] sm:$0xff]  ;;  %v50_v6 = vld [vmem:[#allocation2 + $0x48] sm:$0xff]  ;;  %v49_v7 = vld [vmem:[#allocation2 + $0x40] sm:$0xff] }
   0x8   :  { %62 = vmatpush.msra.mxu0 %v55_v1  ;;  %155 = vmatpush.msra.mxu1 %v55_v1  ;;  %v48_v8 = vld [vmem:[#allocation2 + $0x38] sm:$0xff]  ;;  %v47_v9 = vld [vmem:[#allocation2 + $0x30] sm:$0xff]  ;;  %v46_v10 = vld [vmem:[#allocation2 + $0x28] sm:$0xff] }
   0x9   :  { %v45_v11 = vld [vmem:[#allocation2 + $0x20] sm:$0xff]  ;;  %v44_v12 = vld [vmem:[#allocation2 + $0x18] sm:$0xff]  ;;  %v43_v13 = vld [vmem:[#allocation2 + $0x10] sm:$0xff] }
   0xa   :  { %63 = vmatpush.msra.mxu0 %v54_v2  ;;  %156 = vmatpush.msra.mxu1 %v54_v2  ;;  %v42_v14 = vld [vmem:[#allocation2 + $0x8] sm:$0xff]  ;;  %v41_v15 = vld [vmem:[#allocation2] sm:$0xff] }
   0xb   :  { %v39_v16 = vld [vmem:[%s278_s0] sm:$0xff]  ;;  %v40_v17 = vld [vmem:[%s278_s0 + $0x8] sm:$0xff] }
   0xc   :  { %64 = vmatpush.msra.mxu0 %v53_v3  ;;  %157 = vmatpush.msra.mxu1 %v53_v3  ;;  %v174_v18 = vld [vmem:[%s280_s2] ss:$0 sm:$0xff]  ;;  %v85_v25 = vld [vmem:[%s281_s3 + $0x8] sm:$0xff]  ;;  %v178_v28 = vpop.eup %177 }
   0xd   :  { %v84_v20 = vld [vmem:[%s281_s3] sm:$0xff]  ;;  %v93_v29 = vmul.f32 128.0, %v178_v28  ;;  %vm97_vm0 = vweird.f32 %v178_v28 }
   0xe   :  { %65 = vmatpush.msra.mxu0 %v52_v4  ;;  %158 = vmatpush.msra.mxu1 %v52_v4  ;;  %v175_v56 = vld [vmem:[%s282_s4] ss:$0 sm:$0xff] }
   0xf   :  { %v94_v30 = vsub.f32 1.0, %v93_v29  ;;  %v176_v59 = vld [vmem:[%s283_s5] ss:$0 sm:$0xff] }
  0x10   :  { %66 = vmatpush.msra.mxu0 %v51_v5  ;;  %159 = vmatpush.msra.mxu1 %v51_v5 }
  0x11   :  { %v95_v31 = vmul.f32 %v178_v28, %v94_v30 }
  0x12   :  { %67 = vmatpush.msra.mxu0 %v50_v6  ;;  %160 = vmatpush.msra.mxu1 %v50_v6 }
  0x13   :  { %v96_v32 = vadd.f32 %v178_v28, %v95_v31 }
  0x14   :  { %68 = vmatpush.msra.mxu0 %v49_v7  ;;  %161 = vmatpush.msra.mxu1 %v49_v7 }
  0x15   :  { %v98_v33 = vsel %vm97_vm0, %v178_v28, %v96_v32 }
  0x16   :  { %69 = vmatpush.msra.mxu0 %v48_v8  ;;  %162 = vmatpush.msra.mxu1 %v48_v8 }
  0x18   :  { %70 = vmatpush.msra.mxu0 %v47_v9  ;;  %163 = vmatpush.msra.mxu1 %v47_v9 }
  0x1a   :  { %71 = vmatpush.msra.mxu0 %v46_v10  ;;  %164 = vmatpush.msra.mxu1 %v46_v10 }
  0x1c   :  { %72 = vmatpush.msra.mxu0 %v45_v11  ;;  %165 = vmatpush.msra.mxu1 %v45_v11 }
  0x1e   :  { %73 = vmatpush.msra.mxu0 %v44_v12  ;;  %166 = vmatpush.msra.mxu1 %v44_v12 }
  0x20   :  { %74 = vmatpush.msra.mxu0 %v43_v13  ;;  %167 = vmatpush.msra.mxu1 %v43_v13 }
  0x22   :  { %75 = vmatpush.msra.mxu0 %v42_v14  ;;  %168 = vmatpush.msra.mxu1 %v42_v14 }
  0x24   :  { %76 = vmatpush.msra.mxu0 %v41_v15  ;;  %169 = vmatpush.msra.mxu1 %v41_v15 }
  0x25   :  { %77 = vmatmul.f32.vlgmr.msra.gmra.mxu0 %v39_v16  ;;  %80 = vmatmul.f32.vlgmr.msra.gmra.mxu1 %v40_v17 }
  0xa2   :  { %v78_v19 = vpop.f32.mrf.mxu0  ;;  %v81_v22 = vpop.f32.mrf.mxu1 }
  0xa3   :  { %v79_v21 = vadd.f32 %v174_v18, %v78_v19  ;;  %v82_v24 = vadd.f32 %v174_v18, %v81_v22 }
  0xa5   :  { %v86_v23 = vadd.f32 %v84_v20, %v79_v21  ;;  %v87_v26 = vadd.f32 %v85_v25, %v82_v24 }
  0xa7   :  { %88 = vadd.xlane.f32.xlu0 %v86_v23 }
  0xaf   :  { %90 = vadd.xlane.f32.xlu0 %v87_v26 }
 0x11a   :  { %v89_v34 = vpop.xlane.xlu0 %88 }
 0x11b   :  { %v99_v35 = vmul.f32 %v98_v33, %v89_v34 }
 0x11d   :  { %v101_v36 = vsub.f32 %v86_v23, %v99_v35 }
 0x11f   :  { %v103_v37 = vmul.f32 %v101_v36, %v101_v36 }
 0x121   :  { %105 = vadd.xlane.f32.xlu1 %v103_v37 }
 0x122   :  { %v91_v38 = vpop.xlane.xlu0 %90 }
 0x123   :  { %v100_v39 = vmul.f32 %v98_v33, %v91_v38 }
 0x125   :  { %v102_v40 = vsub.f32 %v87_v26, %v100_v39 }
 0x127   :  { %v104_v41 = vmul.f32 %v102_v40, %v102_v40 }
 0x129   :  { %107 = vadd.xlane.f32.xlu1 %v104_v41 }
 0x194   :  { %v106_v42 = vpop.xlane.xlu1 %105 }
 0x195   :  { %v109_v43 = vmul.f32 %v106_v42, %v98_v33 }
 0x197   :  { %v111_v44 = vadd.f32 1e-06, %v109_v43 }
 0x199   :  { %179 = vrsqrt.f32 %v111_v44  ;;  %vm119_vm2 = vweird.f32 %v111_v44 }
 0x19c   :  { %v108_v45 = vpop.xlane.xlu1 %107 }
 0x19d   :  { %v110_v46 = vmul.f32 %v108_v45, %v98_v33 }
 0x19f   :  { %v180_v47 = vpop.eup %179  ;;  %v112_v48 = vadd.f32 1e-06, %v110_v46 }
 0x1a0   :  { %v114_v49 = vmul.f32 %v180_v47, %v111_v44  ;;  %vm120_vm1 = vweird.f32 %v180_v47 }
 0x1a1   :  { %181 = vrsqrt.f32 %v112_v48  ;;  %vm121_vm3 = vmor %vm119_vm2, %vm120_vm1  ;;  %vm129_vm5 = vweird.f32 %v112_v48 }
 0x1a2   :  { %v115_v50 = vmul.f32 %v180_v47, %v114_v49 }
 0x1a4   :  { %v116_v51 = vmul.f32 0.5, %v115_v50 }
 0x1a6   :  { %v117_v52 = vsub.f32 1.5, %v116_v51 }
 0x1a7   :  { %v182_v53 = vpop.eup %181 }
 0x1a8   :  { %v118_v54 = vmul.f32 %v180_v47, %v117_v52  ;;  %v124_v55 = vmul.f32 %v182_v53, %v112_v48  ;;  %vm130_vm4 = vweird.f32 %v182_v53 }
 0x1a9   :  { %vm131_vm6 = vmor %vm129_vm5, %vm130_vm4 }
 0x1aa   :  { %v122_v57 = vsel %vm121_vm3, %v180_v47, %v118_v54  ;;  %v125_v58 = vmul.f32 %v182_v53, %v124_v55 }
 0x1ab   :  { %v133_v60 = vmul.f32 %v122_v57, %v101_v36 }
 0x1ac   :  { %v126_v61 = vmul.f32 0.5, %v125_v58 }
 0x1ad   :  { %v139_v62 = vmul.f32 %v175_v56, %v133_v60 }
 0x1ae   :  { %v127_v63 = vsub.f32 1.5, %v126_v61 }
 0x1af   :  { %v145_v0 = vadd.f32 %v176_v59, %v139_v62 }
 0x1b0   :  { %v128_v1 = vmul.f32 %v182_v53, %v127_v63 }
 0x1b1   :  { %147 = vst [vmem:[%s284_s6] sm:$0xff] %v145_v0 }
 0x1b2   :  { %v132_v2 = vsel %vm131_vm6, %v182_v53, %v128_v1 }
 0x1b3   :  { %v134_v3 = vmul.f32 %v132_v2, %v102_v40 }
 0x1b5   :  { %v140_v4 = vmul.f32 %v175_v56, %v134_v3 }
 0x1b7   :  { %v146_v5 = vadd.f32 %v176_v59, %v140_v4 }
 0x1b9   :  { %148 = vst [vmem:[%s284_s6 + $0x8] sm:$0xff] %v146_v5 }
 0x1ba   :  { %153 = vsyncpa [#allocation3], 1 }

// kernel: decoder_forward.21
= control target key start
LH: loop header
LB: loop body
LE: loop exit
PB: predicated region body
PF: predicated region fallthrough
CT: control target
= control target key end

     0   :  { %s308_s1 = inlined_call_operand.vmem [shape: f32[128,256], index: 1, kind: input, shape index: {}]   ;;  %s309_s0 = inlined_call_operand.vmem [shape: f32[16,128], index: 0, kind: input, shape index: {}]   ;;  %s310_s2 = inlined_call_operand.vmem [shape: f32[1,256], index: 2, kind: input, shape index: {}]   ;;  %s311_s3 = inlined_call_operand.vmem [shape: f32[16,256], index: 3, kind: output, shape index: {}]  }
   0x1   :  { %v58_v0 = vld [vmem:[%s308_s1 + $0xf0] sm:$0xff]  ;;  %v59_v1 = vld [vmem:[%s308_s1 + $0xf8] sm:$0xff]  ;;  %v56_v2 = vld [vmem:[%s308_s1 + $0xe0] sm:$0xff] }
   0x2   :  { %139 = vmatpush.msra.mxu2 %v58_v0  ;;  %155 = vmatpush.msra.mxu3 %v59_v1  ;;  %v57_v3 = vld [vmem:[%s308_s1 + $0xe8] sm:$0xff]  ;;  %v54_v4 = vld [vmem:[%s308_s1 + $0xd0] sm:$0xff]  ;;  %v55_v5 = vld [vmem:[%s308_s1 + $0xd8] sm:$0xff] }
   0x3   :  { %60 = vmatpush.msra.mxu0 %v58_v0  ;;  %83 = vmatpush.msra.mxu1 %v59_v1  ;;  %v52_v6 = vld [vmem:[%s308_s1 + $0xc0] sm:$0xff]  ;;  %v53_v7 = vld [vmem:[%s308_s1 + $0xc8] sm:$0xff]  ;;  %v50_v8 = vld [vmem:[%s308_s1 + $0xb0] sm:$0xff] }
   0x4   :  { %140 = vmatpush.msra.mxu2 %v56_v2  ;;  %156 = vmatpush.msra.mxu3 %v57_v3  ;;  %v51_v9 = vld [vmem:[%s308_s1 + $0xb8] sm:$0xff]  ;;  %v48_v10 = vld [vmem:[%s308_s1 + $0xa0] sm:$0xff]  ;;  %v49_v11 = vld [vmem:[%s308_s1 + $0xa8] sm:$0xff] }
   0x5   :  { %61 = vmatpush.msra.mxu0 %v56_v2  ;;  %84 = vmatpush.msra.mxu1 %v57_v3  ;;  %v46_v12 = vld [vmem:[%s308_s1 + $0x90] sm:$0xff]  ;;  %v47_v13 = vld [vmem:[%s308_s1 + $0x98] sm:$0xff]  ;;  %v44_v14 = vld [vmem:[%s308_s1 + $0x80] sm:$0xff] }
   0x6   :  { %141 = vmatpush.msra.mxu2 %v54_v4  ;;  %157 = vmatpush.msra.mxu3 %v55_v5  ;;  %v45_v15 = vld [vmem:[%s308_s1 + $0x88] sm:$0xff]  ;;  %v42_v16 = vld [vmem:[%s308_s1 + $0x70] sm:$0xff]  ;;  %v43_v17 = vld [vmem:[%s308_s1 + $0x78] sm:$0xff] }
   0x7   :  { %62 = vmatpush.msra.mxu0 %v54_v4  ;;  %85 = vmatpush.msra.mxu1 %v55_v5  ;;  %v40_v18 = vld [vmem:[%s308_s1 + $0x60] sm:$0xff]  ;;  %v41_v19 = vld [vmem:[%s308_s1 + $0x68] sm:$0xff]  ;;  %v38_v20 = vld [vmem:[%s308_s1 + $0x50] sm:$0xff] }
   0x8   :  { %142 = vmatpush.msra.mxu2 %v52_v6  ;;  %158 = vmatpush.msra.mxu3 %v53_v7  ;;  %v39_v21 = vld [vmem:[%s308_s1 + $0x58] sm:$0xff]  ;;  %v36_v22 = vld [vmem:[%s308_s1 + $0x40] sm:$0xff]  ;;  %v37_v23 = vld [vmem:[%s308_s1 + $0x48] sm:$0xff] }
   0x9   :  { %63 = vmatpush.msra.mxu0 %v52_v6  ;;  %86 = vmatpush.msra.mxu1 %v53_v7  ;;  %v34_v24 = vld [vmem:[%s308_s1 + $0x30] sm:$0xff]  ;;  %v35_v25 = vld [vmem:[%s308_s1 + $0x38] sm:$0xff]  ;;  %v32_v26 = vld [vmem:[%s308_s1 + $0x20] sm:$0xff] }
   0xa   :  { %143 = vmatpush.msra.mxu2 %v50_v8  ;;  %159 = vmatpush.msra.mxu3 %v51_v9  ;;  %v33_v27 = vld [vmem:[%s308_s1 + $0x28] sm:$0xff]  ;;  %v30_v28 = vld [vmem:[%s308_s1 + $0x10] sm:$0xff]  ;;  %v31_v29 = vld [vmem:[%s308_s1 + $0x18] sm:$0xff] }
   0xb   :  { %64 = vmatpush.msra.mxu0 %v50_v8  ;;  %87 = vmatpush.msra.mxu1 %v51_v9  ;;  %v28_v30 = vld [vmem:[%s308_s1] sm:$0xff]  ;;  %v29_v31 = vld [vmem:[%s308_s1 + $0x8] sm:$0xff] }
   0xc   :  { %144 = vmatpush.msra.mxu2 %v48_v10  ;;  %160 = vmatpush.msra.mxu3 %v49_v11  ;;  %v27_v32 = vld [vmem:[%s309_s0 + $0x8] sm:$0xff]  ;;  %v26_v33 = vld [vmem:[%s309_s0] sm:$0xff] }
   0xd   :  { %65 = vmatpush.msra.mxu0 %v48_v10  ;;  %88 = vmatpush.msra.mxu1 %v49_v11  ;;  %v121_v34 = vld [vmem:[%s310_s2] sm:$0x3] }
   0xe   :  { %145 = vmatpush.msra.mxu2 %v46_v12  ;;  %161 = vmatpush.msra.mxu3 %v47_v13  ;;  %v123_v35 = vperm.slane %v121_v34, 0  ;;  %v124_v36 = vperm.slane %v121_v34, 1 }
   0xf   :  { %66 = vmatpush.msra.mxu0 %v46_v12  ;;  %89 = vmatpush.msra.mxu1 %v47_v13 }
  0x10   :  { %146 = vmatpush.msra.mxu2 %v44_v14  ;;  %162 = vmatpush.msra.mxu3 %v45_v15 }
  0x11   :  { %67 = vmatpush.msra.mxu0 %v44_v14  ;;  %90 = vmatpush.msra.mxu1 %v45_v15 }
  0x12   :  { %147 = vmatpush.msra.mxu2 %v42_v16  ;;  %163 = vmatpush.msra.mxu3 %v43_v17 }
  0x13   :  { %68 = vmatpush.msra.mxu0 %v42_v16  ;;  %91 = vmatpush.msra.mxu1 %v43_v17 }
  0x14   :  { %148 = vmatpush.msra.mxu2 %v40_v18  ;;  %164 = vmatpush.msra.mxu3 %v41_v19 }
  0x15   :  { %69 = vmatpush.msra.mxu0 %v40_v18  ;;  %92 = vmatpush.msra.mxu1 %v41_v19 }
  0x16   :  { %149 = vmatpush.msra.mxu2 %v38_v20  ;;  %165 = vmatpush.msra.mxu3 %v39_v21 }
  0x17   :  { %70 = vmatpush.msra.mxu0 %v38_v20  ;;  %93 = vmatpush.msra.mxu1 %v39_v21 }
  0x18   :  { %150 = vmatpush.msra.mxu2 %v36_v22  ;;  %166 = vmatpush.msra.mxu3 %v37_v23 }
  0x19   :  { %71 = vmatpush.msra.mxu0 %v36_v22  ;;  %94 = vmatpush.msra.mxu1 %v37_v23 }
  0x1a   :  { %151 = vmatpush.msra.mxu2 %v34_v24  ;;  %167 = vmatpush.msra.mxu3 %v35_v25 }
  0x1b   :  { %72 = vmatpush.msra.mxu0 %v34_v24  ;;  %95 = vmatpush.msra.mxu1 %v35_v25 }
  0x1c   :  { %152 = vmatpush.msra.mxu2 %v32_v26  ;;  %168 = vmatpush.msra.mxu3 %v33_v27 }
  0x1d   :  { %73 = vmatpush.msra.mxu0 %v32_v26  ;;  %96 = vmatpush.msra.mxu1 %v33_v27 }
  0x1e   :  { %153 = vmatpush.msra.mxu2 %v30_v28  ;;  %169 = vmatpush.msra.mxu3 %v31_v29 }
  0x1f   :  { %74 = vmatpush.msra.mxu0 %v30_v28  ;;  %97 = vmatpush.msra.mxu1 %v31_v29 }
  0x20   :  { %154 = vmatpush.msra.mxu2 %v28_v30  ;;  %170 = vmatpush.msra.mxu3 %v29_v31 }
  0x21   :  { %79 = vmatmul.f32.vlgmr.msra.gmra.mxu2 %v27_v32  ;;  %102 = vmatmul.f32.vlgmr.msra.gmra.mxu3 %v27_v32 }
  0x22   :  { %75 = vmatpush.msra.mxu0 %v28_v30  ;;  %98 = vmatpush.msra.mxu1 %v29_v31 }
  0x23   :  { %76 = vmatmul.f32.vlgmr.msra.gmra.mxu0 %v26_v33  ;;  %99 = vmatmul.f32.vlgmr.msra.gmra.mxu1 %v26_v33 }
  0xa0   :  { %v77_v37 = vpop.f32.mrf.mxu0  ;;  %v100_v38 = vpop.f32.mrf.mxu1 }
  0xa1   :  { %v127_v39 = vadd.f32 %v123_v35, %v77_v37  ;;  %v128_v40 = vadd.f32 %v124_v36, %v100_v38 }
  0xa3   :  { %131 = vst [vmem:[%s311_s3] sm:$0xff] %v127_v39 }
  0xa4   :  { %v80_v41 = vpop.f32.mrf.mxu2  ;;  %132 = vst [vmem:[%s311_s3 + $0x8] sm:$0xff] %v128_v40  ;;  %v103_v42 = vpop.f32.mrf.mxu3 }
  0xa5   :  { %v129_v43 = vadd.f32 %v123_v35, %v80_v41  ;;  %v130_v44 = vadd.f32 %v124_v36, %v103_v42 }
  0xa7   :  { %133 = vst [vmem:[%s311_s3 + $0x10] sm:$0xff] %v129_v43 }
  0xa8   :  { %134 = vst [vmem:[%s311_s3 + $0x18] sm:$0xff] %v130_v44 }

// kernel: decoder_forward.30
= control target key start
LH: loop header
LB: loop body
LE: loop exit
PB: predicated region body
PF: predicated region fallthrough
CT: control target
= control target key end

     0   :  { %s184_s1 = inlined_call_operand.vmem [shape: f32[128,128], index: 1, kind: input, shape index: {}]   ;;  %s185_s2 = inlined_call_operand.vmem [shape: f32[1,128], index: 2, kind: input, shape index: {}]   ;;  %s186_s0 = inlined_call_operand.vmem [shape: f32[16,128], index: 0, kind: input, shape index: {}]   ;;  %s187_s3 = inlined_call_operand.vmem [shape: f32[16,128], index: 3, kind: output, shape index: {}]  }
   0x1   :  { %v39_v0 = vld [vmem:[%s184_s1 + $0x78] sm:$0xff]  ;;  %v38_v1 = vld [vmem:[%s184_s1 + $0x70] sm:$0xff]  ;;  %v37_v2 = vld [vmem:[%s184_s1 + $0x68] sm:$0xff] }
   0x2   :  { %40 = vmatpush.msra.mxu0 %v39_v0  ;;  %84 = vmatpush.msra.mxu1 %v39_v0  ;;  %v36_v3 = vld [vmem:[%s184_s1 + $0x60] sm:$0xff]  ;;  %v35_v4 = vld [vmem:[%s184_s1 + $0x58] sm:$0xff]  ;;  %v34_v5 = vld [vmem:[%s184_s1 + $0x50] sm:$0xff] }
   0x3   :  { %v33_v6 = vld [vmem:[%s184_s1 + $0x48] sm:$0xff]  ;;  %v32_v7 = vld [vmem:[%s184_s1 + $0x40] sm:$0xff]  ;;  %v31_v8 = vld [vmem:[%s184_s1 + $0x38] sm:$0xff] }
   0x4   :  { %41 = vmatpush.msra.mxu0 %v38_v1  ;;  %85 = vmatpush.msra.mxu1 %v38_v1  ;;  %v30_v9 = vld [vmem:[%s184_s1 + $0x30] sm:$0xff]  ;;  %v29_v10 = vld [vmem:[%s184_s1 + $0x28] sm:$0xff]  ;;  %v28_v11 = vld [vmem:[%s184_s1 + $0x20] sm:$0xff] }
   0x5   :  { %v27_v12 = vld [vmem:[%s184_s1 + $0x18] sm:$0xff]  ;;  %v26_v13 = vld [vmem:[%s184_s1 + $0x10] sm:$0xff]  ;;  %v25_v14 = vld [vmem:[%s184_s1 + $0x8] sm:$0xff] }
   0x6   :  { %42 = vmatpush.msra.mxu0 %v37_v2  ;;  %86 = vmatpush.msra.mxu1 %v37_v2  ;;  %v24_v15 = vld [vmem:[%s184_s1] sm:$0xff]  ;;  %v23_v17 = vld [vmem:[%s186_s0 + $0x8] sm:$0xff] }
   0x7   :  { %v22_v16 = vld [vmem:[%s186_s0] sm:$0xff] }
   0x8   :  { %43 = vmatpush.msra.mxu0 %v36_v3  ;;  %87 = vmatpush.msra.mxu1 %v36_v3  ;;  %v100_v18 = vld [vmem:[%s185_s2] ss:$0 sm:$0xff] }
   0xa   :  { %44 = vmatpush.msra.mxu0 %v35_v4  ;;  %88 = vmatpush.msra.mxu1 %v35_v4 }
   0xc   :  { %45 = vmatpush.msra.mxu0 %v34_v5  ;;  %89 = vmatpush.msra.mxu1 %v34_v5 }
   0xe   :  { %46 = vmatpush.msra.mxu0 %v33_v6  ;;  %90 = vmatpush.msra.mxu1 %v33_v6 }
  0x10   :  { %47 = vmatpush.msra.mxu0 %v32_v7  ;;  %91 = vmatpush.msra.mxu1 %v32_v7 }
  0x12   :  { %48 = vmatpush.msra.mxu0 %v31_v8  ;;  %92 = vmatpush.msra.mxu1 %v31_v8 }
  0x14   :  { %49 = vmatpush.msra.mxu0 %v30_v9  ;;  %93 = vmatpush.msra.mxu1 %v30_v9 }
  0x16   :  { %50 = vmatpush.msra.mxu0 %v29_v10  ;;  %94 = vmatpush.msra.mxu1 %v29_v10 }
  0x18   :  { %51 = vmatpush.msra.mxu0 %v28_v11  ;;  %95 = vmatpush.msra.mxu1 %v28_v11 }
  0x1a   :  { %52 = vmatpush.msra.mxu0 %v27_v12  ;;  %96 = vmatpush.msra.mxu1 %v27_v12 }
  0x1c   :  { %53 = vmatpush.msra.mxu0 %v26_v13  ;;  %97 = vmatpush.msra.mxu1 %v26_v13 }
  0x1e   :  { %54 = vmatpush.msra.mxu0 %v25_v14  ;;  %98 = vmatpush.msra.mxu1 %v25_v14 }
  0x20   :  { %55 = vmatpush.msra.mxu0 %v24_v15  ;;  %99 = vmatpush.msra.mxu1 %v24_v15 }
  0x21   :  { %56 = vmatmul.f32.vlgmr.msra.gmra.mxu0 %v22_v16  ;;  %59 = vmatmul.f32.vlgmr.msra.gmra.mxu1 %v23_v17 }
  0x9e   :  { %v57_v19 = vpop.f32.mrf.mxu0  ;;  %v60_v20 = vpop.f32.mrf.mxu1 }
  0x9f   :  { %v76_v21 = vadd.f32 %v100_v18, %v57_v19  ;;  %v77_v22 = vadd.f32 %v100_v18, %v60_v20 }
  0xa1   :  { %78 = vst [vmem:[%s187_s3] sm:$0xff] %v76_v21 }
  0xa2   :  { %79 = vst [vmem:[%s187_s3 + $0x8] sm:$0xff] %v77_v22 }

// kernel: decoder_forward.25
= control target key start
LH: loop header
LB: loop body
LE: loop exit
PB: predicated region body
PF: predicated region fallthrough
CT: control target
= control target key end

     0   :  { %s532_s1 = inlined_call_operand.vmem [shape: f32[128,256], index: 1, kind: input, shape index: {}]   ;;  %s533_s3 = inlined_call_operand.vmem [shape: f32[256,128], index: 3, kind: input, shape index: {}]   ;;  %s534_s0 = inlined_call_operand.vmem [shape: f32[16,128], index: 0, kind: input, shape index: {}]   ;;  %s535_s4 = inlined_call_operand.vmem [shape: f32[1,128], index: 4, kind: input, shape index: {}]   ;;  %s536_s2 = inlined_call_operand.vmem [shape: f32[1,256], index: 2, kind: input, shape index: {}]   ;;  %s537_s5 = inlined_call_operand.vmem [shape: f32[1,128], index: 5, kind: input, shape index: {}]   ;;  %s538_s6 = inlined_call_operand.vmem [shape: f32[1,128], index: 6, kind: input, shape index: {}]   ;;  %s539_s7 = inlined_call_operand.vmem [shape: f32[16,128], index: 7, kind: output, shape index: {}]  }
   0x1   :  { %v58_v0 = vld [vmem:[%s532_s1 + $0xf0] sm:$0xff]  ;;  %v56_v1 = vld [vmem:[%s532_s1 + $0xe0] sm:$0xff]  ;;  %v59_v2 = vld [vmem:[%s532_s1 + $0xf8] sm:$0xff] }
   0x2   :  { %66 = vmatpush.msra.mxu0 %v58_v0  ;;  %89 = vmatpush.msra.mxu1 %v59_v2  ;;  %v57_v3 = vld [vmem:[%s532_s1 + $0xe8] sm:$0xff]  ;;  %v54_v4 = vld [vmem:[%s532_s1 + $0xd0] sm:$0xff]  ;;  %v55_v5 = vld [vmem:[%s532_s1 + $0xd8] sm:$0xff] }
   0x3   :  { %v52_v6 = vld [vmem:[%s532_s1 + $0xc0] sm:$0xff]  ;;  %v53_v7 = vld [vmem:[%s532_s1 + $0xc8] sm:$0xff]  ;;  %v50_v8 = vld [vmem:[%s532_s1 + $0xb0] sm:$0xff] }
   0x4   :  { %67 = vmatpush.msra.mxu0 %v56_v1  ;;  %90 = vmatpush.msra.mxu1 %v57_v3  ;;  %v51_v9 = vld [vmem:[%s532_s1 + $0xb8] sm:$0xff]  ;;  %v48_v10 = vld [vmem:[%s532_s1 + $0xa0] sm:$0xff]  ;;  %v49_v11 = vld [vmem:[%s532_s1 + $0xa8] sm:$0xff] }
   0x5   :  { %v46_v12 = vld [vmem:[%s532_s1 + $0x90] sm:$0xff]  ;;  %v47_v13 = vld [vmem:[%s532_s1 + $0x98] sm:$0xff]  ;;  %v44_v16 = vld [vmem:[%s532_s1 + $0x80] sm:$0xff] }
   0x6   :  { %68 = vmatpush.msra.mxu0 %v54_v4  ;;  %91 = vmatpush.msra.mxu1 %v55_v5  ;;  %v131_v14 = vld [vmem:[%s533_s3 + $0x78] sm:$0xff]  ;;  %v130_v15 = vld [vmem:[%s533_s3 + $0x70] sm:$0xff]  ;;  %v45_v17 = vld [vmem:[%s532_s1 + $0x88] sm:$0xff] }
   0x7   :  { %152 = vmatpush.msra.mxu2 %v131_v14  ;;  %v147_v18 = vld [vmem:[%s533_s3 + $0xf8] sm:$0xff]  ;;  %v129_v19 = vld [vmem:[%s533_s3 + $0x68] sm:$0xff]  ;;  %v146_v20 = vld [vmem:[%s533_s3 + $0xf0] sm:$0xff] }
   0x8   :  { %69 = vmatpush.msra.mxu0 %v52_v6  ;;  %92 = vmatpush.msra.mxu1 %v53_v7  ;;  %v42_v21 = vld [vmem:[%s532_s1 + $0x70] sm:$0xff]  ;;  %v43_v22 = vld [vmem:[%s532_s1 + $0x78] sm:$0xff]  ;;  %v128_v23 = vld [vmem:[%s533_s3 + $0x60] sm:$0xff] }
   0x9   :  { %153 = vmatpush.msra.mxu2 %v130_v15  ;;  %175 = vmatpush.msra.mxu3 %v147_v18  ;;  %v145_v24 = vld [vmem:[%s533_s3 + $0xe8] sm:$0xff]  ;;  %v40_v25 = vld [vmem:[%s532_s1 + $0x60] sm:$0xff]  ;;  %v127_v27 = vld [vmem:[%s533_s3 + $0x58] sm:$0xff] }
   0xa   :  { %70 = vmatpush.msra.mxu0 %v50_v8  ;;  %93 = vmatpush.msra.mxu1 %v51_v9  ;;  %v41_v26 = vld [vmem:[%s532_s1 + $0x68] sm:$0xff]  ;;  %v144_v28 = vld [vmem:[%s533_s3 + $0xe0] sm:$0xff]  ;;  %v38_v29 = vld [vmem:[%s532_s1 + $0x50] sm:$0xff] }
   0xb   :  { %154 = vmatpush.msra.mxu2 %v129_v19  ;;  %176 = vmatpush.msra.mxu3 %v146_v20  ;;  %v39_v30 = vld [vmem:[%s532_s1 + $0x58] sm:$0xff]  ;;  %v126_v31 = vld [vmem:[%s533_s3 + $0x50] sm:$0xff]  ;;  %v36_v33 = vld [vmem:[%s532_s1 + $0x40] sm:$0xff] }
   0xc   :  { %71 = vmatpush.msra.mxu0 %v48_v10  ;;  %94 = vmatpush.msra.mxu1 %v49_v11  ;;  %v143_v32 = vld [vmem:[%s533_s3 + $0xd8] sm:$0xff]  ;;  %v37_v34 = vld [vmem:[%s532_s1 + $0x48] sm:$0xff]  ;;  %v142_v36 = vld [vmem:[%s533_s3 + $0xd0] sm:$0xff] }
   0xd   :  { %155 = vmatpush.msra.mxu2 %v128_v23  ;;  %177 = vmatpush.msra.mxu3 %v145_v24  ;;  %v125_v35 = vld [vmem:[%s533_s3 + $0x48] sm:$0xff]  ;;  %v34_v37 = vld [vmem:[%s532_s1 + $0x30] sm:$0xff]  ;;  %v35_v38 = vld [vmem:[%s532_s1 + $0x38] sm:$0xff] }
   0xe   :  { %72 = vmatpush.msra.mxu0 %v46_v12  ;;  %95 = vmatpush.msra.mxu1 %v47_v13  ;;  %v124_v39 = vld [vmem:[%s533_s3 + $0x40] sm:$0xff]  ;;  %v141_v40 = vld [vmem:[%s533_s3 + $0xc8] sm:$0xff]  ;;  %v123_v43 = vld [vmem:[%s533_s3 + $0x38] sm:$0xff] }
   0xf   :  { %156 = vmatpush.msra.mxu2 %v127_v27  ;;  %178 = vmatpush.msra.mxu3 %v144_v28  ;;  %v32_v41 = vld [vmem:[%s532_s1 + $0x20] sm:$0xff]  ;;  %v33_v42 = vld [vmem:[%s532_s1 + $0x28] sm:$0xff]  ;;  %v30_v45 = vld [vmem:[%s532_s1 + $0x10] sm:$0xff]  ;;  %v275_v28 = vmov 128.0  }
  0x10   :  { %73 = vmatpush.msra.mxu0 %v44_v16  ;;  %96 = vmatpush.msra.mxu1 %v45_v17  ;;  %v140_v44 = vld [vmem:[%s533_s3 + $0xc0] sm:$0xff]  ;;  %v31_v46 = vld [vmem:[%s532_s1 + $0x18] sm:$0xff]  ;;  %v122_v47 = vld [vmem:[%s533_s3 + $0x30] sm:$0xff]  ;;  %269 = vrcp.f32 %v275_v28 }
  0x11   :  { %157 = vmatpush.msra.mxu2 %v126_v31  ;;  %179 = vmatpush.msra.mxu3 %v143_v32  ;;  %v139_v48 = vld [vmem:[%s533_s3 + $0xb8] sm:$0xff]  ;;  %v28_v49 = vld [vmem:[%s532_s1] sm:$0xff]  ;;  %v29_v50 = vld [vmem:[%s532_s1 + $0x8] sm:$0xff] }
  0x12   :  { %74 = vmatpush.msra.mxu0 %v42_v21  ;;  %97 = vmatpush.msra.mxu1 %v43_v22  ;;  %v26_v51 = vld [vmem:[%s534_s0] sm:$0xff]  ;;  %v121_v52 = vld [vmem:[%s533_s3 + $0x28] sm:$0xff]  ;;  %v138_v53 = vld [vmem:[%s533_s3 + $0xb0] sm:$0xff] }
  0x13   :  { %158 = vmatpush.msra.mxu2 %v125_v35  ;;  %180 = vmatpush.msra.mxu3 %v142_v36  ;;  %v120_v54 = vld [vmem:[%s533_s3 + $0x20] sm:$0xff]  ;;  %v137_v55 = vld [vmem:[%s533_s3 + $0xa8] sm:$0xff]  ;;  %v119_v56 = vld [vmem:[%s533_s3 + $0x18] sm:$0xff] }
  0x14   :  { %75 = vmatpush.msra.mxu0 %v40_v25  ;;  %98 = vmatpush.msra.mxu1 %v41_v26  ;;  %v136_v57 = vld [vmem:[%s533_s3 + $0xa0] sm:$0xff]  ;;  %v27_v58 = vld [vmem:[%s534_s0 + $0x8] sm:$0xff]  ;;  %v118_v59 = vld [vmem:[%s533_s3 + $0x10] sm:$0xff] }
  0x15   :  { %159 = vmatpush.msra.mxu2 %v124_v39  ;;  %181 = vmatpush.msra.mxu3 %v141_v40  ;;  %v135_v60 = vld [vmem:[%s533_s3 + $0x98] sm:$0xff]  ;;  %v117_v61 = vld [vmem:[%s533_s3 + $0x8] sm:$0xff]  ;;  %v134_v62 = vld [vmem:[%s533_s3 + $0x90] sm:$0xff] }
  0x16   :  { %76 = vmatpush.msra.mxu0 %v38_v29  ;;  %99 = vmatpush.msra.mxu1 %v39_v30  ;;  %v116_v63 = vld [vmem:[%s533_s3] sm:$0xff]  ;;  %v133_v0 = vld [vmem:[%s533_s3 + $0x88] sm:$0xff]  ;;  %v270_v29 = vpop.eup %269 }
  0x17   :  { %160 = vmatpush.msra.mxu2 %v123_v43  ;;  %182 = vmatpush.msra.mxu3 %v140_v44  ;;  %v132_v1 = vld [vmem:[%s533_s3 + $0x80] sm:$0xff]  ;;  %v205_v30 = vmul.f32 128.0, %v270_v29  ;;  %vm209_vm0 = vweird.f32 %v270_v29 }
  0x18   :  { %77 = vmatpush.msra.mxu0 %v36_v33  ;;  %100 = vmatpush.msra.mxu1 %v37_v34  ;;  %v60_v2 = vld [vmem:[%s536_s2] sm:$0x3] }
  0x19   :  { %161 = vmatpush.msra.mxu2 %v122_v47  ;;  %183 = vmatpush.msra.mxu3 %v139_v48  ;;  %v62_v3 = vperm.slane %v60_v2, 0  ;;  %v63_v4 = vperm.slane %v60_v2, 1  ;;  %v266_v17 = vld [vmem:[%s535_s4] ss:$0 sm:$0xff]  ;;  %v206_v31 = vsub.f32 1.0, %v205_v30 }
  0x1a   :  { %78 = vmatpush.msra.mxu0 %v34_v37  ;;  %101 = vmatpush.msra.mxu1 %v35_v38 }
  0x1b   :  { %162 = vmatpush.msra.mxu2 %v121_v52  ;;  %184 = vmatpush.msra.mxu3 %v138_v53  ;;  %v207_v32 = vmul.f32 %v270_v29, %v206_v31 }
  0x1c   :  { %79 = vmatpush.msra.mxu0 %v32_v41  ;;  %102 = vmatpush.msra.mxu1 %v33_v42 }
  0x1d   :  { %163 = vmatpush.msra.mxu2 %v120_v54  ;;  %185 = vmatpush.msra.mxu3 %v137_v55  ;;  %v208_v33 = vadd.f32 %v270_v29, %v207_v32 }
  0x1e   :  { %80 = vmatpush.msra.mxu0 %v30_v45  ;;  %103 = vmatpush.msra.mxu1 %v31_v46 }
  0x1f   :  { %164 = vmatpush.msra.mxu2 %v119_v56  ;;  %186 = vmatpush.msra.mxu3 %v136_v57  ;;  %v210_v34 = vsel %vm209_vm0, %v270_v29, %v208_v33  ;;  %v267_v57 = vld [vmem:[%s537_s5] ss:$0 sm:$0xff] }
  0x20   :  { %81 = vmatpush.msra.mxu0 %v28_v49  ;;  %104 = vmatpush.msra.mxu1 %v29_v50 }
  0x21   :  { %82 = vmatmul.f32.vlgmr.msra.gmra.mxu0 %v26_v51  ;;  %105 = vmatmul.f32.vlgmr.msra.gmra.mxu1 %v26_v51 }
  0x22   :  { %165 = vmatpush.msra.mxu2 %v118_v59  ;;  %187 = vmatpush.msra.mxu3 %v135_v60  ;;  %v268_v60 = vld [vmem:[%s538_s6] ss:$0 sm:$0xff] }
  0x24   :  { %166 = vmatpush.msra.mxu2 %v117_v61  ;;  %188 = vmatpush.msra.mxu3 %v134_v62 }
  0x26   :  { %167 = vmatpush.msra.mxu2 %v116_v63  ;;  %189 = vmatpush.msra.mxu3 %v133_v0 }
  0x28   :  { %190 = vmatpush.msra.mxu3 %v132_v1 }
  0x29   :  { %85 = vmatmul.f32.gmra.mxu0 %v27_v58  ;;  %108 = vmatmul.f32.gmra.mxu1 %v27_v58 }
  0x9e   :  { %v83_v5 = vpop.f32.mrf.mxu0  ;;  %v106_v6 = vpop.f32.mrf.mxu1 }
  0x9f   :  { %v84_v7 = vadd.f32 %v83_v5, %v62_v3  ;;  %v107_v8 = vadd.f32 %v106_v6, %v63_v4 }
  0xa1   :  { %v112_v9 = vmax.f32 %v84_v7, 0.0  ;;  %v113_v10 = vmax.f32 %v107_v8, 0.0 }
  0xa3   :  { %168 = vmatmul.f32.vlgmr.msra.gmra.mxu2 %v112_v9  ;;  %191 = vmatmul.f32.vlgmr.msra.gmra.mxu3 %v113_v10 }
  0xa6   :  { %v86_v11 = vpop.f32.mrf.mxu0  ;;  %v109_v12 = vpop.f32.mrf.mxu1 }
  0xa7   :  { %v87_v13 = vadd.f32 %v86_v11, %v62_v3  ;;  %v110_v14 = vadd.f32 %v109_v12, %v63_v4 }
  0xa9   :  { %v114_v15 = vmax.f32 %v87_v13, 0.0  ;;  %v115_v16 = vmax.f32 %v110_v14, 0.0 }
  0xab   :  { %171 = vmatmul.f32.gmra.mxu2 %v114_v15  ;;  %194 = vmatmul.f32.gmra.mxu3 %v115_v16 }
 0x126   :  { %v169_v18 = vpop.f32.mrf.mxu2  ;;  %v192_v19 = vpop.f32.mrf.mxu3 }
 0x127   :  { %v170_v20 = vadd.f32 %v266_v17, %v169_v18 }
 0x129   :  { %v193_v21 = vadd.f32 %v192_v19, %v170_v20 }
 0x12b   :  { %v198_v22 = vadd.f32 %v193_v21, %v26_v51 }
 0x12d   :  { %200 = vadd.xlane.f32.xlu0 %v198_v22 }
 0x12e   :  { %v172_v23 = vpop.f32.mrf.mxu2  ;;  %v195_v24 = vpop.f32.mrf.mxu3 }
 0x12f   :  { %v173_v25 = vadd.f32 %v266_v17, %v172_v23 }
 0x131   :  { %v196_v26 = vadd.f32 %v195_v24, %v173_v25 }
 0x133   :  { %v199_v27 = vadd.f32 %v196_v26, %v27_v58 }
 0x135   :  { %202 = vadd.xlane.f32.xlu0 %v199_v27 }
 0x1a0   :  { %v201_v35 = vpop.xlane.xlu0 %200 }
 0x1a1   :  { %v211_v36 = vmul.f32 %v210_v34, %v201_v35 }
 0x1a3   :  { %v213_v37 = vsub.f32 %v198_v22, %v211_v36 }
 0x1a5   :  { %v215_v38 = vmul.f32 %v213_v37, %v213_v37 }
 0x1a7   :  { %217 = vadd.xlane.f32.xlu1 %v215_v38 }
 0x1a8   :  { %v203_v39 = vpop.xlane.xlu0 %202 }
 0x1a9   :  { %v212_v40 = vmul.f32 %v210_v34, %v203_v39 }
 0x1ab   :  { %v214_v41 = vsub.f32 %v199_v27, %v212_v40 }
 0x1ad   :  { %v216_v42 = vmul.f32 %v214_v41, %v214_v41 }
 0x1af   :  { %219 = vadd.xlane.f32.xlu1 %v216_v42 }
 0x21a   :  { %v218_v43 = vpop.xlane.xlu1 %217 }
 0x21b   :  { %v221_v44 = vmul.f32 %v218_v43, %v210_v34 }
 0x21d   :  { %v223_v45 = vadd.f32 1e-06, %v221_v44 }
 0x21f   :  { %271 = vrsqrt.f32 %v223_v45  ;;  %vm231_vm2 = vweird.f32 %v223_v45 }
 0x222   :  { %v220_v46 = vpop.xlane.xlu1 %219 }
 0x223   :  { %v222_v47 = vmul.f32 %v220_v46, %v210_v34 }
 0x225   :  { %v272_v48 = vpop.eup %271  ;;  %v224_v49 = vadd.f32 1e-06, %v222_v47 }
 0x226   :  { %v226_v50 = vmul.f32 %v272_v48, %v223_v45  ;;  %vm232_vm1 = vweird.f32 %v272_v48 }
 0x227   :  { %273 = vrsqrt.f32 %v224_v49  ;;  %vm233_vm3 = vmor %vm231_vm2, %vm232_vm1  ;;  %vm241_vm5 = vweird.f32 %v224_v49 }
 0x228   :  { %v227_v51 = vmul.f32 %v272_v48, %v226_v50 }
 0x22a   :  { %v228_v52 = vmul.f32 0.5, %v227_v51 }
 0x22c   :  { %v229_v53 = vsub.f32 1.5, %v228_v52 }
 0x22d   :  { %v274_v54 = vpop.eup %273 }
 0x22e   :  { %v230_v55 = vmul.f32 %v272_v48, %v229_v53  ;;  %v236_v56 = vmul.f32 %v274_v54, %v224_v49  ;;  %vm242_vm4 = vweird.f32 %v274_v54 }
 0x22f   :  { %vm243_vm6 = vmor %vm241_vm5, %vm242_vm4 }
 0x230   :  { %v234_v58 = vsel %vm233_vm3, %v272_v48, %v230_v55  ;;  %v237_v59 = vmul.f32 %v274_v54, %v236_v56 }
 0x231   :  { %v245_v61 = vmul.f32 %v234_v58, %v213_v37 }
 0x232   :  { %v238_v62 = vmul.f32 0.5, %v237_v59 }
 0x233   :  { %v251_v63 = vmul.f32 %v267_v57, %v245_v61 }
 0x234   :  { %v239_v0 = vsub.f32 1.5, %v238_v62 }
 0x235   :  { %v257_v1 = vadd.f32 %v268_v60, %v251_v63 }
 0x236   :  { %v240_v2 = vmul.f32 %v274_v54, %v239_v0 }
 0x237   :  { %259 = vst [vmem:[%s539_s7] sm:$0xff] %v257_v1 }
 0x238   :  { %v244_v3 = vsel %vm243_vm6, %v274_v54, %v240_v2 }
 0x239   :  { %v246_v4 = vmul.f32 %v244_v3, %v214_v41 }
 0x23b   :  { %v252_v5 = vmul.f32 %v267_v57, %v246_v4 }
 0x23d   :  { %v258_v6 = vadd.f32 %v268_v60, %v252_v5 }
 0x23f   :  { %260 = vst [vmem:[%s539_s7 + $0x8] sm:$0xff] %v258_v6 }

// kernel: decoder_forward.33
= control target key start
LH: loop header
LB: loop body
LE: loop exit
PB: predicated region body
PF: predicated region fallthrough
CT: control target
= control target key end

     0   :  { %s576_s0 = inlined_call_operand.vmem [shape: f32[16,128], index: 0, kind: input, shape index: {}]   ;;  %s577_s1 = inlined_call_operand.vmem [shape: f32[128,256], index: 1, kind: input, shape index: {}]   ;;  %s578_s2 = inlined_call_operand.vmem [shape: f32[1,256], index: 2, kind: input, shape index: {}]   ;;  %s579_s3 = inlined_call_operand.vmem [shape: f32[256,128], index: 3, kind: input, shape index: {}]   ;;  %s580_s4 = inlined_call_operand.vmem [shape: f32[1,128], index: 4, kind: input, shape index: {}]   ;;  %s581_s5 = inlined_call_operand.vmem [shape: f32[1,128], index: 5, kind: input, shape index: {}]   ;;  %s582_s6 = inlined_call_operand.vmem [shape: f32[1,128], index: 6, kind: input, shape index: {}]   ;;  %s583_s7 = inlined_call_operand.hbm [shape: f32[16,128], index: 7, kind: output, shape index: {}]  }
   0x1   :  { %v59_v0 = vld [vmem:[%s577_s1 + $0xf0] sm:$0xff]  ;;  %v57_v1 = vld [vmem:[%s577_s1 + $0xe0] sm:$0xff]  ;;  %v60_v2 = vld [vmem:[%s577_s1 + $0xf8] sm:$0xff] }
   0x2   :  { %67 = vmatpush.msra.mxu0 %v59_v0  ;;  %90 = vmatpush.msra.mxu1 %v60_v2  ;;  %v58_v3 = vld [vmem:[%s577_s1 + $0xe8] sm:$0xff]  ;;  %v55_v4 = vld [vmem:[%s577_s1 + $0xd0] sm:$0xff]  ;;  %v56_v5 = vld [vmem:[%s577_s1 + $0xd8] sm:$0xff] }
   0x3   :  { %v53_v6 = vld [vmem:[%s577_s1 + $0xc0] sm:$0xff]  ;;  %v54_v7 = vld [vmem:[%s577_s1 + $0xc8] sm:$0xff]  ;;  %v51_v8 = vld [vmem:[%s577_s1 + $0xb0] sm:$0xff] }
   0x4   :  { %68 = vmatpush.msra.mxu0 %v57_v1  ;;  %91 = vmatpush.msra.mxu1 %v58_v3  ;;  %v52_v9 = vld [vmem:[%s577_s1 + $0xb8] sm:$0xff]  ;;  %v49_v10 = vld [vmem:[%s577_s1 + $0xa0] sm:$0xff]  ;;  %v50_v11 = vld [vmem:[%s577_s1 + $0xa8] sm:$0xff] }
   0x5   :  { %v47_v12 = vld [vmem:[%s577_s1 + $0x90] sm:$0xff]  ;;  %v48_v13 = vld [vmem:[%s577_s1 + $0x98] sm:$0xff]  ;;  %v45_v16 = vld [vmem:[%s577_s1 + $0x80] sm:$0xff] }
   0x6   :  { %69 = vmatpush.msra.mxu0 %v55_v4  ;;  %92 = vmatpush.msra.mxu1 %v56_v5  ;;  %v132_v14 = vld [vmem:[%s579_s3 + $0x78] sm:$0xff]  ;;  %v131_v15 = vld [vmem:[%s579_s3 + $0x70] sm:$0xff]  ;;  %v46_v17 = vld [vmem:[%s577_s1 + $0x88] sm:$0xff] }
   0x7   :  { %153 = vmatpush.msra.mxu2 %v132_v14  ;;  %v148_v18 = vld [vmem:[%s579_s3 + $0xf8] sm:$0xff]  ;;  %v130_v19 = vld [vmem:[%s579_s3 + $0x68] sm:$0xff]  ;;  %v147_v20 = vld [vmem:[%s579_s3 + $0xf0] sm:$0xff] }
   0x8   :  { %70 = vmatpush.msra.mxu0 %v53_v6  ;;  %93 = vmatpush.msra.mxu1 %v54_v7  ;;  %v43_v21 = vld [vmem:[%s577_s1 + $0x70] sm:$0xff]  ;;  %v44_v22 = vld [vmem:[%s577_s1 + $0x78] sm:$0xff]  ;;  %v129_v23 = vld [vmem:[%s579_s3 + $0x60] sm:$0xff] }
   0x9   :  { %154 = vmatpush.msra.mxu2 %v131_v15  ;;  %176 = vmatpush.msra.mxu3 %v148_v18  ;;  %v146_v24 = vld [vmem:[%s579_s3 + $0xe8] sm:$0xff]  ;;  %v41_v25 = vld [vmem:[%s577_s1 + $0x60] sm:$0xff]  ;;  %v128_v27 = vld [vmem:[%s579_s3 + $0x58] sm:$0xff] }
   0xa   :  { %71 = vmatpush.msra.mxu0 %v51_v8  ;;  %94 = vmatpush.msra.mxu1 %v52_v9  ;;  %v42_v26 = vld [vmem:[%s577_s1 + $0x68] sm:$0xff]  ;;  %v145_v28 = vld [vmem:[%s579_s3 + $0xe0] sm:$0xff]  ;;  %v39_v29 = vld [vmem:[%s577_s1 + $0x50] sm:$0xff] }
   0xb   :  { %155 = vmatpush.msra.mxu2 %v130_v19  ;;  %177 = vmatpush.msra.mxu3 %v147_v20  ;;  %v37_v30 = vld [vmem:[%s577_s1 + $0x40] sm:$0xff]  ;;  %v40_v31 = vld [vmem:[%s577_s1 + $0x58] sm:$0xff]  ;;  %v38_v32 = vld [vmem:[%s577_s1 + $0x48] sm:$0xff] }
   0xc   :  { %72 = vmatpush.msra.mxu0 %v49_v10  ;;  %95 = vmatpush.msra.mxu1 %v50_v11  ;;  %v127_v33 = vld [vmem:[%s579_s3 + $0x50] sm:$0xff]  ;;  %v144_v34 = vld [vmem:[%s579_s3 + $0xd8] sm:$0xff]  ;;  %v126_v35 = vld [vmem:[%s579_s3 + $0x48] sm:$0xff] }
   0xd   :  { %156 = vmatpush.msra.mxu2 %v129_v23  ;;  %178 = vmatpush.msra.mxu3 %v146_v24  ;;  %v143_v36 = vld [vmem:[%s579_s3 + $0xd0] sm:$0xff] }
   0xe   :  { %73 = vmatpush.msra.mxu0 %v47_v12  ;;  %96 = vmatpush.msra.mxu1 %v48_v13 }
   0xf   :  { %157 = vmatpush.msra.mxu2 %v128_v27  ;;  %179 = vmatpush.msra.mxu3 %v145_v28 }
  0x10   :  { %74 = vmatpush.msra.mxu0 %v45_v16  ;;  %97 = vmatpush.msra.mxu1 %v46_v17 }
  0x12   :  { %75 = vmatpush.msra.mxu0 %v43_v21  ;;  %98 = vmatpush.msra.mxu1 %v44_v22 }
  0x14   :  { %76 = vmatpush.msra.mxu0 %v41_v25  ;;  %99 = vmatpush.msra.mxu1 %v42_v26 }
  0x16   :  { %77 = vmatpush.msra.mxu0 %v39_v29  ;;  %100 = vmatpush.msra.mxu1 %v40_v31 }
  0x17   :  { %12 = vsyncpa [#allocation3], 0  ;;  %v35_v37 = vld [vmem:[%s577_s1 + $0x30] sm:$0xff]  ;;  %v36_v38 = vld [vmem:[%s577_s1 + $0x38] sm:$0xff]  ;;  %158 = vmatpush.msra.mxu2 %v127_v33  ;;  %180 = vmatpush.msra.mxu3 %v144_v34  ;;  %v319_v28 = vmov 128.0   ;;  %s268_s23 = sshll.u32 %s583_s7, 4  ;;  %s269_s23 = int_to_ptr.hbm [resolvable:$true] %s268_s23 }
  0x18   :  { %78 = vmatpush.msra.mxu0 %v37_v30  ;;  %101 = vmatpush.msra.mxu1 %v38_v32  ;;  %v125_v39 = vld [vmem:[%s579_s3 + $0x40] sm:$0xff]  ;;  %v142_v40 = vld [vmem:[%s579_s3 + $0xc8] sm:$0xff]  ;;  %v124_v43 = vld [vmem:[%s579_s3 + $0x38] sm:$0xff]  ;;  %287 = vrcp.f32 %v319_v28  ;;  %s322_s24 = smov 8  }
  0x19   :  { %v33_v41 = vld [vmem:[%s577_s1 + $0x20] sm:$0xff]  ;;  %v34_v42 = vld [vmem:[%s577_s1 + $0x28] sm:$0xff]  ;;  %159 = vmatpush.msra.mxu2 %v126_v35  ;;  %181 = vmatpush.msra.mxu3 %v143_v36  ;;  %v31_v45 = vld [vmem:[%s577_s1 + $0x10] sm:$0xff] }
  0x1a   :  { %79 = vmatpush.msra.mxu0 %v35_v37  ;;  %102 = vmatpush.msra.mxu1 %v36_v38  ;;  %v141_v44 = vld [vmem:[%s579_s3 + $0xc0] sm:$0xff]  ;;  %v32_v46 = vld [vmem:[%s577_s1 + $0x18] sm:$0xff]  ;;  %v123_v47 = vld [vmem:[%s579_s3 + $0x30] sm:$0xff] }
  0x1b   :  { %160 = vmatpush.msra.mxu2 %v125_v39  ;;  %182 = vmatpush.msra.mxu3 %v142_v40  ;;  %v140_v48 = vld [vmem:[%s579_s3 + $0xb8] sm:$0xff]  ;;  %v29_v49 = vld [vmem:[%s577_s1] sm:$0xff]  ;;  %v30_v50 = vld [vmem:[%s577_s1 + $0x8] sm:$0xff] }
  0x1c   :  { %80 = vmatpush.msra.mxu0 %v33_v41  ;;  %103 = vmatpush.msra.mxu1 %v34_v42  ;;  %v27_v51 = vld [vmem:[%s576_s0] sm:$0xff]  ;;  %v122_v52 = vld [vmem:[%s579_s3 + $0x28] sm:$0xff]  ;;  %v139_v53 = vld [vmem:[%s579_s3 + $0xb0] sm:$0xff] }
  0x1d   :  { %161 = vmatpush.msra.mxu2 %v124_v43  ;;  %183 = vmatpush.msra.mxu3 %v141_v44  ;;  %v121_v54 = vld [vmem:[%s579_s3 + $0x20] sm:$0xff]  ;;  %v138_v55 = vld [vmem:[%s579_s3 + $0xa8] sm:$0xff]  ;;  %v120_v56 = vld [vmem:[%s579_s3 + $0x18] sm:$0xff] }
  0x1e   :  { %81 = vmatpush.msra.mxu0 %v31_v45  ;;  %104 = vmatpush.msra.mxu1 %v32_v46  ;;  %v137_v57 = vld [vmem:[%s579_s3 + $0xa0] sm:$0xff]  ;;  %v28_v58 = vld [vmem:[%s576_s0 + $0x8] sm:$0xff]  ;;  %v119_v59 = vld [vmem:[%s579_s3 + $0x10] sm:$0xff]  ;;  %v288_v29 = vpop.eup %287 }
  0x1f   :  { %162 = vmatpush.msra.mxu2 %v123_v47  ;;  %184 = vmatpush.msra.mxu3 %v140_v48  ;;  %v136_v60 = vld [vmem:[%s579_s3 + $0x98] sm:$0xff]  ;;  %v118_v61 = vld [vmem:[%s579_s3 + $0x8] sm:$0xff]  ;;  %v135_v62 = vld [vmem:[%s579_s3 + $0x90] sm:$0xff]  ;;  %v206_v30 = vmul.f32 128.0, %v288_v29  ;;  %vm210_vm0 = vweird.f32 %v288_v29 }
  0x20   :  { %82 = vmatpush.msra.mxu0 %v29_v49  ;;  %105 = vmatpush.msra.mxu1 %v30_v50  ;;  %v117_v63 = vld [vmem:[%s579_s3] sm:$0xff]  ;;  %v134_v0 = vld [vmem:[%s579_s3 + $0x88] sm:$0xff] }
  0x21   :  { %83 = vmatmul.f32.vlgmr.msra.gmra.mxu0 %v27_v51  ;;  %106 = vmatmul.f32.vlgmr.msra.gmra.mxu1 %v27_v51  ;;  %v133_v1 = vld [vmem:[%s579_s3 + $0x80] sm:$0xff]  ;;  %v207_v31 = vsub.f32 1.0, %v206_v30 }
  0x22   :  { %163 = vmatpush.msra.mxu2 %v122_v52  ;;  %185 = vmatpush.msra.mxu3 %v139_v53  ;;  %v61_v2 = vld [vmem:[%s578_s2] sm:$0x3] }
  0x23   :  { %v63_v3 = vperm.slane %v61_v2, 0  ;;  %v64_v4 = vperm.slane %v61_v2, 1  ;;  %v284_v17 = vld [vmem:[%s580_s4] ss:$0 sm:$0xff]  ;;  %v208_v32 = vmul.f32 %v288_v29, %v207_v31 }
  0x24   :  { %164 = vmatpush.msra.mxu2 %v121_v54  ;;  %186 = vmatpush.msra.mxu3 %v138_v55 }
  0x25   :  { %v209_v33 = vadd.f32 %v288_v29, %v208_v32 }
  0x26   :  { %165 = vmatpush.msra.mxu2 %v120_v56  ;;  %187 = vmatpush.msra.mxu3 %v137_v57  ;;  %v285_v57 = vld [vmem:[%s581_s5] ss:$0 sm:$0xff]  ;;  %s320_s5 = smov [#allocation2]  }
  0x27   :  { %v211_v34 = vsel %vm210_vm0, %v288_v29, %v209_v33  ;;  %s266_s20 = sshll.u32 %s320_s5, 4  ;;  %s267_s20 = int_to_ptr.vmem [resolvable:$true] %s266_s20 }
  0x28   :  { %166 = vmatpush.msra.mxu2 %v119_v59  ;;  %188 = vmatpush.msra.mxu3 %v136_v60 }
  0x29   :  { %86 = vmatmul.f32.gmra.mxu0 %v28_v58  ;;  %109 = vmatmul.f32.gmra.mxu1 %v28_v58 }
  0x2a   :  { %167 = vmatpush.msra.mxu2 %v118_v61  ;;  %189 = vmatpush.msra.mxu3 %v135_v62  ;;  %v286_v61 = vld [vmem:[%s582_s6] ss:$0 sm:$0xff]  ;;  %s321_s6 = smov 128  }
  0x2c   :  { %168 = vmatpush.msra.mxu2 %v117_v63  ;;  %190 = vmatpush.msra.mxu3 %v134_v0 }
  0x2e   :  { %191 = vmatpush.msra.mxu3 %v133_v1 }
  0x9e   :  { %v84_v5 = vpop.f32.mrf.mxu0  ;;  %v107_v6 = vpop.f32.mrf.mxu1 }
  0x9f   :  { %v85_v7 = vadd.f32 %v84_v5, %v63_v3  ;;  %v108_v8 = vadd.f32 %v107_v6, %v64_v4 }
  0xa1   :  { %v113_v9 = vmax.f32 %v85_v7, 0.0  ;;  %v114_v10 = vmax.f32 %v108_v8, 0.0 }
  0xa3   :  { %169 = vmatmul.f32.vlgmr.msra.gmra.mxu2 %v113_v9  ;;  %192 = vmatmul.f32.vlgmr.msra.gmra.mxu3 %v114_v10 }
  0xa6   :  { %v87_v11 = vpop.f32.mrf.mxu0  ;;  %v110_v12 = vpop.f32.mrf.mxu1 }
  0xa7   :  { %v88_v13 = vadd.f32 %v87_v11, %v63_v3  ;;  %v111_v14 = vadd.f32 %v110_v12, %v64_v4 }
  0xa9   :  { %v115_v15 = vmax.f32 %v88_v13, 0.0  ;;  %v116_v16 = vmax.f32 %v111_v14, 0.0 }
  0xab   :  { %172 = vmatmul.f32.gmra.mxu2 %v115_v15  ;;  %195 = vmatmul.f32.gmra.mxu3 %v116_v16 }
 0x126   :  { %v170_v18 = vpop.f32.mrf.mxu2  ;;  %v193_v19 = vpop.f32.mrf.mxu3 }
 0x127   :  { %v171_v20 = vadd.f32 %v284_v17, %v170_v18 }
 0x129   :  { %v194_v21 = vadd.f32 %v193_v19, %v171_v20 }
 0x12b   :  { %v199_v22 = vadd.f32 %v194_v21, %v27_v51 }
 0x12d   :  { %201 = vadd.xlane.f32.xlu0 %v199_v22 }
 0x12e   :  { %v173_v23 = vpop.f32.mrf.mxu2  ;;  %v196_v24 = vpop.f32.mrf.mxu3 }
 0x12f   :  { %v174_v25 = vadd.f32 %v284_v17, %v173_v23 }
 0x131   :  { %v197_v26 = vadd.f32 %v196_v24, %v174_v25 }
 0x133   :  { %v200_v27 = vadd.f32 %v197_v26, %v28_v58 }
 0x135   :  { %203 = vadd.xlane.f32.xlu0 %v200_v27 }
 0x1a0   :  { %v202_v35 = vpop.xlane.xlu0 %201 }
 0x1a1   :  { %v212_v36 = vmul.f32 %v211_v34, %v202_v35 }
 0x1a3   :  { %v214_v37 = vsub.f32 %v199_v22, %v212_v36 }
 0x1a5   :  { %v216_v38 = vmul.f32 %v214_v37, %v214_v37 }
 0x1a7   :  { %218 = vadd.xlane.f32.xlu1 %v216_v38 }
 0x1a8   :  { %v204_v39 = vpop.xlane.xlu0 %203 }
 0x1a9   :  { %v213_v40 = vmul.f32 %v211_v34, %v204_v39 }
 0x1ab   :  { %v215_v41 = vsub.f32 %v200_v27, %v213_v40 }
 0x1ad   :  { %v217_v42 = vmul.f32 %v215_v41, %v215_v41 }
 0x1af   :  { %220 = vadd.xlane.f32.xlu1 %v217_v42 }
 0x21a   :  { %v219_v43 = vpop.xlane.xlu1 %218 }
 0x21b   :  { %v222_v44 = vmul.f32 %v219_v43, %v211_v34 }
 0x21d   :  { %v224_v45 = vadd.f32 1e-06, %v222_v44 }
 0x21f   :  { %289 = vrsqrt.f32 %v224_v45  ;;  %vm232_vm2 = vweird.f32 %v224_v45 }
 0x222   :  { %v221_v46 = vpop.xlane.xlu1 %220 }
 0x223   :  { %v223_v47 = vmul.f32 %v221_v46, %v211_v34 }
 0x225   :  { %v290_v48 = vpop.eup %289  ;;  %v225_v49 = vadd.f32 1e-06, %v223_v47 }
 0x226   :  { %v227_v50 = vmul.f32 %v290_v48, %v224_v45  ;;  %vm233_vm1 = vweird.f32 %v290_v48 }
 0x227   :  { %291 = vrsqrt.f32 %v225_v49  ;;  %vm234_vm3 = vmor %vm232_vm2, %vm233_vm1  ;;  %vm242_vm5 = vweird.f32 %v225_v49 }
 0x228   :  { %v228_v51 = vmul.f32 %v290_v48, %v227_v50 }
 0x22a   :  { %v229_v52 = vmul.f32 0.5, %v228_v51 }
 0x22c   :  { %v230_v53 = vsub.f32 1.5, %v229_v52 }
 0x22d   :  { %v292_v54 = vpop.eup %291 }
 0x22e   :  { %v231_v55 = vmul.f32 %v290_v48, %v230_v53  ;;  %v237_v56 = vmul.f32 %v292_v54, %v225_v49  ;;  %vm243_vm4 = vweird.f32 %v292_v54 }
 0x22f   :  { %vm244_vm6 = vmor %vm242_vm5, %vm243_vm4 }
 0x230   :  { %v235_v58 = vsel %vm234_vm3, %v290_v48, %v231_v55  ;;  %v238_v59 = vmul.f32 %v292_v54, %v237_v56 }
 0x231   :  { %v246_v60 = vmul.f32 %v235_v58, %v214_v37 }
 0x232   :  { %v239_v62 = vmul.f32 0.5, %v238_v59 }
 0x233   :  { %v252_v63 = vmul.f32 %v285_v57, %v246_v60 }
 0x234   :  { %v240_v0 = vsub.f32 1.5, %v239_v62 }
 0x235   :  { %v258_v1 = vadd.f32 %v286_v61, %v252_v63 }
 0x236   :  { %v241_v2 = vmul.f32 %v292_v54, %v240_v0 }
 0x237   :  { %260 = vst [vmem:[#allocation2] sm:$0xff] %v258_v1 }
 0x238   :  { %v245_v3 = vsel %vm244_vm6, %v292_v54, %v241_v2 }
 0x239   :  { %v247_v4 = vmul.f32 %v245_v3, %v215_v41 }
 0x23b   :  { %v253_v5 = vmul.f32 %v285_v57, %v247_v4 }
 0x23d   :  { %v259_v6 = vadd.f32 %v286_v61, %v253_v5 }
 0x23f   :  { %261 = vst [vmem:[#allocation2 + $0x8] sm:$0xff] %v259_v6 }
 0x240   :  { %274 = dma.vmem_to_hbm [thread:$0]  %s267_s20, 256, %s269_s23, [#allocation3], %s321_s6, %s321_s6, %s322_s24  }
 0x241   :  { %317 = dma.done.wait [#allocation3], 256  }
 0x242   :  { %318 = vsyncadd [#allocation3], 4294967040 }
 0x243   :  { %279 = vsyncpa [#allocation3], 1 }

</bundles_post_ra>
